<compile_context>
chip_gen: v7x
topology: tpu7x:2x2x1
jax: 0.10.0
libtpu: 0.0.40
codegen_flags: <defaults>
</compile_context>

<pallas_src>
import numpy as np
import jax
import jax.numpy as jnp
from jax.experimental import pallas as pl
from jax.experimental.pallas import tpu as pltpu


# ----------------------------------- kernel ------------------------------------------

def _make_kernel(e1p, n_clusters):
    """e1p: padded width of encoder/projection layer 1 (for the fused-matmul split).
    n_clusters: real (unpadded) number of clusters, for masking the padded lanes."""

    def kernel(
        x_ref,
        w1c, b1c,                       # fused [we1 | wp1], [be1 | bp1]
        we2, be2, we3, be3, wz, bz,
        wd1, bd1, wd2, bd2, wd3, bd3, wxb, bxb,
        wp2, bp2, wp3, bp3, wp4, bp4, wp5, bp5,
        clus_ref, csq_ref,
        xbar_out, q_out, pred_out, z_out,
    ):
        x = x_ref[...]                                      # [T, in_p] f32

        def mm(a, w_ref, b_ref):
            # bf16 MXU matmul with f32 accumulation, f32 bias add.
            y = jnp.dot(a.astype(jnp.bfloat16), w_ref[...],
                        preferred_element_type=jnp.float32)
            return y + b_ref[...]

        def mm_relu(a, w_ref, b_ref):
            return jnp.maximum(mm(a, w_ref, b_ref), 0.0)

        # ---------------- layer 1 (fused encoder enc_1 + projection proj1) ----------
        l1 = jnp.maximum(mm(x, w1c, b1c), 0.0)              # [T, 2*e1p]
        tra1 = l1[:, :e1p]                                  # relu(enc_1(x))
        h1 = l1[:, e1p:]                                    # relu(proj1(x))  (SpatialConv == identity)

        # ---------------- autoencoder ------------------------------------------------
        tra2 = mm_relu(tra1, we2, be2)
        tra3 = mm_relu(tra2, we3, be3)
        z = mm(tra3, wz, bz)                                # latent z (f32)

        d1 = mm_relu(z, wd1, bd1)
        d2 = mm_relu(d1, wd2, bd2)
        d3 = mm_relu(d2, wd3, bd3)
        x_bar = mm(d3, wxb, bxb)

        # ---------------- spatial / projection branch --------------------------------
        sigma = 0.5
        h2 = mm_relu((1.0 - sigma) * h1 + sigma * tra1, wp2, bp2)
        h3 = mm_relu((1.0 - sigma) * h2 + sigma * tra2, wp3, bp3)
        h4 = mm_relu((1.0 - sigma) * h3 + sigma * tra3, wp4, bp4)
        h5 = mm((1.0 - sigma) * h4 + sigma * z, wp5, bp5)   # [T, kp]

        # softmax over the real cluster columns (padded lanes masked to -inf / 0)
        col = jax.lax.broadcasted_iota(jnp.int32, h5.shape, 1)
        valid = col < n_clusters
        h5m = jnp.where(valid, h5, -jnp.inf)
        m = jnp.max(h5m, axis=1, keepdims=True)
        e = jnp.where(valid, jnp.exp(h5m - m), 0.0)
        pred = e * pl.reciprocal(jnp.sum(e, axis=1, keepdims=True), approx=True)

        # ---------------- Student-t soft assignment q (v == 1) ------------------------
        clus = clus_ref[...]                                # [kp, zp] f32
        z_sq = jnp.sum(z * z, axis=1, keepdims=True)        # [T, 1]
        cross = jnp.dot(z, clus.T, preferred_element_type=jnp.float32)   # [T, kp]
        dist2 = jnp.maximum(z_sq + csq_ref[...] - 2.0 * cross, 0.0)
        qraw = 1.0 / (1.0 + dist2)                          # v = 1; pow((v+1)/2) == identity
        qraw = jnp.where(valid, qraw, 0.0)
        q = qraw * pl.reciprocal(jnp.sum(qraw, axis=1, keepdims=True), approx=True)

        xbar_out[...] = x_bar
        q_out[...] = q
        pred_out[...] = pred
        z_out[...] = z

    return kernel


# ----------------------------------- wrapper ------------------------------------------

def _rup(n, m=128):
    return ((n + m - 1) // m) * m


def sdcn_spatial_forward(x, adj, params, *, tile_n=128):
    """x: [N, n_input], adj: [N, N] (unused — SpatialConv treated as identity)."""
    del adj  # TODO(synk): adjacency only feeds the undefined external SpatialConv layers.
    N, n_input = x.shape
    K, n_z = params["cluster_layer"].shape

    # layer widths from the (pre-transposed) weights
    e1 = params["we1"].shape[1]
    e2 = params["we2"].shape[1]
    e3 = params["we3"].shape[1]
    d1 = params["wd1"].shape[1]
    d2 = params["wd2"].shape[1]
    d3 = params["wd3"].shape[1]

    in_p, e1p, e2p, e3p = _rup(n_input), _rup(e1), _rup(e2), _rup(e3)
    d1p, d2p, d3p = _rup(d1), _rup(d2), _rup(d3)
    zp, kp = _rup(n_z), _rup(K)
    n_pad = _rup(N, tile_n)

    f32, bf16 = jnp.float32, jnp.bfloat16

    def pad2(a, r, c, dtype):
        a = jnp.asarray(a, f32)
        a = jnp.pad(a, ((0, r - a.shape[0]), (0, c - a.shape[1])))
        return a.astype(dtype)

    W = lambda name, r, c: pad2(params[name], r, c, bf16)   # weights -> bf16
    B = lambda name, c: pad2(params[name], 1, c, f32)       # biases  -> f32

    # fused layer-1 weights/biases (encoder enc_1 | projection proj1)
    w1c = jnp.concatenate([W("we1", in_p, e1p), W("wp1", in_p, e1p)], axis=1)
    b1c = jnp.concatenate([B("be1", e1p), B("bp1", e1p)], axis=1)

    clus_p = pad2(params["cluster_layer"], kp, zp, f32)
    csq = jnp.sum(clus_p * clus_p, axis=1, keepdims=True).T          # [1, kp], hoisted

    args = (
        pad2(x, n_pad, in_p, f32),
        w1c, b1c,
        W("we2", e1p, e2p), B("be2", e2p),
        W("we3", e2p, e3p), B("be3", e3p),
        W("wz", e3p, zp), B("bz", zp),
        W("wd1", zp, d1p), B("bd1", d1p),
        W("wd2", d1p, d2p), B("bd2", d2p),
        W("wd3", d2p, d3p), B("bd3", d3p),
        W("wxb", d3p, in_p), B("bxb", in_p),
        W("wp2", e1p, e2p), B("bp2", e2p),
        W("wp3", e2p, e3p), B("bp3", e3p),
        W("wp4", e3p, zp), B("bp4", zp),
        W("wp5", zp, kp), B("bp5", kp),
        clus_p, csq,
    )

    grid = (n_pad // tile_n,)
    x_spec = pl.BlockSpec((tile_n, in_p), lambda i: (i, 0))
    const_spec = lambda a: pl.BlockSpec(a.shape, lambda i: (0, 0))   # VMEM-resident params
    in_specs = [x_spec] + [const_spec(a) for a in args[1:]]
    out_specs = (
        pl.BlockSpec((tile_n, in_p), lambda i: (i, 0)),
        pl.BlockSpec((tile_n, kp), lambda i: (i, 0)),
        pl.BlockSpec((tile_n, kp), lambda i: (i, 0)),
        pl.BlockSpec((tile_n, zp), lambda i: (i, 0)),
    )
    out_shapes = (
        jax.ShapeDtypeStruct((n_pad, in_p), f32),   # x_bar (padded)
        jax.ShapeDtypeStruct((n_pad, kp), f32),     # q     (padded)
        jax.ShapeDtypeStruct((n_pad, kp), f32),     # pred  (padded)
        jax.ShapeDtypeStruct((n_pad, zp), f32),     # z     (padded)
    )

    # explicit VMEM budget: resident params (double-buffered bound) + tile I/O + activations
    param_bytes = sum(int(np.prod(a.shape)) * a.dtype.itemsize for a in args[1:])
    tile_io_bytes = tile_n * 4 * (2 * in_p + 2 * kp + zp)
    act_bytes = tile_n * 4 * (2 * e1p + 2 * e2p + 2 * e3p + 2 * zp
                              + d1p + d2p + d3p + in_p + 3 * kp)
    vmem_bytes = int(1.5 * (2 * param_bytes + 2 * tile_io_bytes + act_bytes))
    vmem_bytes = min(max(vmem_bytes, 4 << 20), 48 << 20)

    kernel = _make_kernel(e1p, K)
    x_bar_p, q_p, pred_p, z_p = pl.pallas_call(
        kernel,
        out_shape=out_shapes,
        grid_spec=pltpu.PrefetchScalarGridSpec(
            num_scalar_prefetch=0,
            grid=grid,
            in_specs=in_specs,
            out_specs=out_specs,
        ),
        compiler_params=pltpu.CompilerParams(
            dimension_semantics=("parallel",),
            vmem_limit_bytes=vmem_bytes,
        ),
    )(*args)

    # strip the lane / row padding
    return (x_bar_p[:N, :n_input], q_p[:N, :K], pred_p[:N, :K], z_p[:N, :n_z])


# ------------------------------ deterministic params --------------------------------

def _init_linear(key, fan_in, fan_out):
    # PyTorch-default-style uniform init; weight stored pre-transposed as [in, out].
    kw, kb = jax.random.split(key)
    bound = 1.0 / np.sqrt(fan_in)
    w = jax.random.uniform(kw, (fan_in, fan_out), jnp.float32, -bound, bound)
    b = jax.random.uniform(kb, (1, fan_out), jnp.float32, -bound, bound)
    return w, b


def make_params(key, n_enc_1, n_enc_2, n_enc_3, n_dec_1, n_dec_2, n_dec_3,
                n_input, n_z, n_clusters):
    keys = jax.random.split(key, 14)
    p = {}
    p["we1"], p["be1"] = _init_linear(keys[0], n_input, n_enc_1)
    p["we2"], p["be2"] = _init_linear(keys[1], n_enc_1, n_enc_2)
    p["we3"], p["be3"] = _init_linear(keys[2], n_enc_2, n_enc_3)
    p["wz"], p["bz"] = _init_linear(keys[3], n_enc_3, n_z)
    p["wd1"], p["bd1"] = _init_linear(keys[4], n_z, n_dec_1)
    p["wd2"], p["bd2"] = _init_linear(keys[5], n_dec_1, n_dec_2)
    p["wd3"], p["bd3"] = _init_linear(keys[6], n_dec_2, n_dec_3)
    p["wxb"], p["bxb"] = _init_linear(keys[7], n_dec_3, n_input)
    p["wp1"], p["bp1"] = _init_linear(keys[8], n_input, n_enc_1)
    p["wp2"], p["bp2"] = _init_linear(keys[9], n_enc_1, n_enc_2)
    p["wp3"], p["bp3"] = _init_linear(keys[10], n_enc_2, n_enc_3)
    p["wp4"], p["bp4"] = _init_linear(keys[11], n_enc_3, n_z)
    p["wp5"], p["bp5"] = _init_linear(keys[12], n_z, n_clusters)
    # cluster_layer: xavier_normal_ on [n_clusters, n_z]
    std = np.sqrt(2.0 / (n_clusters + n_z))
    p["cluster_layer"] = std * jax.random.normal(keys[13], (n_clusters, n_z), jnp.float32)
    return p


# ------------------------------------- main ------------------------------------------

if __name__ == "__main__":
    # small shapes consistent with the module
    N = 16           # number of nodes
    n_input = 16
    n_enc_1 = n_enc_2 = n_enc_3 = 32
    n_dec_1 = n_dec_2 = n_dec_3 = 32
    n_z = 8
    n_clusters = 4

    key = jax.random.PRNGKey(0)
    kx, kadj, kp = jax.random.split(key, 3)
    x = jax.random.normal(kx, (N, n_input), jnp.float32)
    adj = (jax.random.uniform(kadj, (N, N)) > 0.7).astype(jnp.float32)  # unused (identity SpatialConv)
    params = make_params(kp, n_enc_1, n_enc_2, n_enc_3, n_dec_1, n_dec_2, n_dec_3,
                         n_input, n_z, n_clusters)

    x_bar, q, predict, z = sdcn_spatial_forward(x, adj, params)
    jax.block_until_ready((x_bar, q, predict, z))

    assert x_bar.shape == (N, n_input)
    assert q.shape == (N, n_clusters)
    assert predict.shape == (N, n_clusters)
    assert z.shape == (N, n_z)
    assert bool(jnp.all(jnp.isfinite(x_bar))) and bool(jnp.all(jnp.isfinite(q)))
    assert bool(jnp.all(jnp.isfinite(predict))) and bool(jnp.all(jnp.isfinite(z)))
    # row sums of the two normalized distributions should be ~1
    assert bool(jnp.all(jnp.abs(jnp.sum(predict, axis=1) - 1.0) < 1e-2))
    assert bool(jnp.all(jnp.abs(jnp.sum(q, axis=1) - 1.0) < 1e-2))
    print("KERNEL_OK")
</pallas_src>

<mosaic_0001>
module attributes {stable_mosaic.version = 11 : i64} {
  func.func @kernel(%arg0: i32, %arg1: memref<128x128xf32, #tpu.memory_space<vmem>>, %arg2: memref<128x256xbf16, #tpu.memory_space<vmem>>, %arg3: memref<1x256xf32, #tpu.memory_space<vmem>>, %arg4: memref<128x128xbf16, #tpu.memory_space<vmem>>, %arg5: memref<1x128xf32, #tpu.memory_space<vmem>>, %arg6: memref<128x128xbf16, #tpu.memory_space<vmem>>, %arg7: memref<1x128xf32, #tpu.memory_space<vmem>>, %arg8: memref<128x128xbf16, #tpu.memory_space<vmem>>, %arg9: memref<1x128xf32, #tpu.memory_space<vmem>>, %arg10: memref<128x128xbf16, #tpu.memory_space<vmem>>, %arg11: memref<1x128xf32, #tpu.memory_space<vmem>>, %arg12: memref<128x128xbf16, #tpu.memory_space<vmem>>, %arg13: memref<1x128xf32, #tpu.memory_space<vmem>>, %arg14: memref<128x128xbf16, #tpu.memory_space<vmem>>, %arg15: memref<1x128xf32, #tpu.memory_space<vmem>>, %arg16: memref<128x128xbf16, #tpu.memory_space<vmem>>, %arg17: memref<1x128xf32, #tpu.memory_space<vmem>>, %arg18: memref<128x128xbf16, #tpu.memory_space<vmem>>, %arg19: memref<1x128xf32, #tpu.memory_space<vmem>>, %arg20: memref<128x128xbf16, #tpu.memory_space<vmem>>, %arg21: memref<1x128xf32, #tpu.memory_space<vmem>>, %arg22: memref<128x128xbf16, #tpu.memory_space<vmem>>, %arg23: memref<1x128xf32, #tpu.memory_space<vmem>>, %arg24: memref<128x128xbf16, #tpu.memory_space<vmem>>, %arg25: memref<1x128xf32, #tpu.memory_space<vmem>>, %arg26: memref<128x128xf32, #tpu.memory_space<vmem>>, %arg27: memref<1x128xf32, #tpu.memory_space<vmem>>, %arg28: memref<128x128xf32, #tpu.memory_space<vmem>>, %arg29: memref<128x128xf32, #tpu.memory_space<vmem>>, %arg30: memref<128x128xf32, #tpu.memory_space<vmem>>, %arg31: memref<128x128xf32, #tpu.memory_space<vmem>>) attributes {dimension_semantics = [#tpu.dimension_semantics<parallel>], iteration_bounds = array<i64: 1>, scalar_prefetch = 0 : i64, scratch_operands = 0 : i64, tpu.core_type = #tpu.core_type<tc>, window_params = [{transform_indices = @transform_0, window_bounds = array<i64: 128, 128>}, {pipeline_mode = #tpu.pipeline_mode<synchronous>, transform_indices = @transform_1, window_bounds = array<i64: 128, 256>}, {pipeline_mode = #tpu.pipeline_mode<synchronous>, transform_indices = @transform_2, window_bounds = array<i64: 1, 256>}, {pipeline_mode = #tpu.pipeline_mode<synchronous>, transform_indices = @transform_3, window_bounds = array<i64: 128, 128>}, {pipeline_mode = #tpu.pipeline_mode<synchronous>, transform_indices = @transform_4, window_bounds = array<i64: 1, 128>}, {pipeline_mode = #tpu.pipeline_mode<synchronous>, transform_indices = @transform_5, window_bounds = array<i64: 128, 128>}, {pipeline_mode = #tpu.pipeline_mode<synchronous>, transform_indices = @transform_6, window_bounds = array<i64: 1, 128>}, {pipeline_mode = #tpu.pipeline_mode<synchronous>, transform_indices = @transform_7, window_bounds = array<i64: 128, 128>}, {pipeline_mode = #tpu.pipeline_mode<synchronous>, transform_indices = @transform_8, window_bounds = array<i64: 1, 128>}, {pipeline_mode = #tpu.pipeline_mode<synchronous>, transform_indices = @transform_9, window_bounds = array<i64: 128, 128>}, {pipeline_mode = #tpu.pipeline_mode<synchronous>, transform_indices = @transform_10, window_bounds = array<i64: 1, 128>}, {pipeline_mode = #tpu.pipeline_mode<synchronous>, transform_indices = @transform_11, window_bounds = array<i64: 128, 128>}, {pipeline_mode = #tpu.pipeline_mode<synchronous>, transform_indices = @transform_12, window_bounds = array<i64: 1, 128>}, {pipeline_mode = #tpu.pipeline_mode<synchronous>, transform_indices = @transform_13, window_bounds = array<i64: 128, 128>}, {pipeline_mode = #tpu.pipeline_mode<synchronous>, transform_indices = @transform_14, window_bounds = array<i64: 1, 128>}, {pipeline_mode = #tpu.pipeline_mode<synchronous>, transform_indices = @transform_15, window_bounds = array<i64: 128, 128>}, {pipeline_mode = #tpu.pipeline_mode<synchronous>, transform_indices = @transform_16, window_bounds = array<i64: 1, 128>}, {pipeline_mode = #tpu.pipeline_mode<synchronous>, transform_indices = @transform_17, window_bounds = array<i64: 128, 128>}, {pipeline_mode = #tpu.pipeline_mode<synchronous>, transform_indices = @transform_18, window_bounds = array<i64: 1, 128>}, {pipeline_mode = #tpu.pipeline_mode<synchronous>, transform_indices = @transform_19, window_bounds = array<i64: 128, 128>}, {pipeline_mode = #tpu.pipeline_mode<synchronous>, transform_indices = @transform_20, window_bounds = array<i64: 1, 128>}, {pipeline_mode = #tpu.pipeline_mode<synchronous>, transform_indices = @transform_21, window_bounds = array<i64: 128, 128>}, {pipeline_mode = #tpu.pipeline_mode<synchronous>, transform_indices = @transform_22, window_bounds = array<i64: 1, 128>}, {pipeline_mode = #tpu.pipeline_mode<synchronous>, transform_indices = @transform_23, window_bounds = array<i64: 128, 128>}, {pipeline_mode = #tpu.pipeline_mode<synchronous>, transform_indices = @transform_24, window_bounds = array<i64: 1, 128>}, {pipeline_mode = #tpu.pipeline_mode<synchronous>, transform_indices = @transform_25, window_bounds = array<i64: 128, 128>}, {pipeline_mode = #tpu.pipeline_mode<synchronous>, transform_indices = @transform_26, window_bounds = array<i64: 1, 128>}, {transform_indices = @transform_27, window_bounds = array<i64: 128, 128>}, {transform_indices = @transform_28, window_bounds = array<i64: 128, 128>}, {transform_indices = @transform_29, window_bounds = array<i64: 128, 128>}, {transform_indices = @transform_30, window_bounds = array<i64: 128, 128>}]} {
    %c0 = arith.constant 0 : index
    %c0_0 = arith.constant 0 : index
    %0 = vector.load %arg1[%c0, %c0_0] : memref<128x128xf32, #tpu.memory_space<vmem>>, vector<128x128xf32>
    %1 = arith.truncf %0 : vector<128x128xf32> to vector<128x128xbf16>
    %c0_1 = arith.constant 0 : index
    %c0_2 = arith.constant 0 : index
    %2 = vector.load %arg2[%c0_1, %c0_2] : memref<128x256xbf16, #tpu.memory_space<vmem>>, vector<128x256xbf16>
    %cst = arith.constant dense<0.000000e+00> : vector<128x256xf32>
    %3 = tpu.matmul %1, %2, %cst {dimension_numbers = #tpu.dot_dimension_numbers<[1], [0], [0], [1], [0, 0, 1, 1], [], []>} : vector<128x128xbf16>, vector<128x256xbf16>, vector<128x256xf32> -> vector<128x256xf32>
    %c0_3 = arith.constant 0 : index
    %c0_4 = arith.constant 0 : index
    %4 = vector.load %arg3[%c0_3, %c0_4] : memref<1x256xf32, #tpu.memory_space<vmem>>, vector<1x256xf32>
    %5 = vector.broadcast %4 : vector<1x256xf32> to vector<128x256xf32>
    %6 = arith.addf %3, %5 : vector<128x256xf32>
    %cst_5 = arith.constant 0.000000e+00 : f32
    %7 = vector.broadcast %cst_5 : f32 to vector<128x256xf32>
    %8 = arith.maximumf %6, %7 : vector<128x256xf32>
    %9 = vector.extract_strided_slice %8 {offsets = [0, 0], sizes = [128, 128], strides = [1, 1]} : vector<128x256xf32> to vector<128x128xf32>
    %10 = vector.extract_strided_slice %8 {offsets = [0, 128], sizes = [128, 128], strides = [1, 1]} : vector<128x256xf32> to vector<128x128xf32>
    %11 = arith.truncf %9 : vector<128x128xf32> to vector<128x128xbf16>
    %c0_6 = arith.constant 0 : index
    %c0_7 = arith.constant 0 : index
    %12 = vector.load %arg4[%c0_6, %c0_7] : memref<128x128xbf16, #tpu.memory_space<vmem>>, vector<128x128xbf16>
    %cst_8 = arith.constant dense<0.000000e+00> : vector<128x128xf32>
    %13 = tpu.matmul %11, %12, %cst_8 {dimension_numbers = #tpu.dot_dimension_numbers<[1], [0], [0], [1], [0, 0, 1, 1], [], []>} : vector<128x128xbf16>, vector<128x128xbf16>, vector<128x128xf32> -> vector<128x128xf32>
    %c0_9 = arith.constant 0 : index
    %c0_10 = arith.constant 0 : index
    %14 = vector.load %arg5[%c0_9, %c0_10] : memref<1x128xf32, #tpu.memory_space<vmem>>, vector<1x128xf32>
    %15 = vector.broadcast %14 : vector<1x128xf32> to vector<128x128xf32>
    %16 = arith.addf %13, %15 : vector<128x128xf32>
    %cst_11 = arith.constant 0.000000e+00 : f32
    %17 = vector.broadcast %cst_11 : f32 to vector<128x128xf32>
    %18 = arith.maximumf %16, %17 : vector<128x128xf32>
    %19 = arith.truncf %18 : vector<128x128xf32> to vector<128x128xbf16>
    %c0_12 = arith.constant 0 : index
    %c0_13 = arith.constant 0 : index
    %20 = vector.load %arg6[%c0_12, %c0_13] : memref<128x128xbf16, #tpu.memory_space<vmem>>, vector<128x128xbf16>
    %cst_14 = arith.constant dense<0.000000e+00> : vector<128x128xf32>
    %21 = tpu.matmul %19, %20, %cst_14 {dimension_numbers = #tpu.dot_dimension_numbers<[1], [0], [0], [1], [0, 0, 1, 1], [], []>} : vector<128x128xbf16>, vector<128x128xbf16>, vector<128x128xf32> -> vector<128x128xf32>
    %c0_15 = arith.constant 0 : index
    %c0_16 = arith.constant 0 : index
    %22 = vector.load %arg7[%c0_15, %c0_16] : memref<1x128xf32, #tpu.memory_space<vmem>>, vector<1x128xf32>
    %23 = vector.broadcast %22 : vector<1x128xf32> to vector<128x128xf32>
    %24 = arith.addf %21, %23 : vector<128x128xf32>
    %cst_17 = arith.constant 0.000000e+00 : f32
    %25 = vector.broadcast %cst_17 : f32 to vector<128x128xf32>
    %26 = arith.maximumf %24, %25 : vector<128x128xf32>
    %27 = arith.truncf %26 : vector<128x128xf32> to vector<128x128xbf16>
    %c0_18 = arith.constant 0 : index
    %c0_19 = arith.constant 0 : index
    %28 = vector.load %arg8[%c0_18, %c0_19] : memref<128x128xbf16, #tpu.memory_space<vmem>>, vector<128x128xbf16>
    %cst_20 = arith.constant dense<0.000000e+00> : vector<128x128xf32>
    %29 = tpu.matmul %27, %28, %cst_20 {dimension_numbers = #tpu.dot_dimension_numbers<[1], [0], [0], [1], [0, 0, 1, 1], [], []>} : vector<128x128xbf16>, vector<128x128xbf16>, vector<128x128xf32> -> vector<128x128xf32>
    %c0_21 = arith.constant 0 : index
    %c0_22 = arith.constant 0 : index
    %30 = vector.load %arg9[%c0_21, %c0_22] : memref<1x128xf32, #tpu.memory_space<vmem>>, vector<1x128xf32>
    %31 = vector.broadcast %30 : vector<1x128xf32> to vector<128x128xf32>
    %32 = arith.addf %29, %31 : vector<128x128xf32>
    %33 = arith.truncf %32 : vector<128x128xf32> to vector<128x128xbf16>
    %c0_23 = arith.constant 0 : index
    %c0_24 = arith.constant 0 : index
    %34 = vector.load %arg10[%c0_23, %c0_24] : memref<128x128xbf16, #tpu.memory_space<vmem>>, vector<128x128xbf16>
    %cst_25 = arith.constant dense<0.000000e+00> : vector<128x128xf32>
    %35 = tpu.matmul %33, %34, %cst_25 {dimension_numbers = #tpu.dot_dimension_numbers<[1], [0], [0], [1], [0, 0, 1, 1], [], []>} : vector<128x128xbf16>, vector<128x128xbf16>, vector<128x128xf32> -> vector<128x128xf32>
    %c0_26 = arith.constant 0 : index
    %c0_27 = arith.constant 0 : index
    %36 = vector.load %arg11[%c0_26, %c0_27] : memref<1x128xf32, #tpu.memory_space<vmem>>, vector<1x128xf32>
    %37 = vector.broadcast %36 : vector<1x128xf32> to vector<128x128xf32>
    %38 = arith.addf %35, %37 : vector<128x128xf32>
    %cst_28 = arith.constant 0.000000e+00 : f32
    %39 = vector.broadcast %cst_28 : f32 to vector<128x128xf32>
    %40 = arith.maximumf %38, %39 : vector<128x128xf32>
    %41 = arith.truncf %40 : vector<128x128xf32> to vector<128x128xbf16>
    %c0_29 = arith.constant 0 : index
    %c0_30 = arith.constant 0 : index
    %42 = vector.load %arg12[%c0_29, %c0_30] : memref<128x128xbf16, #tpu.memory_space<vmem>>, vector<128x128xbf16>
    %cst_31 = arith.constant dense<0.000000e+00> : vector<128x128xf32>
    %43 = tpu.matmul %41, %42, %cst_31 {dimension_numbers = #tpu.dot_dimension_numbers<[1], [0], [0], [1], [0, 0, 1, 1], [], []>} : vector<128x128xbf16>, vector<128x128xbf16>, vector<128x128xf32> -> vector<128x128xf32>
    %c0_32 = arith.constant 0 : index
    %c0_33 = arith.constant 0 : index
    %44 = vector.load %arg13[%c0_32, %c0_33] : memref<1x128xf32, #tpu.memory_space<vmem>>, vector<1x128xf32>
    %45 = vector.broadcast %44 : vector<1x128xf32> to vector<128x128xf32>
    %46 = arith.addf %43, %45 : vector<128x128xf32>
    %cst_34 = arith.constant 0.000000e+00 : f32
    %47 = vector.broadcast %cst_34 : f32 to vector<128x128xf32>
    %48 = arith.maximumf %46, %47 : vector<128x128xf32>
    %49 = arith.truncf %48 : vector<128x128xf32> to vector<128x128xbf16>
    %c0_35 = arith.constant 0 : index
    %c0_36 = arith.constant 0 : index
    %50 = vector.load %arg14[%c0_35, %c0_36] : memref<128x128xbf16, #tpu.memory_space<vmem>>, vector<128x128xbf16>
    %cst_37 = arith.constant dense<0.000000e+00> : vector<128x128xf32>
    %51 = tpu.matmul %49, %50, %cst_37 {dimension_numbers = #tpu.dot_dimension_numbers<[1], [0], [0], [1], [0, 0, 1, 1], [], []>} : vector<128x128xbf16>, vector<128x128xbf16>, vector<128x128xf32> -> vector<128x128xf32>
    %c0_38 = arith.constant 0 : index
    %c0_39 = arith.constant 0 : index
    %52 = vector.load %arg15[%c0_38, %c0_39] : memref<1x128xf32, #tpu.memory_space<vmem>>, vector<1x128xf32>
    %53 = vector.broadcast %52 : vector<1x128xf32> to vector<128x128xf32>
    %54 = arith.addf %51, %53 : vector<128x128xf32>
    %cst_40 = arith.constant 0.000000e+00 : f32
    %55 = vector.broadcast %cst_40 : f32 to vector<128x128xf32>
    %56 = arith.maximumf %54, %55 : vector<128x128xf32>
    %57 = arith.truncf %56 : vector<128x128xf32> to vector<128x128xbf16>
    %c0_41 = arith.constant 0 : index
    %c0_42 = arith.constant 0 : index
    %58 = vector.load %arg16[%c0_41, %c0_42] : memref<128x128xbf16, #tpu.memory_space<vmem>>, vector<128x128xbf16>
    %cst_43 = arith.constant dense<0.000000e+00> : vector<128x128xf32>
    %59 = tpu.matmul %57, %58, %cst_43 {dimension_numbers = #tpu.dot_dimension_numbers<[1], [0], [0], [1], [0, 0, 1, 1], [], []>} : vector<128x128xbf16>, vector<128x128xbf16>, vector<128x128xf32> -> vector<128x128xf32>
    %c0_44 = arith.constant 0 : index
    %c0_45 = arith.constant 0 : index
    %60 = vector.load %arg17[%c0_44, %c0_45] : memref<1x128xf32, #tpu.memory_space<vmem>>, vector<1x128xf32>
    %61 = vector.broadcast %60 : vector<1x128xf32> to vector<128x128xf32>
    %62 = arith.addf %59, %61 : vector<128x128xf32>
    %cst_46 = arith.constant 5.000000e-01 : f32
    %63 = vector.broadcast %cst_46 : f32 to vector<128x128xf32>
    %64 = arith.mulf %63, %10 : vector<128x128xf32>
    %cst_47 = arith.constant 5.000000e-01 : f32
    %65 = vector.broadcast %cst_47 : f32 to vector<128x128xf32>
    %66 = arith.mulf %65, %9 : vector<128x128xf32>
    %67 = arith.addf %64, %66 : vector<128x128xf32>
    %68 = arith.truncf %67 : vector<128x128xf32> to vector<128x128xbf16>
    %c0_48 = arith.constant 0 : index
    %c0_49 = arith.constant 0 : index
    %69 = vector.load %arg18[%c0_48, %c0_49] : memref<128x128xbf16, #tpu.memory_space<vmem>>, vector<128x128xbf16>
    %cst_50 = arith.constant dense<0.000000e+00> : vector<128x128xf32>
    %70 = tpu.matmul %68, %69, %cst_50 {dimension_numbers = #tpu.dot_dimension_numbers<[1], [0], [0], [1], [0, 0, 1, 1], [], []>} : vector<128x128xbf16>, vector<128x128xbf16>, vector<128x128xf32> -> vector<128x128xf32>
    %c0_51 = arith.constant 0 : index
    %c0_52 = arith.constant 0 : index
    %71 = vector.load %arg19[%c0_51, %c0_52] : memref<1x128xf32, #tpu.memory_space<vmem>>, vector<1x128xf32>
    %72 = vector.broadcast %71 : vector<1x128xf32> to vector<128x128xf32>
    %73 = arith.addf %70, %72 : vector<128x128xf32>
    %cst_53 = arith.constant 0.000000e+00 : f32
    %74 = vector.broadcast %cst_53 : f32 to vector<128x128xf32>
    %75 = arith.maximumf %73, %74 : vector<128x128xf32>
    %cst_54 = arith.constant 5.000000e-01 : f32
    %76 = vector.broadcast %cst_54 : f32 to vector<128x128xf32>
    %77 = arith.mulf %76, %75 : vector<128x128xf32>
    %cst_55 = arith.constant 5.000000e-01 : f32
    %78 = vector.broadcast %cst_55 : f32 to vector<128x128xf32>
    %79 = arith.mulf %78, %18 : vector<128x128xf32>
    %80 = arith.addf %77, %79 : vector<128x128xf32>
    %81 = arith.truncf %80 : vector<128x128xf32> to vector<128x128xbf16>
    %c0_56 = arith.constant 0 : index
    %c0_57 = arith.constant 0 : index
    %82 = vector.load %arg20[%c0_56, %c0_57] : memref<128x128xbf16, #tpu.memory_space<vmem>>, vector<128x128xbf16>
    %cst_58 = arith.constant dense<0.000000e+00> : vector<128x128xf32>
    %83 = tpu.matmul %81, %82, %cst_58 {dimension_numbers = #tpu.dot_dimension_numbers<[1], [0], [0], [1], [0, 0, 1, 1], [], []>} : vector<128x128xbf16>, vector<128x128xbf16>, vector<128x128xf32> -> vector<128x128xf32>
    %c0_59 = arith.constant 0 : index
    %c0_60 = arith.constant 0 : index
    %84 = vector.load %arg21[%c0_59, %c0_60] : memref<1x128xf32, #tpu.memory_space<vmem>>, vector<1x128xf32>
    %85 = vector.broadcast %84 : vector<1x128xf32> to vector<128x128xf32>
    %86 = arith.addf %83, %85 : vector<128x128xf32>
    %cst_61 = arith.constant 0.000000e+00 : f32
    %87 = vector.broadcast %cst_61 : f32 to vector<128x128xf32>
    %88 = arith.maximumf %86, %87 : vector<128x128xf32>
    %cst_62 = arith.constant 5.000000e-01 : f32
    %89 = vector.broadcast %cst_62 : f32 to vector<128x128xf32>
    %90 = arith.mulf %89, %88 : vector<128x128xf32>
    %cst_63 = arith.constant 5.000000e-01 : f32
    %91 = vector.broadcast %cst_63 : f32 to vector<128x128xf32>
    %92 = arith.mulf %91, %26 : vector<128x128xf32>
    %93 = arith.addf %90, %92 : vector<128x128xf32>
    %94 = arith.truncf %93 : vector<128x128xf32> to vector<128x128xbf16>
    %c0_64 = arith.constant 0 : index
    %c0_65 = arith.constant 0 : index
    %95 = vector.load %arg22[%c0_64, %c0_65] : memref<128x128xbf16, #tpu.memory_space<vmem>>, vector<128x128xbf16>
    %cst_66 = arith.constant dense<0.000000e+00> : vector<128x128xf32>
    %96 = tpu.matmul %94, %95, %cst_66 {dimension_numbers = #tpu.dot_dimension_numbers<[1], [0], [0], [1], [0, 0, 1, 1], [], []>} : vector<128x128xbf16>, vector<128x128xbf16>, vector<128x128xf32> -> vector<128x128xf32>
    %c0_67 = arith.constant 0 : index
    %c0_68 = arith.constant 0 : index
    %97 = vector.load %arg23[%c0_67, %c0_68] : memref<1x128xf32, #tpu.memory_space<vmem>>, vector<1x128xf32>
    %98 = vector.broadcast %97 : vector<1x128xf32> to vector<128x128xf32>
    %99 = arith.addf %96, %98 : vector<128x128xf32>
    %cst_69 = arith.constant 0.000000e+00 : f32
    %100 = vector.broadcast %cst_69 : f32 to vector<128x128xf32>
    %101 = arith.maximumf %99, %100 : vector<128x128xf32>
    %cst_70 = arith.constant 5.000000e-01 : f32
    %102 = vector.broadcast %cst_70 : f32 to vector<128x128xf32>
    %103 = arith.mulf %102, %101 : vector<128x128xf32>
    %cst_71 = arith.constant 5.000000e-01 : f32
    %104 = vector.broadcast %cst_71 : f32 to vector<128x128xf32>
    %105 = arith.mulf %104, %32 : vector<128x128xf32>
    %106 = arith.addf %103, %105 : vector<128x128xf32>
    %107 = arith.truncf %106 : vector<128x128xf32> to vector<128x128xbf16>
    %c0_72 = arith.constant 0 : index
    %c0_73 = arith.constant 0 : index
    %108 = vector.load %arg24[%c0_72, %c0_73] : memref<128x128xbf16, #tpu.memory_space<vmem>>, vector<128x128xbf16>
    %cst_74 = arith.constant dense<0.000000e+00> : vector<128x128xf32>
    %109 = tpu.matmul %107, %108, %cst_74 {dimension_numbers = #tpu.dot_dimension_numbers<[1], [0], [0], [1], [0, 0, 1, 1], [], []>} : vector<128x128xbf16>, vector<128x128xbf16>, vector<128x128xf32> -> vector<128x128xf32>
    %c0_75 = arith.constant 0 : index
    %c0_76 = arith.constant 0 : index
    %110 = vector.load %arg25[%c0_75, %c0_76] : memref<1x128xf32, #tpu.memory_space<vmem>>, vector<1x128xf32>
    %111 = vector.broadcast %110 : vector<1x128xf32> to vector<128x128xf32>
    %112 = arith.addf %109, %111 : vector<128x128xf32>
    %113 = tpu.iota {dimensions = array<i32: 1>} : vector<128x128xi32>
    %c4_i32 = arith.constant 4 : i32
    %114 = vector.broadcast %c4_i32 : i32 to vector<128x128xi32>
    %115 = arith.cmpi slt, %113, %114 : vector<128x128xi32>
    %cst_77 = arith.constant 0xFF800000 : f32
    %116 = vector.broadcast %cst_77 : f32 to vector<128x128xf32>
    %117 = arith.select %115, %112, %116 : vector<128x128xi1>, vector<128x128xf32>
    %cst_78 = arith.constant dense<0xFF800000> : vector<128xf32>
    %118 = vector.multi_reduction <maximumf>, %117, %cst_78 [1] : vector<128x128xf32> to vector<128xf32>
    %119 = vector.shape_cast %118 : vector<128xf32> to vector<128x1xf32>
    %120 = vector.broadcast %119 : vector<128x1xf32> to vector<128x128xf32>
    %121 = arith.subf %117, %120 : vector<128x128xf32>
    %122 = math.exp %121 : vector<128x128xf32>
    %cst_79 = arith.constant 0.000000e+00 : f32
    %123 = vector.broadcast %cst_79 : f32 to vector<128x128xf32>
    %124 = arith.select %115, %122, %123 : vector<128x128xi1>, vector<128x128xf32>
    %cst_80 = arith.constant dense<0.000000e+00> : vector<128xf32>
    %125 = vector.multi_reduction <add>, %124, %cst_80 [1] : vector<128x128xf32> to vector<128xf32>
    %126 = vector.shape_cast %125 : vector<128xf32> to vector<128x1xf32>
    %127 = tpu.reciprocal %126 {approx = true} : vector<128x1xf32> -> vector<128x1xf32>
    %128 = vector.broadcast %127 : vector<128x1xf32> to vector<128x128xf32>
    %129 = arith.mulf %124, %128 : vector<128x128xf32>
    %c0_81 = arith.constant 0 : index
    %c0_82 = arith.constant 0 : index
    %130 = vector.load %arg26[%c0_81, %c0_82] : memref<128x128xf32, #tpu.memory_space<vmem>>, vector<128x128xf32>
    %131 = arith.mulf %32, %32 : vector<128x128xf32>
    %cst_83 = arith.constant dense<0.000000e+00> : vector<128xf32>
    %132 = vector.multi_reduction <add>, %131, %cst_83 [1] : vector<128x128xf32> to vector<128xf32>
    %133 = vector.shape_cast %132 : vector<128xf32> to vector<128x1xf32>
    %134 = tpu.transpose %130, [1, 0] : vector<128x128xf32> -> vector<128x128xf32>
    %cst_84 = arith.constant dense<0.000000e+00> : vector<128x128xf32>
    %135 = tpu.matmul %32, %134, %cst_84 {dimension_numbers = #tpu.dot_dimension_numbers<[1], [0], [0], [1], [0, 0, 1, 1], [], []>} : vector<128x128xf32>, vector<128x128xf32>, vector<128x128xf32> -> vector<128x128xf32>
    %c0_85 = arith.constant 0 : index
    %c0_86 = arith.constant 0 : index
    %136 = vector.load %arg27[%c0_85, %c0_86] : memref<1x128xf32, #tpu.memory_space<vmem>>, vector<1x128xf32>
    %137 = vector.broadcast %133 : vector<128x1xf32> to vector<128x128xf32>
    %138 = vector.broadcast %136 : vector<1x128xf32> to vector<128x128xf32>
    %139 = arith.addf %137, %138 : vector<128x128xf32>
    %cst_87 = arith.constant 2.000000e+00 : f32
    %140 = vector.broadcast %cst_87 : f32 to vector<128x128xf32>
    %141 = arith.mulf %140, %135 : vector<128x128xf32>
    %142 = arith.subf %139, %141 : vector<128x128xf32>
    %cst_88 = arith.constant 0.000000e+00 : f32
    %143 = vector.broadcast %cst_88 : f32 to vector<128x128xf32>
    %144 = arith.maximumf %142, %143 : vector<128x128xf32>
    %cst_89 = arith.constant 1.000000e+00 : f32
    %145 = vector.broadcast %cst_89 : f32 to vector<128x128xf32>
    %146 = arith.addf %145, %144 : vector<128x128xf32>
    %cst_90 = arith.constant 1.000000e+00 : f32
    %147 = vector.broadcast %cst_90 : f32 to vector<128x128xf32>
    %148 = arith.divf %147, %146 : vector<128x128xf32>
    %cst_91 = arith.constant 0.000000e+00 : f32
    %149 = vector.broadcast %cst_91 : f32 to vector<128x128xf32>
    %150 = arith.select %115, %148, %149 : vector<128x128xi1>, vector<128x128xf32>
    %cst_92 = arith.constant dense<0.000000e+00> : vector<128xf32>
    %151 = vector.multi_reduction <add>, %150, %cst_92 [1] : vector<128x128xf32> to vector<128xf32>
    %152 = vector.shape_cast %151 : vector<128xf32> to vector<128x1xf32>
    %153 = tpu.reciprocal %152 {approx = true} : vector<128x1xf32> -> vector<128x1xf32>
    %154 = vector.broadcast %153 : vector<128x1xf32> to vector<128x128xf32>
    %155 = arith.mulf %150, %154 : vector<128x128xf32>
    %c0_93 = arith.constant 0 : index
    %c0_94 = arith.constant 0 : index
    %156 = vector.load %arg28[%c0_93, %c0_94] : memref<128x128xf32, #tpu.memory_space<vmem>>, vector<128x128xf32>
    tpu.vector_store %arg28[%c0_93, %c0_94], %62 {strides = array<i32>} : memref<128x128xf32, #tpu.memory_space<vmem>>, vector<128x128xf32>,
    %c0_95 = arith.constant 0 : index
    %c0_96 = arith.constant 0 : index
    %157 = vector.load %arg29[%c0_95, %c0_96] : memref<128x128xf32, #tpu.memory_space<vmem>>, vector<128x128xf32>
    tpu.vector_store %arg29[%c0_95, %c0_96], %155 {strides = array<i32>} : memref<128x128xf32, #tpu.memory_space<vmem>>, vector<128x128xf32>,
    %c0_97 = arith.constant 0 : index
    %c0_98 = arith.constant 0 : index
    %158 = vector.load %arg30[%c0_97, %c0_98] : memref<128x128xf32, #tpu.memory_space<vmem>>, vector<128x128xf32>
    tpu.vector_store %arg30[%c0_97, %c0_98], %129 {strides = array<i32>} : memref<128x128xf32, #tpu.memory_space<vmem>>, vector<128x128xf32>,
    %c0_99 = arith.constant 0 : index
    %c0_100 = arith.constant 0 : index
    %159 = vector.load %arg31[%c0_99, %c0_100] : memref<128x128xf32, #tpu.memory_space<vmem>>, vector<128x128xf32>
    tpu.vector_store %arg31[%c0_99, %c0_100], %32 {strides = array<i32>} : memref<128x128xf32, #tpu.memory_space<vmem>>, vector<128x128xf32>,
    return
  }
  func.func @transform_0(%arg0: i32) -> (i32, i32) {
    %c0_i32 = arith.constant 0 : i32
    %c0_i32_0 = arith.constant 0 : i32
    return %arg0, %c0_i32 : i32, i32
  }
  func.func @transform_1(%arg0: i32) -> (i32, i32) {
    %c0_i32 = arith.constant 0 : i32
    %c0_i32_0 = arith.constant 0 : i32
    %c0_i32_1 = arith.constant 0 : i32
    return %c0_i32, %c0_i32_0 : i32, i32
  }
  func.func @transform_2(%arg0: i32) -> (i32, i32) {
    %c0_i32 = arith.constant 0 : i32
    %c0_i32_0 = arith.constant 0 : i32
    %c0_i32_1 = arith.constant 0 : i32
    return %c0_i32, %c0_i32_0 : i32, i32
  }
  func.func @transform_3(%arg0: i32) -> (i32, i32) {
    %c0_i32 = arith.constant 0 : i32
    %c0_i32_0 = arith.constant 0 : i32
    %c0_i32_1 = arith.constant 0 : i32
    return %c0_i32, %c0_i32_0 : i32, i32
  }
  func.func @transform_4(%arg0: i32) -> (i32, i32) {
    %c0_i32 = arith.constant 0 : i32
    %c0_i32_0 = arith.constant 0 : i32
    %c0_i32_1 = arith.constant 0 : i32
    return %c0_i32, %c0_i32_0 : i32, i32
  }
  func.func @transform_5(%arg0: i32) -> (i32, i32) {
    %c0_i32 = arith.constant 0 : i32
    %c0_i32_0 = arith.constant 0 : i32
    %c0_i32_1 = arith.constant 0 : i32
    return %c0_i32, %c0_i32_0 : i32, i32
  }
  func.func @transform_6(%arg0: i32) -> (i32, i32) {
    %c0_i32 = arith.constant 0 : i32
    %c0_i32_0 = arith.constant 0 : i32
    %c0_i32_1 = arith.constant 0 : i32
    return %c0_i32, %c0_i32_0 : i32, i32
  }
  func.func @transform_7(%arg0: i32) -> (i32, i32) {
    %c0_i32 = arith.constant 0 : i32
    %c0_i32_0 = arith.constant 0 : i32
    %c0_i32_1 = arith.constant 0 : i32
    return %c0_i32, %c0_i32_0 : i32, i32
  }
  func.func @transform_8(%arg0: i32) -> (i32, i32) {
    %c0_i32 = arith.constant 0 : i32
    %c0_i32_0 = arith.constant 0 : i32
    %c0_i32_1 = arith.constant 0 : i32
    return %c0_i32, %c0_i32_0 : i32, i32
  }
  func.func @transform_9(%arg0: i32) -> (i32, i32) {
    %c0_i32 = arith.constant 0 : i32
    %c0_i32_0 = arith.constant 0 : i32
    %c0_i32_1 = arith.constant 0 : i32
    return %c0_i32, %c0_i32_0 : i32, i32
  }
  func.func @transform_10(%arg0: i32) -> (i32, i32) {
    %c0_i32 = arith.constant 0 : i32
    %c0_i32_0 = arith.constant 0 : i32
    %c0_i32_1 = arith.constant 0 : i32
    return %c0_i32, %c0_i32_0 : i32, i32
  }
  func.func @transform_11(%arg0: i32) -> (i32, i32) {
    %c0_i32 = arith.constant 0 : i32
    %c0_i32_0 = arith.constant 0 : i32
    %c0_i32_1 = arith.constant 0 : i32
    return %c0_i32, %c0_i32_0 : i32, i32
  }
  func.func @transform_12(%arg0: i32) -> (i32, i32) {
    %c0_i32 = arith.constant 0 : i32
    %c0_i32_0 = arith.constant 0 : i32
    %c0_i32_1 = arith.constant 0 : i32
    return %c0_i32, %c0_i32_0 : i32, i32
  }
  func.func @transform_13(%arg0: i32) -> (i32, i32) {
    %c0_i32 = arith.constant 0 : i32
    %c0_i32_0 = arith.constant 0 : i32
    %c0_i32_1 = arith.constant 0 : i32
    return %c0_i32, %c0_i32_0 : i32, i32
  }
  func.func @transform_14(%arg0: i32) -> (i32, i32) {
    %c0_i32 = arith.constant 0 : i32
    %c0_i32_0 = arith.constant 0 : i32
    %c0_i32_1 = arith.constant 0 : i32
    return %c0_i32, %c0_i32_0 : i32, i32
  }
  func.func @transform_15(%arg0: i32) -> (i32, i32) {
    %c0_i32 = arith.constant 0 : i32
    %c0_i32_0 = arith.constant 0 : i32
    %c0_i32_1 = arith.constant 0 : i32
    return %c0_i32, %c0_i32_0 : i32, i32
  }
  func.func @transform_16(%arg0: i32) -> (i32, i32) {
    %c0_i32 = arith.constant 0 : i32
    %c0_i32_0 = arith.constant 0 : i32
    %c0_i32_1 = arith.constant 0 : i32
    return %c0_i32, %c0_i32_0 : i32, i32
  }
  func.func @transform_17(%arg0: i32) -> (i32, i32) {
    %c0_i32 = arith.constant 0 : i32
    %c0_i32_0 = arith.constant 0 : i32
    %c0_i32_1 = arith.constant 0 : i32
    return %c0_i32, %c0_i32_0 : i32, i32
  }
  func.func @transform_18(%arg0: i32) -> (i32, i32) {
    %c0_i32 = arith.constant 0 : i32
    %c0_i32_0 = arith.constant 0 : i32
    %c0_i32_1 = arith.constant 0 : i32
    return %c0_i32, %c0_i32_0 : i32, i32
  }
  func.func @transform_19(%arg0: i32) -> (i32, i32) {
    %c0_i32 = arith.constant 0 : i32
    %c0_i32_0 = arith.constant 0 : i32
    %c0_i32_1 = arith.constant 0 : i32
    return %c0_i32, %c0_i32_0 : i32, i32
  }
  func.func @transform_20(%arg0: i32) -> (i32, i32) {
    %c0_i32 = arith.constant 0 : i32
    %c0_i32_0 = arith.constant 0 : i32
    %c0_i32_1 = arith.constant 0 : i32
    return %c0_i32, %c0_i32_0 : i32, i32
  }
  func.func @transform_21(%arg0: i32) -> (i32, i32) {
    %c0_i32 = arith.constant 0 : i32
    %c0_i32_0 = arith.constant 0 : i32
    %c0_i32_1 = arith.constant 0 : i32
    return %c0_i32, %c0_i32_0 : i32, i32
  }
  func.func @transform_22(%arg0: i32) -> (i32, i32) {
    %c0_i32 = arith.constant 0 : i32
    %c0_i32_0 = arith.constant 0 : i32
    %c0_i32_1 = arith.constant 0 : i32
    return %c0_i32, %c0_i32_0 : i32, i32
  }
  func.func @transform_23(%arg0: i32) -> (i32, i32) {
    %c0_i32 = arith.constant 0 : i32
    %c0_i32_0 = arith.constant 0 : i32
    %c0_i32_1 = arith.constant 0 : i32
    return %c0_i32, %c0_i32_0 : i32, i32
  }
  func.func @transform_24(%arg0: i32) -> (i32, i32) {
    %c0_i32 = arith.constant 0 : i32
    %c0_i32_0 = arith.constant 0 : i32
    %c0_i32_1 = arith.constant 0 : i32
    return %c0_i32, %c0_i32_0 : i32, i32
  }
  func.func @transform_25(%arg0: i32) -> (i32, i32) {
    %c0_i32 = arith.constant 0 : i32
    %c0_i32_0 = arith.constant 0 : i32
    %c0_i32_1 = arith.constant 0 : i32
    return %c0_i32, %c0_i32_0 : i32, i32
  }
  func.func @transform_26(%arg0: i32) -> (i32, i32) {
    %c0_i32 = arith.constant 0 : i32
    %c0_i32_0 = arith.constant 0 : i32
    %c0_i32_1 = arith.constant 0 : i32
    return %c0_i32, %c0_i32_0 : i32, i32
  }
  func.func @transform_27(%arg0: i32) -> (i32, i32) {
    %c0_i32 = arith.constant 0 : i32
    %c0_i32_0 = arith.constant 0 : i32
    return %arg0, %c0_i32 : i32, i32
  }
  func.func @transform_28(%arg0: i32) -> (i32, i32) {
    %c0_i32 = arith.constant 0 : i32
    %c0_i32_0 = arith.constant 0 : i32
    return %arg0, %c0_i32 : i32, i32
  }
  func.func @transform_29(%arg0: i32) -> (i32, i32) {
    %c0_i32 = arith.constant 0 : i32
    %c0_i32_0 = arith.constant 0 : i32
    return %arg0, %c0_i32 : i32, i32
  }
  func.func @transform_30(%arg0: i32) -> (i32, i32) {
    %c0_i32 = arith.constant 0 : i32
    %c0_i32_0 = arith.constant 0 : i32
    return %arg0, %c0_i32 : i32, i32
  }
}

</mosaic_0001>

<bundles_post_ra>
// kernel: tpu_custom_call.1
= control target key start
LH: loop header
LB: loop body
LE: loop exit
PB: predicated region body
PF: predicated region fallthrough
CT: control target
= control target key end

     0   :  { %s5339_s6 = smov 1   ;;  %s5340_s10 = smov 2   ;;  %s6656_s0 = inlined_call_operand.smem [shape: u32[31], index: -1, kind: input, shape index: {}] }
   0x1   :  { %s5407_s5 = sld [smem:[%s6656_s0]]   ;;  %s5341_s14 = smov 3  }
   0x2   :  { %s5412_s9 = sld [smem:[%s6656_s0 + %s5339_s6]]   ;;  %s5342_s18 = smov 4  }
   0x3   :  { %s5417_s13 = sld [smem:[%s6656_s0 + %s5340_s10]]   ;;  %s5343_s22 = smov 5  }
   0x4   :  { %s5422_s17 = sld [smem:[%s6656_s0 + %s5341_s14]]   ;;  %s5344_s26 = smov 6  }
   0x5   :  { %s5427_s21 = sld [smem:[%s6656_s0 + %s5342_s18]]   ;;  %s5345_s30 = smov 7  }
   0x6   :  { %s5432_s25 = sld [smem:[%s6656_s0 + %s5343_s22]]   ;;  %s5346_s4 = smov 8  }
   0x7   :  { %s5437_s29 = sld [smem:[%s6656_s0 + %s5344_s26]]   ;;  %s5347_s10 = smov 9  }
   0x8   :  { %s5442_s3 = sld [smem:[%s6656_s0 + %s5345_s30]]   ;;  %s5348_s15 = smov 10  }
   0x9   :  { %s5447_s8 = sld [smem:[%s6656_s0 + %s5346_s4]]   ;;  %s5349_s20 = smov 11  }
   0xa   :  { %s5452_s14 = sld [smem:[%s6656_s0 + %s5347_s10]]   ;;  %s5350_s26 = smov 12  }
   0xb   :  { %s5457_s19 = sld [smem:[%s6656_s0 + %s5348_s15]]   ;;  %s5351_s1 = smov 13  }
   0xc   :  { %s5462_s24 = sld [smem:[%s6656_s0 + %s5349_s20]]   ;;  %s5352_s7 = smov 14  }
   0xd   :  { %s5467_s30 = sld [smem:[%s6656_s0 + %s5350_s26]]   ;;  %s5353_s15 = smov 15  }
   0xe   :  { %s5472_s6 = sld [smem:[%s6656_s0 + %s5351_s1]]   ;;  %s5354_s22 = smov 16  }
   0xf   :  { %6705 = sst [smem:[#allocation55_spill]] %s5447_s8  ;;  %s5355_s28 = smov 17  }
  0x10   :  { %s5477_s12 = sld [smem:[%s6656_s0 + %s5352_s7]]   ;;  %s5356_s7 = smov 18  }
  0x11   :  { %6706 = sst [smem:[#allocation56_spill]] %s5457_s19 }
  0x12   :  { %s5482_s20 = sld [smem:[%s6656_s0 + %s5353_s15]]   ;;  %s5357_s15 = smov 19  }
  0x13   :  { %6707 = sst [smem:[#allocation57_spill]] %s5467_s30 }
  0x14   :  { %s5487_s27 = sld [smem:[%s6656_s0 + %s5354_s22]]   ;;  %s5358_s22 = smov 20  }
  0x15   :  { %s5492_s4 = sld [smem:[%s6656_s0 + %s5355_s28]]   ;;  %s5359_s28 = smov 21  }
  0x16   :  { %6708 = sst [smem:[#allocation58_spill]] %s5477_s12 }
  0x17   :  { %s5497_s12 = sld [smem:[%s6656_s0 + %s5356_s7]]   ;;  %s5360_s7 = smov 22  }
  0x18   :  { %s5502_s30 = sld [smem:[%s6656_s0 + %s5357_s15]]   ;;  %s5361_s15 = smov 23  }
  0x19   :  { %s5522_s19 = sld [smem:[%s6656_s0 + %s5361_s15]]   ;;  %s5365_s15 = smov 27  }
  0x1a   :  { %6709 = sst [smem:[#allocation59_spill]] %s5487_s27 }
  0x1b   :  { %6710 = sst [smem:[#allocation60_spill]] %s5492_s4 }
  0x1c   :  { %s5507_s27 = sld [smem:[%s6656_s0 + %s5358_s22]]   ;;  %s5362_s22 = smov 24  }
  0x1d   :  { %6711 = sst [smem:[#allocation61_spill]] %s5497_s12 }
  0x1e   :  { %s5512_s4 = sld [smem:[%s6656_s0 + %s5359_s28]]   ;;  %s5363_s28 = smov 25  }
  0x1f   :  { %s5517_s12 = sld [smem:[%s6656_s0 + %s5360_s7]]   ;;  %s5364_s7 = smov 26  }
  0x20   :  { %s5542_s8 = sld [smem:[%s6656_s0 + %s5365_s15]]  }
  0x22   :  { %6712 = sst [smem:[#allocation62_spill]] %s5507_s27 }
  0x23   :  { %s5527_s27 = sld [smem:[%s6656_s0 + %s5362_s22]]   ;;  %s5366_s22 = smov 28  }
  0x24   :  { %6713 = sst [smem:[#allocation63_spill]] %s5512_s4 }
  0x25   :  { %6714 = sst [smem:[#allocation64_spill]] %s5517_s12 }
  0x26   :  { %s5532_s4 = sld [smem:[%s6656_s0 + %s5363_s28]]   ;;  %s5367_s28 = smov 29  }
  0x27   :  { %s5537_s12 = sld [smem:[%s6656_s0 + %s5364_s7]]   ;;  %s5368_s7 = smov 30  }
  0x29   :  { %6715 = sst [smem:[#allocation65_spill]] %s5527_s27 }
  0x2a   :  { %s5547_s27 = sld [smem:[%s6656_s0 + %s5366_s22]]  }
  0x2c   :  { %6716 = sst [smem:[#allocation66_spill]] %s5532_s4 }
  0x2d   :  { %6717 = sst [smem:[#allocation67_spill]] %s5537_s12 }
  0x2e   :  { %s5552_s4 = sld [smem:[%s6656_s0 + %s5367_s28]]  }
  0x2f   :  { %s5557_s12 = sld [smem:[%s6656_s0 + %s5368_s7]]  }
  0x30   :  { %67 = vsyncpa [#allocation3], 0 }
  0x31   :  { %68 = vsyncpa [#allocation6], 0 }
  0x32   :  { %69 = vsyncpa [#allocation9], 0 }
  0x33   :  { %70 = vsyncpa [#allocation12], 0 }
  0x34   :  { %71 = vsyncpa [#allocation15], 0 }
  0x35   :  { %72 = vsyncpa [#allocation18], 0 }
  0x36   :  { %73 = vsyncpa [#allocation21], 0 }
  0x37   :  { %74 = vsyncpa [#allocation24], 0 }
  0x38   :  { %75 = vsyncpa [#allocation27], 0 }
  0x39   :  { %76 = vsyncpa [#allocation30], 0 }
  0x3a   :  { %77 = vsyncpa [#allocation33], 0 }
  0x3b   :  { %78 = vsyncpa [#allocation4], 0 }
  0x3c   :  { %79 = vsyncpa [#allocation37], 0 }
  0x3d   :  { %80 = vsyncpa [#allocation40], 0  ;;  %s5369_s15 = smov [#allocation5]   ;;  %s5370_s16 = smov [#allocation8]  }
  0x3e   :  { %s98_s0 = sshll.u32 %s5369_s15, 4  ;;  %s120_s18 = sshll.u32 %s5370_s16, 4  ;;  %s99_s0 = int_to_ptr.vmem [resolvable:$true] %s98_s0  ;;  %s5559_s18 = int_to_ptr.vmem [resolvable:$true] %s120_s18 }
  0x3f   :  { %s4761_s22 = scalar_lea.hbm %s5412_s9, 2048 }
  0x40   :  { %p4762_p0 = scmp.ne.s32.totalorder %s5412_s9, %s4761_s22  ;;  %p4765_p1 = scmp.lt.u32.totalorder %s4761_s22, %s5412_s9 }
  0x42   :  { %p4767_p2 = pnand %p4765_p1, %p4762_p0 }
  0x44   :  { %4770 = shalt.err (!%p4767_p2)
}
  0x45   :  { %s4771_s23 = scalar_lea.vmem %s99_s0, 2048  ;;  %p4776_p4 = scmp.lt.s32.totalorder %s99_s0, %s99_s0 }
  0x46   :  { %p4772_p3 = scmp.ne.s32.totalorder %s99_s0, %s4771_s23  ;;  %p4777_p5 = scmp.lt.s32.totalorder %s4771_s23, %s4771_s23 }
  0x48   :  { %p4778_p6 = por %p4777_p5, %p4776_p4 }
  0x4a   :  { %p4779_p7 = pnand %p4778_p6, %p4772_p3 }
  0x4c   :  { %4782 = shalt.err (!%p4779_p7)
}
  0x4d   :  { %s5371_s26 = smov 128   ;;  %s5372_s28 = smov 8  }
  0x4e   :  { %104 = dma.hbm_to_vmem [thread:$0]  %s5412_s9, 2048, %s99_s0, [#allocation6], %s5371_s26, %s5371_s26, %s5372_s28  }
  0x4f   :  { %s4783_s1 = scalar_lea.hbm %s5422_s17, 1024 }
  0x50   :  { %p4784_p8 = scmp.ne.s32.totalorder %s5422_s17, %s4783_s1  ;;  %p4787_p9 = scmp.lt.u32.totalorder %s4783_s1, %s5422_s17 }
  0x52   :  { %p4789_p10 = pnand %p4787_p9, %p4784_p8 }
  0x54   :  { %4792 = shalt.err (!%p4789_p10)
}
  0x55   :  { %s4793_s2 = scalar_lea.vmem %s5559_s18, 1024  ;;  %p4798_p12 = scmp.lt.s32.totalorder %s5559_s18, %s5559_s18 }
  0x56   :  { %p4794_p11 = scmp.ne.s32.totalorder %s5559_s18, %s4793_s2  ;;  %p4799_p13 = scmp.lt.s32.totalorder %s4793_s2, %s4793_s2 }
  0x58   :  { %p4800_p0 = por %p4799_p13, %p4798_p12 }
  0x5a   :  { %p4801_p1 = pnand %p4800_p0, %p4794_p11 }
  0x5c   :  { %4804 = shalt.err (!%p4801_p1)
}
  0x5d   :  { %s5373_s7 = smov 64   ;;  %s5374_s9 = smov 4  }
  0x5e   :  { %126 = dma.hbm_to_vmem [thread:$0]  %s5422_s17, 1024, %s5559_s18, [#allocation9], %s5373_s7, %s5373_s7, %s5374_s9  }
  0x5f   :  { %s5375_s10 = smov [#allocation11]   ;;  %s5376_s15 = smov [#allocation14]  }
  0x60   :  { %s142_s11 = sshll.u32 %s5375_s10, 4  ;;  %s164_s0 = sshll.u32 %s5376_s15, 4  ;;  %s143_s11 = int_to_ptr.vmem [resolvable:$true] %s142_s11  ;;  %s5580_s0 = int_to_ptr.vmem [resolvable:$true] %s164_s0 }
  0x61   :  { %s4805_s16 = scalar_lea.hbm %s5432_s25, 1024 }
  0x62   :  { %p4806_p2 = scmp.ne.s32.totalorder %s5432_s25, %s4805_s16  ;;  %p4809_p3 = scmp.lt.u32.totalorder %s4805_s16, %s5432_s25 }
  0x64   :  { %p4811_p4 = pnand %p4809_p3, %p4806_p2 }
  0x66   :  { %4814 = shalt.err (!%p4811_p4)
}
  0x67   :  { %s4815_s22 = scalar_lea.vmem %s143_s11, 1024  ;;  %p4820_p6 = scmp.lt.s32.totalorder %s143_s11, %s143_s11 }
  0x68   :  { %p4816_p5 = scmp.ne.s32.totalorder %s143_s11, %s4815_s22  ;;  %p4821_p7 = scmp.lt.s32.totalorder %s4815_s22, %s4815_s22 }
  0x6a   :  { %p4822_p8 = por %p4821_p7, %p4820_p6 }
  0x6c   :  { %p4823_p9 = pnand %p4822_p8, %p4816_p5 }
  0x6e   :  { %4826 = shalt.err (!%p4823_p9)
}
  0x6f   :  { %148 = dma.hbm_to_vmem [thread:$0]  %s5432_s25, 1024, %s143_s11, [#allocation12], %s5373_s7, %s5373_s7, %s5374_s9  }
  0x70   :  { %s4827_s17 = scalar_lea.hbm %s5442_s3, 1024 }
  0x71   :  { %p4828_p10 = scmp.ne.s32.totalorder %s5442_s3, %s4827_s17  ;;  %p4831_p11 = scmp.lt.u32.totalorder %s4827_s17, %s5442_s3 }
  0x73   :  { %p4833_p12 = pnand %p4831_p11, %p4828_p10 }
  0x75   :  { %4836 = shalt.err (!%p4833_p12)
}
  0x76   :  { %s4837_s18 = scalar_lea.vmem %s5580_s0, 1024  ;;  %p4842_p0 = scmp.lt.s32.totalorder %s5580_s0, %s5580_s0 }
  0x77   :  { %p4838_p13 = scmp.ne.s32.totalorder %s5580_s0, %s4837_s18  ;;  %p4843_p1 = scmp.lt.s32.totalorder %s4837_s18, %s4837_s18 }
  0x79   :  { %p4844_p2 = por %p4843_p1, %p4842_p0 }
  0x7b   :  { %p4845_p3 = pnand %p4844_p2, %p4838_p13 }
  0x7d   :  { %4848 = shalt.err (!%p4845_p3)
}
  0x7e   :  { %170 = dma.hbm_to_vmem [thread:$0]  %s5442_s3, 1024, %s5580_s0, [#allocation15], %s5373_s7, %s5373_s7, %s5374_s9  }
  0x7f   :  { %s5377_s25 = smov [#allocation17]   ;;  %s5378_s1 = smov [#allocation20]  }
  0x80   :  { %s186_s23 = sshll.u32 %s5377_s25, 4  ;;  %s208_s2 = sshll.u32 %s5378_s1, 4  ;;  %s187_s23 = int_to_ptr.vmem [resolvable:$true] %s186_s23  ;;  %s5601_s2 = int_to_ptr.vmem [resolvable:$true] %s208_s2 }
  0x81   :  { %s4849_s10 = scalar_lea.hbm %s5452_s14, 1024 }
  0x82   :  { %p4850_p4 = scmp.ne.s32.totalorder %s5452_s14, %s4849_s10  ;;  %p4853_p5 = scmp.lt.u32.totalorder %s4849_s10, %s5452_s14 }
  0x84   :  { %p4855_p6 = pnand %p4853_p5, %p4850_p4 }
  0x86   :  { %4858 = shalt.err (!%p4855_p6)
}
  0x87   :  { %s4859_s11 = scalar_lea.vmem %s187_s23, 1024  ;;  %p4864_p8 = scmp.lt.s32.totalorder %s187_s23, %s187_s23 }
  0x88   :  { %p4860_p7 = scmp.ne.s32.totalorder %s187_s23, %s4859_s11  ;;  %p4865_p9 = scmp.lt.s32.totalorder %s4859_s11, %s4859_s11 }
  0x8a   :  { %p4866_p10 = por %p4865_p9, %p4864_p8 }
  0x8c   :  { %p4867_p11 = pnand %p4866_p10, %p4860_p7 }
  0x8e   :  { %4870 = shalt.err (!%p4867_p11)
}
  0x8f   :  { %192 = dma.hbm_to_vmem [thread:$0]  %s5452_s14, 1024, %s187_s23, [#allocation18], %s5373_s7, %s5373_s7, %s5374_s9  }
  0x90   :  { %s4871_s3 = scalar_lea.hbm %s5462_s24, 1024 }
  0x91   :  { %p4872_p12 = scmp.ne.s32.totalorder %s5462_s24, %s4871_s3  ;;  %p4875_p13 = scmp.lt.u32.totalorder %s4871_s3, %s5462_s24 }
  0x93   :  { %p4877_p0 = pnand %p4875_p13, %p4872_p12 }
  0x95   :  { %4880 = shalt.err (!%p4877_p0)
}
  0x96   :  { %s4881_s15 = scalar_lea.vmem %s5601_s2, 1024  ;;  %p4886_p2 = scmp.lt.s32.totalorder %s5601_s2, %s5601_s2 }
  0x97   :  { %p4882_p1 = scmp.ne.s32.totalorder %s5601_s2, %s4881_s15  ;;  %p4887_p3 = scmp.lt.s32.totalorder %s4881_s15, %s4881_s15 }
  0x99   :  { %p4888_p4 = por %p4887_p3, %p4886_p2 }
  0x9b   :  { %p4889_p5 = pnand %p4888_p4, %p4882_p1 }
  0x9d   :  { %4892 = shalt.err (!%p4889_p5)
}
  0x9e   :  { %214 = dma.hbm_to_vmem [thread:$0]  %s5462_s24, 1024, %s5601_s2, [#allocation21], %s5373_s7, %s5373_s7, %s5374_s9  }
  0x9f   :  { %s5379_s14 = smov [#allocation23]   ;;  %s5380_s16 = smov [#allocation26]  }
  0xa0   :  { %s230_s0 = sshll.u32 %s5379_s14, 4  ;;  %s252_s22 = sshll.u32 %s5380_s16, 4  ;;  %s231_s0 = int_to_ptr.vmem [resolvable:$true] %s230_s0  ;;  %s5622_s22 = int_to_ptr.vmem [resolvable:$true] %s252_s22 }
  0xa1   :  { %s4893_s17 = scalar_lea.hbm %s5472_s6, 1024 }
  0xa2   :  { %p4894_p6 = scmp.ne.s32.totalorder %s5472_s6, %s4893_s17  ;;  %p4897_p7 = scmp.lt.u32.totalorder %s4893_s17, %s5472_s6 }
  0xa4   :  { %p4899_p8 = pnand %p4897_p7, %p4894_p6 }
  0xa6   :  { %4902 = shalt.err (!%p4899_p8)
}
  0xa7   :  { %s4903_s18 = scalar_lea.vmem %s231_s0, 1024  ;;  %p4908_p10 = scmp.lt.s32.totalorder %s231_s0, %s231_s0 }
  0xa8   :  { %p4904_p9 = scmp.ne.s32.totalorder %s231_s0, %s4903_s18  ;;  %p4909_p11 = scmp.lt.s32.totalorder %s4903_s18, %s4903_s18 }
  0xaa   :  { %p4910_p12 = por %p4909_p11, %p4908_p10 }
  0xac   :  { %p4911_p13 = pnand %p4910_p12, %p4904_p9 }
  0xae   :  { %4914 = shalt.err (!%p4911_p13)
}
  0xaf   :  { %236 = dma.hbm_to_vmem [thread:$0]  %s5472_s6, 1024, %s231_s0, [#allocation24], %s5373_s7, %s5373_s7, %s5374_s9  }
  0xb0   :  { %s4915_s24 = scalar_lea.hbm %s5482_s20, 1024 }
  0xb1   :  { %p4916_p0 = scmp.ne.s32.totalorder %s5482_s20, %s4915_s24  ;;  %p4919_p1 = scmp.lt.u32.totalorder %s4915_s24, %s5482_s20 }
  0xb3   :  { %p4921_p2 = pnand %p4919_p1, %p4916_p0 }
  0xb5   :  { %4924 = shalt.err (!%p4921_p2)
}
  0xb6   :  { %s4925_s25 = scalar_lea.vmem %s5622_s22, 1024  ;;  %p4930_p4 = scmp.lt.s32.totalorder %s5622_s22, %s5622_s22 }
  0xb7   :  { %p4926_p3 = scmp.ne.s32.totalorder %s5622_s22, %s4925_s25  ;;  %p4931_p5 = scmp.lt.s32.totalorder %s4925_s25, %s4925_s25 }
  0xb9   :  { %p4932_p6 = por %p4931_p5, %p4930_p4 }
  0xbb   :  { %p4933_p7 = pnand %p4932_p6, %p4926_p3 }
  0xbd   :  { %4936 = shalt.err (!%p4933_p7)
}
  0xbe   :  { %258 = dma.hbm_to_vmem [thread:$0]  %s5482_s20, 1024, %s5622_s22, [#allocation27], %s5373_s7, %s5373_s7, %s5374_s9  }
  0xbf   :  { %s5381_s6 = smov [#allocation29]   ;;  %s5382_s1 = smov [#allocation32]  }
  0xc0   :  { %s278_s23 = sshll.u32 %s5381_s6, 4  ;;  %s306_s2 = sshll.u32 %s5382_s1, 4  ;;  %s279_s23 = int_to_ptr.vmem [resolvable:$true] %s278_s23  ;;  %s5643_s2 = int_to_ptr.vmem [resolvable:$true] %s306_s2 }
  0xc1   :  { %s4937_s10 = scalar_lea.hbm %s5502_s30, 1024 }
  0xc2   :  { %p4938_p8 = scmp.ne.s32.totalorder %s5502_s30, %s4937_s10  ;;  %p4941_p9 = scmp.lt.u32.totalorder %s4937_s10, %s5502_s30 }
  0xc4   :  { %p4943_p10 = pnand %p4941_p9, %p4938_p8 }
  0xc6   :  { %4946 = shalt.err (!%p4943_p10)
}
  0xc7   :  { %s4947_s11 = scalar_lea.vmem %s279_s23, 1024  ;;  %p4952_p12 = scmp.lt.s32.totalorder %s279_s23, %s279_s23 }
  0xc8   :  { %p4948_p11 = scmp.ne.s32.totalorder %s279_s23, %s4947_s11  ;;  %p4953_p13 = scmp.lt.s32.totalorder %s4947_s11, %s4947_s11 }
  0xca   :  { %p4954_p0 = por %p4953_p13, %p4952_p12 }
  0xcc   :  { %p4955_p1 = pnand %p4954_p0, %p4948_p11 }
  0xce   :  { %4958 = shalt.err (!%p4955_p1)
}
  0xcf   :  { %284 = dma.hbm_to_vmem [thread:$0]  %s5502_s30, 1024, %s279_s23, [#allocation30], %s5373_s7, %s5373_s7, %s5374_s9  }
  0xd0   :  { %s4959_s20 = scalar_lea.hbm %s5522_s19, 1024 }
  0xd1   :  { %p4960_p2 = scmp.ne.s32.totalorder %s5522_s19, %s4959_s20  ;;  %p4963_p3 = scmp.lt.u32.totalorder %s4959_s20, %s5522_s19 }
  0xd3   :  { %p4965_p4 = pnand %p4963_p3, %p4960_p2 }
  0xd5   :  { %4968 = shalt.err (!%p4965_p4)
}
  0xd6   :  { %s4969_s3 = scalar_lea.vmem %s5643_s2, 1024  ;;  %p4974_p6 = scmp.lt.s32.totalorder %s5643_s2, %s5643_s2 }
  0xd7   :  { %p4970_p5 = scmp.ne.s32.totalorder %s5643_s2, %s4969_s3  ;;  %p4975_p7 = scmp.lt.s32.totalorder %s4969_s3, %s4969_s3 }
  0xd9   :  { %p4976_p8 = por %p4975_p7, %p4974_p6 }
  0xdb   :  { %p4977_p9 = pnand %p4976_p8, %p4970_p5 }
  0xdd   :  { %4980 = shalt.err (!%p4977_p9)
}
  0xde   :  { %312 = dma.hbm_to_vmem [thread:$0]  %s5522_s19, 1024, %s5643_s2, [#allocation33], %s5373_s7, %s5373_s7, %s5374_s9  }
  0xdf   :  { %s5383_s30 = smov [#allocation2]   ;;  %s5384_s14 = smov [#allocation7]  }
  0xe0   :  { %s86_s15 = sshll.u32 %s5383_s30, 4  ;;  %s111_s0 = sshll.u32 %s5384_s14, 4  ;;  %s87_s15 = int_to_ptr.vmem [resolvable:$true] %s86_s15  ;;  %s112_s0 = int_to_ptr.vmem [resolvable:$true] %s111_s0 }
  0xe1   :  { %s4981_s16 = scalar_lea.hbm %s5407_s5, 2048 }
  0xe2   :  { %p4982_p10 = scmp.ne.s32.totalorder %s5407_s5, %s4981_s16  ;;  %p4985_p11 = scmp.lt.u32.totalorder %s4981_s16, %s5407_s5 }
  0xe4   :  { %p4987_p12 = pnand %p4985_p11, %p4982_p10 }
  0xe6   :  { %4990 = shalt.err (!%p4987_p12)
}
  0xe7   :  { %s4991_s22 = scalar_lea.vmem %s87_s15, 2048  ;;  %p4996_p0 = scmp.lt.s32.totalorder %s87_s15, %s87_s15 }
  0xe8   :  { %p4992_p13 = scmp.ne.s32.totalorder %s87_s15, %s4991_s22  ;;  %p4997_p1 = scmp.lt.s32.totalorder %s4991_s22, %s4991_s22 }
  0xea   :  { %p4998_p2 = por %p4997_p1, %p4996_p0 }
  0xec   :  { %p4999_p3 = pnand %p4998_p2, %p4992_p13 }
  0xee   :  { %5002 = shalt.err (!%p4999_p3)
}
  0xef   :  { %92 = dma.hbm_to_vmem [thread:$0]  %s5407_s5, 2048, %s87_s15, [#allocation3], %s5371_s26, %s5371_s26, %s5372_s28  }
  0xf0   :  { %s5003_s19 = scalar_lea.hbm %s5417_s13, 32 }
  0xf1   :  { %p5004_p4 = scmp.ne.s32.totalorder %s5417_s13, %s5003_s19  ;;  %p5007_p5 = scmp.lt.u32.totalorder %s5003_s19, %s5417_s13 }
  0xf3   :  { %p5009_p6 = pnand %p5007_p5, %p5004_p4 }
  0xf5   :  { %5012 = shalt.err (!%p5009_p6)
}
  0xf6   :  { %s5013_s17 = scalar_lea.vmem %s112_s0, 32  ;;  %p5018_p8 = scmp.lt.s32.totalorder %s112_s0, %s112_s0 }
  0xf7   :  { %p5014_p7 = scmp.ne.s32.totalorder %s112_s0, %s5013_s17  ;;  %p5019_p9 = scmp.lt.s32.totalorder %s5013_s17, %s5013_s17 }
  0xf9   :  { %p5020_p10 = por %p5019_p9, %p5018_p8 }
  0xfb   :  { %p5021_p11 = pnand %p5020_p10, %p5014_p7 }
  0xfd   :  { %5024 = shalt.err (!%p5021_p11)
}
  0xfe   :  { %114 = dma.hbm_to_vmem [thread:$0]  %s5417_s13, 32, %s112_s0, [#allocation6]  }
  0xff   :  { %s5385_s18 = smov [#allocation10]   ;;  %s5386_s5 = smov [#allocation13]  }
 0x100   :  { %s133_s24 = sshll.u32 %s5385_s18, 4  ;;  %s155_s25 = sshll.u32 %s5386_s5, 4  ;;  %s134_s24 = int_to_ptr.vmem [resolvable:$true] %s133_s24  ;;  %s156_s25 = int_to_ptr.vmem [resolvable:$true] %s155_s25 }
 0x101   :  { %s5025_s6 = scalar_lea.hbm %s5427_s21, 16 }
 0x102   :  { %p5026_p12 = scmp.ne.s32.totalorder %s5427_s21, %s5025_s6  ;;  %p5029_p13 = scmp.lt.u32.totalorder %s5025_s6, %s5427_s21 }
 0x104   :  { %p5031_p0 = pnand %p5029_p13, %p5026_p12 }
 0x106   :  { %5034 = shalt.err (!%p5031_p0)
}
 0x107   :  { %s5035_s23 = scalar_lea.vmem %s134_s24, 16  ;;  %s5039_s1 = scalar_lea.vmem %s134_s24, 32 }
 0x108   :  { %p5036_p1 = scmp.ne.s32.totalorder %s134_s24, %s5035_s23  ;;  %p5040_p2 = scmp.lt.s32.totalorder %s134_s24, %s134_s24 }
 0x109   :  { %p5041_p3 = scmp.lt.s32.totalorder %s5039_s1, %s5035_s23 }
 0x10b   :  { %p5042_p4 = por %p5041_p3, %p5040_p2 }
 0x10d   :  { %p5043_p5 = pnand %p5042_p4, %p5036_p1 }
 0x10f   :  { %5046 = shalt.err (!%p5043_p5)
}
 0x110   :  { %136 = dma.hbm_to_vmem [thread:$0]  %s5427_s21, 16, %s134_s24, [#allocation9]  }
 0x111   :  { %s5047_s13 = scalar_lea.hbm %s5437_s29, 16 }
 0x112   :  { %p5048_p6 = scmp.ne.s32.totalorder %s5437_s29, %s5047_s13  ;;  %p5051_p7 = scmp.lt.u32.totalorder %s5047_s13, %s5437_s29 }
 0x114   :  { %p5053_p8 = pnand %p5051_p7, %p5048_p6 }
 0x116   :  { %5056 = shalt.err (!%p5053_p8)
}
 0x117   :  { %s5057_s2 = scalar_lea.vmem %s156_s25, 16  ;;  %s5061_s10 = scalar_lea.vmem %s156_s25, 32 }
 0x118   :  { %p5058_p9 = scmp.ne.s32.totalorder %s156_s25, %s5057_s2  ;;  %p5062_p10 = scmp.lt.s32.totalorder %s156_s25, %s156_s25 }
 0x119   :  { %p5063_p11 = scmp.lt.s32.totalorder %s5061_s10, %s5057_s2 }
 0x11b   :  { %p5064_p12 = por %p5063_p11, %p5062_p10 }
 0x11d   :  { %p5065_p13 = pnand %p5064_p12, %p5058_p9 }
 0x11f   :  { %5068 = shalt.err (!%p5065_p13)
}
 0x120   :  { %s6718_s11 = sld [smem:[#allocation55_spill]]  ;;  %s5387_s20 = smov [#allocation16]  }
 0x121   :  { %158 = dma.hbm_to_vmem [thread:$0]  %s5437_s29, 16, %s156_s25, [#allocation12]  }
 0x122   :  { %s177_s21 = sshll.u32 %s5387_s20, 4  ;;  %s5388_s3 = smov [#allocation19]   ;;  %s178_s21 = int_to_ptr.vmem [resolvable:$true] %s177_s21 }
 0x123   :  { %s199_s30 = sshll.u32 %s5388_s3, 4  ;;  %s200_s30 = int_to_ptr.vmem [resolvable:$true] %s199_s30 }
 0x126   :  { %s5069_s15 = scalar_lea.hbm %s6718_s11, 16 }
 0x127   :  { %p5070_p0 = scmp.ne.s32.totalorder %s6718_s11, %s5069_s15  ;;  %p5073_p1 = scmp.lt.u32.totalorder %s5069_s15, %s6718_s11 }
 0x129   :  { %p5075_p2 = pnand %p5073_p1, %p5070_p0 }
 0x12b   :  { %5078 = shalt.err (!%p5075_p2)
}
 0x12c   :  { %s5079_s14 = scalar_lea.vmem %s178_s21, 16  ;;  %s5083_s0 = scalar_lea.vmem %s178_s21, 32 }
 0x12d   :  { %p5080_p3 = scmp.ne.s32.totalorder %s178_s21, %s5079_s14  ;;  %p5084_p4 = scmp.lt.s32.totalorder %s178_s21, %s178_s21 }
 0x12e   :  { %p5085_p5 = scmp.lt.s32.totalorder %s5083_s0, %s5079_s14 }
 0x130   :  { %p5086_p6 = por %p5085_p5, %p5084_p4 }
 0x132   :  { %p5087_p7 = pnand %p5086_p6, %p5080_p3 }
 0x134   :  { %5090 = shalt.err (!%p5087_p7)
}
 0x135   :  { %s6719_s29 = sld [smem:[#allocation56_spill]] }
 0x136   :  { %180 = dma.hbm_to_vmem [thread:$0]  %s6718_s11, 16, %s178_s21, [#allocation15]  }
 0x13b   :  { %s5091_s16 = scalar_lea.hbm %s6719_s29, 16 }
 0x13c   :  { %p5092_p8 = scmp.ne.s32.totalorder %s6719_s29, %s5091_s16  ;;  %p5095_p9 = scmp.lt.u32.totalorder %s5091_s16, %s6719_s29 }
 0x13e   :  { %p5097_p10 = pnand %p5095_p9, %p5092_p8 }
 0x140   :  { %5100 = shalt.err (!%p5097_p10)
}
 0x141   :  { %s5101_s22 = scalar_lea.vmem %s200_s30, 16  ;;  %s5105_s19 = scalar_lea.vmem %s200_s30, 32 }
 0x142   :  { %p5102_p11 = scmp.ne.s32.totalorder %s200_s30, %s5101_s22  ;;  %p5106_p12 = scmp.lt.s32.totalorder %s200_s30, %s200_s30 }
 0x143   :  { %p5107_p13 = scmp.lt.s32.totalorder %s5105_s19, %s5101_s22 }
 0x145   :  { %p5108_p0 = por %p5107_p13, %p5106_p12 }
 0x147   :  { %p5109_p1 = pnand %p5108_p0, %p5102_p11 }
 0x149   :  { %5112 = shalt.err (!%p5109_p1)
}
 0x14a   :  { %s6720_s17 = sld [smem:[#allocation57_spill]]  ;;  %s5389_s18 = smov [#allocation22]  }
 0x14b   :  { %202 = dma.hbm_to_vmem [thread:$0]  %s6719_s29, 16, %s200_s30, [#allocation18]  }
 0x14c   :  { %s221_s24 = sshll.u32 %s5389_s18, 4  ;;  %s5390_s5 = smov [#allocation25]   ;;  %s222_s24 = int_to_ptr.vmem [resolvable:$true] %s221_s24 }
 0x14d   :  { %s243_s25 = sshll.u32 %s5390_s5, 4  ;;  %s244_s25 = int_to_ptr.vmem [resolvable:$true] %s243_s25 }
 0x150   :  { %s5113_s6 = scalar_lea.hbm %s6720_s17, 16 }
 0x151   :  { %p5114_p2 = scmp.ne.s32.totalorder %s6720_s17, %s5113_s6  ;;  %p5117_p3 = scmp.lt.u32.totalorder %s5113_s6, %s6720_s17 }
 0x153   :  { %p5119_p4 = pnand %p5117_p3, %p5114_p2 }
 0x155   :  { %5122 = shalt.err (!%p5119_p4)
}
 0x156   :  { %s5123_s23 = scalar_lea.vmem %s222_s24, 16  ;;  %s5127_s1 = scalar_lea.vmem %s222_s24, 32 }
 0x157   :  { %p5124_p5 = scmp.ne.s32.totalorder %s222_s24, %s5123_s23  ;;  %p5128_p6 = scmp.lt.s32.totalorder %s222_s24, %s222_s24 }
 0x158   :  { %p5129_p7 = scmp.lt.s32.totalorder %s5127_s1, %s5123_s23 }
 0x15a   :  { %p5130_p8 = por %p5129_p7, %p5128_p6 }
 0x15c   :  { %p5131_p9 = pnand %p5130_p8, %p5124_p5 }
 0x15e   :  { %5134 = shalt.err (!%p5131_p9)
}
 0x15f   :  { %s6721_s13 = sld [smem:[#allocation58_spill]] }
 0x160   :  { %224 = dma.hbm_to_vmem [thread:$0]  %s6720_s17, 16, %s222_s24, [#allocation21]  }
 0x165   :  { %s5135_s2 = scalar_lea.hbm %s6721_s13, 16 }
 0x166   :  { %p5136_p10 = scmp.ne.s32.totalorder %s6721_s13, %s5135_s2  ;;  %p5139_p11 = scmp.lt.u32.totalorder %s5135_s2, %s6721_s13 }
 0x168   :  { %p5141_p12 = pnand %p5139_p11, %p5136_p10 }
 0x16a   :  { %5144 = shalt.err (!%p5141_p12)
}
 0x16b   :  { %s5145_s10 = scalar_lea.vmem %s244_s25, 16  ;;  %s5149_s11 = scalar_lea.vmem %s244_s25, 32 }
 0x16c   :  { %p5146_p13 = scmp.ne.s32.totalorder %s244_s25, %s5145_s10  ;;  %p5150_p0 = scmp.lt.s32.totalorder %s244_s25, %s244_s25 }
 0x16d   :  { %p5151_p1 = scmp.lt.s32.totalorder %s5149_s11, %s5145_s10 }
 0x16f   :  { %p5152_p2 = por %p5151_p1, %p5150_p0 }
 0x171   :  { %p5153_p3 = pnand %p5152_p2, %p5146_p13 }
 0x173   :  { %5156 = shalt.err (!%p5153_p3)
}
 0x174   :  { %s6722_s20 = sld [smem:[#allocation59_spill]]  ;;  %s5391_s21 = smov [#allocation28]  }
 0x175   :  { %246 = dma.hbm_to_vmem [thread:$0]  %s6721_s13, 16, %s244_s25, [#allocation24]  }
 0x176   :  { %s265_s3 = sshll.u32 %s5391_s21, 4  ;;  %s5392_s30 = smov [#allocation31]   ;;  %s266_s3 = int_to_ptr.vmem [resolvable:$true] %s265_s3 }
 0x177   :  { %s292_s15 = sshll.u32 %s5392_s30, 4  ;;  %s5699_s15 = int_to_ptr.vmem [resolvable:$true] %s292_s15 }
 0x17a   :  { %s5157_s14 = scalar_lea.hbm %s6722_s20, 16 }
 0x17b   :  { %p5158_p4 = scmp.ne.s32.totalorder %s6722_s20, %s5157_s14  ;;  %p5161_p5 = scmp.lt.u32.totalorder %s5157_s14, %s6722_s20 }
 0x17d   :  { %p5163_p6 = pnand %p5161_p5, %p5158_p4 }
 0x17f   :  { %5166 = shalt.err (!%p5163_p6)
}
 0x180   :  { %s5167_s0 = scalar_lea.vmem %s266_s3, 16  ;;  %s5171_s29 = scalar_lea.vmem %s266_s3, 32 }
 0x181   :  { %p5168_p7 = scmp.ne.s32.totalorder %s266_s3, %s5167_s0  ;;  %p5172_p8 = scmp.lt.s32.totalorder %s266_s3, %s266_s3 }
 0x182   :  { %p5173_p9 = scmp.lt.s32.totalorder %s5171_s29, %s5167_s0 }
 0x184   :  { %p5174_p10 = por %p5173_p9, %p5172_p8 }
 0x186   :  { %p5175_p11 = pnand %p5174_p10, %p5168_p7 }
 0x188   :  { %5178 = shalt.err (!%p5175_p11)
}
 0x189   :  { %s6723_s16 = sld [smem:[#allocation63_spill]] }
 0x18a   :  { %268 = dma.hbm_to_vmem [thread:$0]  %s6722_s20, 16, %s266_s3, [#allocation27]  }
 0x18f   :  { %s5179_s22 = scalar_lea.hbm %s6723_s16, 1024 }
 0x190   :  { %p5180_p12 = scmp.ne.s32.totalorder %s6723_s16, %s5179_s22  ;;  %p5183_p13 = scmp.lt.u32.totalorder %s5179_s22, %s6723_s16 }
 0x192   :  { %p5185_p0 = pnand %p5183_p13, %p5180_p12 }
 0x194   :  { %5188 = shalt.err (!%p5185_p0)
}
 0x195   :  { %s5189_s19 = scalar_lea.vmem %s5699_s15, 1024  ;;  %p5194_p2 = scmp.lt.s32.totalorder %s5699_s15, %s5699_s15 }
 0x196   :  { %p5190_p1 = scmp.ne.s32.totalorder %s5699_s15, %s5189_s19  ;;  %p5195_p3 = scmp.lt.s32.totalorder %s5189_s19, %s5189_s19 }
 0x198   :  { %p5196_p4 = por %p5195_p3, %p5194_p2 }
 0x19a   :  { %p5197_p5 = pnand %p5196_p4, %p5190_p1 }
 0x19c   :  { %5200 = shalt.err (!%p5197_p5)
}
 0x19d   :  { %s6724_s17 = sld [smem:[#allocation66_spill]]  ;;  %s5393_s18 = smov [#allocation34]  }
 0x19e   :  { %298 = dma.hbm_to_vmem [thread:$0]  %s6723_s16, 1024, %s5699_s15, [#allocation30], %s5373_s7, %s5373_s7, %s5374_s9  }
 0x19f   :  { %s320_s24 = sshll.u32 %s5393_s18, 4  ;;  %s321_s24 = int_to_ptr.vmem [resolvable:$true] %s320_s24 }
 0x1a3   :  { %s5201_s5 = scalar_lea.hbm %s6724_s17, 2048 }
 0x1a4   :  { %p5202_p6 = scmp.ne.s32.totalorder %s6724_s17, %s5201_s5  ;;  %p5205_p7 = scmp.lt.u32.totalorder %s5201_s5, %s6724_s17 }
 0x1a6   :  { %p5207_p8 = pnand %p5205_p7, %p5202_p6 }
 0x1a8   :  { %5210 = shalt.err (!%p5207_p8)
}
 0x1a9   :  { %s5211_s25 = scalar_lea.vmem %s321_s24, 2048  ;;  %p5216_p10 = scmp.lt.s32.totalorder %s321_s24, %s321_s24 }
 0x1aa   :  { %p5212_p9 = scmp.ne.s32.totalorder %s321_s24, %s5211_s25  ;;  %p5217_p11 = scmp.lt.s32.totalorder %s5211_s25, %s5211_s25 }
 0x1ac   :  { %p5218_p12 = por %p5217_p11, %p5216_p10 }
 0x1ae   :  { %p5219_p13 = pnand %p5218_p12, %p5212_p9 }
 0x1b0   :  { %5222 = shalt.err (!%p5219_p13)
}
 0x1b1   :  { %326 = dma.hbm_to_vmem [thread:$0]  %s6724_s17, 2048, %s321_s24, [#allocation33], %s5371_s26, %s5371_s26, %s5372_s28  }
 0x1b2   :  { %5311 = dma.done.wait [#allocation3], 2048  }
 0x1b3   :  { %5312 = vsyncadd [#allocation3], 4294965248 }
 0x1b4   :  { %5313 = dma.done.wait [#allocation6], 2080  }
 0x1b5   :  { %5314 = vsyncadd [#allocation6], 4294965216 }
 0x1b6   :  { %5315 = dma.done.wait [#allocation9], 1040  }
 0x1b7   :  { %5316 = vsyncadd [#allocation9], 4294966256 }
 0x1b8   :  { %5317 = dma.done.wait [#allocation12], 1040  }
 0x1b9   :  { %5318 = vsyncadd [#allocation12], 4294966256 }
 0x1ba   :  { %5319 = dma.done.wait [#allocation15], 1040  }
 0x1bb   :  { %5320 = vsyncadd [#allocation15], 4294966256 }
 0x1bc   :  { %5321 = dma.done.wait [#allocation18], 1040  }
 0x1bd   :  { %5322 = vsyncadd [#allocation18], 4294966256 }
 0x1be   :  { %5323 = dma.done.wait [#allocation21], 1040  }
 0x1bf   :  { %5324 = vsyncadd [#allocation21], 4294966256 }
 0x1c0   :  { %5325 = dma.done.wait [#allocation24], 1040  }
 0x1c1   :  { %5326 = vsyncadd [#allocation24], 4294966256 }
 0x1c2   :  { %5327 = dma.done.wait [#allocation27], 1040  }
 0x1c3   :  { %5328 = vsyncadd [#allocation27], 4294966256 }
 0x1c4   :  { %5329 = dma.done.wait [#allocation30], 2048  }
 0x1c5   :  { %5330 = vsyncadd [#allocation30], 4294965248 }
 0x1c6   :  { %5331 = dma.done.wait [#allocation33], 3072  }
 0x1c7   :  { %5332 = vsyncadd [#allocation33], 4294964224  ;;  %v5394_v0 = vmov 0   ;;  %v4505_v1 = vld [vmem:[#allocation5 + $0x4] ss:$8 sps:$4 sm:$0xff]   ;;  %v4531_v16 = vld [vmem:[#allocation8 + $0x10] sm:$0xff]   ;;  %v6665_v50 = vlaneseq }
 0x1c8   :  { %557 = vmatprep.mubr.bf16.mxu0 %v5394_v0  ;;  %v4507_v2 = vld [vmem:[#allocation5] ss:$8 sps:$4 sm:$0xff]   ;;  %525 = vmatprep.subr.bf16.mxu0 %v4505_v1  ;;  %v4508_v3 = vld [vmem:[#allocation5 + $0x14] ss:$8 sps:$4 sm:$0xff]   ;;  %v4510_v4 = vld [vmem:[#allocation5 + $0x10] ss:$8 sps:$4 sm:$0xff]  }
 0x1c9   :  { %526 = vmatpush1.bf16.msra.mxu0 %v4507_v2  ;;  %v4511_v5 = vld [vmem:[#allocation5 + $0x24] ss:$8 sps:$4 sm:$0xff]   ;;  %v4513_v6 = vld [vmem:[#allocation5 + $0x20] ss:$8 sps:$4 sm:$0xff]   ;;  %v4514_v7 = vld [vmem:[#allocation5 + $0x34] ss:$8 sps:$4 sm:$0xff]  }
 0x1ca   :  { %527 = vmatprep.subr.bf16.mxu0 %v4508_v3  ;;  %v4516_v8 = vld [vmem:[#allocation5 + $0x30] ss:$8 sps:$4 sm:$0xff]   ;;  %v4517_v9 = vld [vmem:[#allocation5 + $0x44] ss:$8 sps:$4 sm:$0xff]   ;;  %v4519_v10 = vld [vmem:[#allocation5 + $0x40] ss:$8 sps:$4 sm:$0xff]  }
 0x1cb   :  { %v4520_v11 = vld [vmem:[#allocation5 + $0x54] ss:$8 sps:$4 sm:$0xff]   ;;  %v4529_v12 = vld [vmem:[#allocation8] sm:$0xff]   ;;  %v4530_v13 = vld [vmem:[#allocation8 + $0x8] sm:$0xff]   ;;  %v436_v51 = vshrl.u32 %v6665_v50, 7  ;;  %s6732_s7 = sld [smem:[#allocation60_spill]] }
 0x1cc   :  { %v4522_v14 = vld [vmem:[#allocation5 + $0x50] ss:$8 sps:$4 sm:$0xff]   ;;  %4005 = vmatprep.subr.bf16.mxu1 %v4529_v12  ;;  %v4523_v15 = vld [vmem:[#allocation5 + $0x64] ss:$8 sps:$4 sm:$0xff]   ;;  %v4525_v17 = vld [vmem:[#allocation5 + $0x60] ss:$8 sps:$4 sm:$0xff]  }
 0x1cd   :  { %528 = vmatpush1.bf16.msra.mxu0 %v4510_v4  ;;  %4006 = vmatpush3.bf16.msra.mxu1 %v4529_v12  ;;  %v4526_v18 = vld [vmem:[#allocation5 + $0x74] ss:$8 sps:$4 sm:$0xff]   ;;  %v4528_v20 = vld [vmem:[#allocation5 + $0x70] ss:$8 sps:$4 sm:$0xff]   ;;  %v393_v21 = vld [vmem:[#allocation2] sm:$0xff]  ;;  %v437_v52 = vsub.s32 0, %v436_v51 }
 0x1ce   :  { %529 = vmatprep.subr.bf16.mxu0 %v4511_v5  ;;  %4007 = vmatprep.subr.bf16.mxu1 %v4530_v13  ;;  %v4532_v19 = vld [vmem:[#allocation8 + $0x18] sm:$0xff]   ;;  %v394_v22 = vld [vmem:[#allocation2 + $0x8] sm:$0xff]  ;;  %v395_v24 = vld [vmem:[#allocation2 + $0x10] sm:$0xff]  ;;  %v441_v54 = vsub.s32 1, %v436_v51  ;;  %s6741_s9 = sld [smem:[#allocation61_spill]]  ;;  %s6758_s6 = sld [smem:[#allocation62_spill]] }
 0x1cf   :  { %v409_v23 = vpack.c.bf16 %v394_v22, %v393_v21  ;;  %v396_v25 = vld [vmem:[#allocation2 + $0x18] sm:$0xff]  ;;  %v397_v27 = vld [vmem:[#allocation2 + $0x20] sm:$0xff]  ;;  %v398_v28 = vld [vmem:[#allocation2 + $0x28] sm:$0xff]  ;;  %s6782_s23 = sld [smem:[#allocation64_spill]]  ;;  %s6783_s1 = sld [smem:[#allocation65_spill]] }
 0x1d0   :  { %v410_v26 = vpack.c.bf16 %v396_v25, %v395_v24  ;;  %v411_v29 = vpack.c.bf16 %v398_v28, %v397_v27  ;;  %v399_v30 = vld [vmem:[#allocation2 + $0x30] sm:$0xff]  ;;  %v400_v31 = vld [vmem:[#allocation2 + $0x38] sm:$0xff]  ;;  %v401_v33 = vld [vmem:[#allocation2 + $0x40] sm:$0xff]  ;;  %s6785_s13 = sld [smem:[#allocation67_spill]]  ;;  %s5395_s2 = smov [#allocation36]  }
 0x1d1   :  { %530 = vmatpush1.bf16.msra.mxu0 %v4513_v6  ;;  %4008 = vmatpush3.bf16.msra.mxu1 %v4530_v13  ;;  %v412_v32 = vpack.c.bf16 %v400_v31, %v399_v30  ;;  %v402_v34 = vld [vmem:[#allocation2 + $0x48] sm:$0xff]  ;;  %v403_v36 = vld [vmem:[#allocation2 + $0x50] sm:$0xff]  ;;  %v404_v37 = vld [vmem:[#allocation2 + $0x58] sm:$0xff]  ;;  %s3594_s10 = sshll.u32 %s5395_s2, 4  ;;  %s5396_s11 = smov [#allocation35]   ;;  %s6605_s10 = int_to_ptr.vmem [resolvable:$true] %s3594_s10 }
 0x1d2   :  { %531 = vmatprep.subr.bf16.mxu0 %v4514_v7  ;;  %4009 = vmatprep.subr.bf16.mxu1 %v4531_v16  ;;  %v413_v35 = vpack.c.bf16 %v402_v34, %v401_v33  ;;  %v414_v38 = vpack.c.bf16 %v404_v37, %v403_v36  ;;  %v405_v39 = vld [vmem:[#allocation2 + $0x60] sm:$0xff]  ;;  %v406_v40 = vld [vmem:[#allocation2 + $0x68] sm:$0xff]  ;;  %v407_v42 = vld [vmem:[#allocation2 + $0x70] sm:$0xff]  ;;  %s3582_s20 = sshll.u32 %s5396_s11, 4  ;;  %s3583_s20 = int_to_ptr.vmem [resolvable:$true] %s3582_s20 }
 0x1d3   :  { %v415_v41 = vpack.c.bf16 %v406_v40, %v405_v39  ;;  %v408_v43 = vld [vmem:[#allocation2 + $0x78] sm:$0xff]  ;;  %v4533_v45 = vld [vmem:[#allocation8 + $0x20] sm:$0xff]   ;;  %v4534_v46 = vld [vmem:[#allocation8 + $0x28] sm:$0xff]   ;;  %s5223_s21 = scalar_lea.vmem %s3583_s20, 2048  ;;  %p5228_p1 = scmp.lt.s32.totalorder %s3583_s20, %s3583_s20 }
 0x1d4   :  { %v416_v44 = vpack.c.bf16 %v408_v43, %v407_v42  ;;  %v4535_v47 = vld [vmem:[#allocation8 + $0x30] sm:$0xff]   ;;  %v4536_v48 = vld [vmem:[#allocation8 + $0x38] sm:$0xff]   ;;  %v4537_v49 = vld [vmem:[#allocation11] sm:$0xff]   ;;  %p5224_p0 = scmp.ne.s32.totalorder %s3583_s20, %s5223_s21  ;;  %p5229_p2 = scmp.lt.s32.totalorder %s5223_s21, %s5223_s21 }
 0x1d5   :  { %532 = vmatpush1.bf16.msra.mxu0 %v4516_v8  ;;  %4010 = vmatpush3.bf16.msra.mxu1 %v4531_v16  ;;  %v433_v53 = vld [vmem:[#allocation7] sm:$0x3] }
 0x1d6   :  { %533 = vmatprep.subr.bf16.mxu0 %v4517_v9  ;;  %4011 = vmatprep.subr.bf16.mxu1 %v4532_v19  ;;  %v5733_v55 = vrot.slane %v433_v53, %v437_v52  ;;  %v5735_v56 = vrot.slane %v433_v53, %v441_v54  ;;  %v4556_v50 = vld [vmem:[#allocation17 + $0x18] sm:$0xff]   ;;  %p5230_p3 = por %p5229_p2, %p5228_p1 }
 0x1d8   :  { %p5231_p4 = pnand %p5230_p3, %p5224_p0 }
 0x1d9   :  { %534 = vmatpush1.bf16.msra.mxu0 %v4519_v10  ;;  %4012 = vmatpush3.bf16.msra.mxu1 %v4532_v19 }
 0x1da   :  { %535 = vmatprep.subr.bf16.mxu0 %v4520_v11  ;;  %4013 = vmatprep.subr.bf16.mxu1 %v4533_v45 }
 0x1dd   :  { %536 = vmatpush1.bf16.msra.mxu0 %v4522_v14  ;;  %4014 = vmatpush3.bf16.msra.mxu1 %v4533_v45 }
 0x1de   :  { %537 = vmatprep.subr.bf16.mxu0 %v4523_v15  ;;  %4015 = vmatprep.subr.bf16.mxu1 %v4534_v46 }
 0x1e1   :  { %538 = vmatpush1.bf16.msra.mxu0 %v4525_v17  ;;  %4016 = vmatpush3.bf16.msra.mxu1 %v4534_v46 }
 0x1e2   :  { %539 = vmatprep.subr.bf16.mxu0 %v4526_v18  ;;  %4017 = vmatprep.subr.bf16.mxu1 %v4535_v47 }
 0x1e5   :  { %540 = vmatpush1.bf16.msra.mxu0 %v4528_v20  ;;  %4018 = vmatpush3.bf16.msra.mxu1 %v4535_v47 }
 0x1e6   :  { %4019 = vmatprep.subr.bf16.mxu1 %v4536_v48 }
 0x1e8   :  { %558 = vmatmul.mubr.bf16.vlgmr.msra.gmra.mrb[0].mxu0 %v409_v23 }
 0x1e9   :  { %567 = vmatprep.mubr.bf16.mxu0 %v5394_v0  ;;  %4020 = vmatpush3.bf16.msra.mxu1 %v4536_v48 }
 0x1ea   :  { %4037 = vmatprep.subr.bf16.mxu1 %v4537_v49 }
 0x1f0   :  { %568 = vmatmul.mubr.bf16.gmra.mrb[4].mxu0 %v410_v26 }
 0x1f1   :  { %577 = vmatprep.mubr.bf16.mxu0 %v5394_v0 }
 0x1f8   :  { %578 = vmatmul.mubr.bf16.gmra.mrb[8].mxu0 %v411_v29  ;;  %v4538_v29 = vld [vmem:[#allocation11 + $0x8] sm:$0xff]  }
 0x1f9   :  { %587 = vmatprep.mubr.bf16.mxu0 %v5394_v0 }
 0x200   :  { %588 = vmatmul.mubr.bf16.gmra.mrb[12].mxu0 %v412_v32 }
 0x201   :  { %597 = vmatprep.mubr.bf16.mxu0 %v5394_v0 }
 0x208   :  { %598 = vmatmul.mubr.bf16.gmra.mrb[16].mxu0 %v413_v35 }
 0x209   :  { %607 = vmatprep.mubr.bf16.mxu0 %v5394_v0 }
 0x210   :  { %608 = vmatmul.mubr.bf16.gmra.mrb[20].mxu0 %v414_v38 }
 0x211   :  { %617 = vmatprep.mubr.bf16.mxu0 %v5394_v0 }
 0x218   :  { %618 = vmatmul.mubr.bf16.gmra.mrb[24].mxu0 %v415_v41  ;;  %v4539_v41 = vld [vmem:[#allocation11 + $0x10] sm:$0xff]  }
 0x219   :  { %627 = vmatprep.mubr.bf16.mxu0 %v5394_v0 }
 0x220   :  { %628 = vmatmul.mubr.bf16.gmra.mrb[28].mxu0 %v416_v44 }
 0x2bb   :  { %v559_v57 = vpop.f32.mrb[0].mxu0 }
 0x2bc   :  { %v560_v58 = vadd.f32 %v559_v57, %v5733_v55  ;;  %v561_v59 = vpop.f32.mrb[1].mxu0 }
 0x2bd   :  { %v562_v60 = vadd.f32 %v561_v59, %v5735_v56  ;;  %v563_v61 = vpop.f32.mrb[2].mxu0 }
 0x2be   :  { %v638_v62 = vmax.f32 %v560_v58, 0.0  ;;  %v564_v63 = vadd.f32 %v563_v61, %v5733_v55  ;;  %v565_v0 = vpop.f32.mrb[3].mxu0 }
 0x2bf   :  { %v639_v1 = vmax.f32 %v562_v60, 0.0  ;;  %v566_v2 = vadd.f32 %v565_v0, %v5735_v56 }
 0x2c0   :  { %v1998_v3 = vmul.f32 0.5, %v638_v62  ;;  %v640_v4 = vmax.f32 %v564_v63, 0.0 }
 0x2c1   :  { %v1982_v5 = vmul.f32 0.5, %v639_v1  ;;  %v641_v6 = vmax.f32 %v566_v2, 0.0  ;;  %v4541_v2 = vld [vmem:[#allocation11 + $0x20] sm:$0xff]  }
 0x2c2   :  { %v1999_v7 = vmul.f32 0.5, %v640_v4  ;;  %v670_v8 = vpack.c.bf16 %v640_v4, %v638_v62 }
 0x2c3   :  { %v5741_v9 = vadd.f32 %v1998_v3, %v1982_v5  ;;  %v1983_v10 = vmul.f32 0.5, %v641_v6  ;;  %v569_v11 = vpop.f32.mrb[4].mxu0 }
 0x2c4   :  { %v570_v12 = vadd.f32 %v569_v11, %v5733_v55  ;;  %v571_v13 = vpop.f32.mrb[5].mxu0  ;;  %4021 = vmatprep.mubr.bf16.mxu1 %v670_v8 }
 0x2c5   :  { %v5744_v14 = vadd.f32 %v1999_v7, %v1983_v10  ;;  %v572_v15 = vadd.f32 %v571_v13, %v5735_v56  ;;  %v573_v16 = vpop.f32.mrb[6].mxu0  ;;  %v4542_v13 = vld [vmem:[#allocation11 + $0x28] sm:$0xff]  }
 0x2c6   :  { %v642_v17 = vmax.f32 %v570_v12, 0.0  ;;  %v574_v18 = vadd.f32 %v573_v16, %v5733_v55  ;;  %v575_v19 = vpop.f32.mrb[7].mxu0 }
 0x2c7   :  { %v643_v20 = vmax.f32 %v572_v15, 0.0  ;;  %v576_v21 = vadd.f32 %v575_v19, %v5735_v56 }
 0x2c8   :  { %v2000_v23 = vmul.f32 0.5, %v642_v17  ;;  %v644_v24 = vmax.f32 %v574_v18, 0.0 }
 0x2c9   :  { %v1984_v25 = vmul.f32 0.5, %v643_v20  ;;  %v645_v26 = vmax.f32 %v576_v21, 0.0 }
 0x2ca   :  { %v671_v27 = vpack.c.bf16 %v644_v24, %v642_v17  ;;  %v2001_v28 = vmul.f32 0.5, %v644_v24 }
 0x2cb   :  { %v5751_v30 = vadd.f32 %v2000_v23, %v1984_v25  ;;  %v1985_v31 = vmul.f32 0.5, %v645_v26  ;;  %v579_v32 = vpop.f32.mrb[8].mxu0 }
 0x2cc   :  { %v580_v33 = vadd.f32 %v579_v32, %v5733_v55  ;;  %v581_v34 = vpop.f32.mrb[9].mxu0  ;;  %4022 = vmatmul.mubr.bf16.vlgmr.msra.gmra.mrb[0].mxu1 %v671_v27 }
 0x2cd   :  { %v5754_v35 = vadd.f32 %v2001_v28, %v1985_v31  ;;  %v582_v36 = vadd.f32 %v581_v34, %v5735_v56  ;;  %v583_v37 = vpop.f32.mrb[10].mxu0  ;;  %4038 = vmatpush3.bf16.msra.mxu1 %v4537_v49  ;;  %v4540_v49 = vld [vmem:[#allocation11 + $0x18] sm:$0xff]  }
 0x2ce   :  { %v646_v38 = vmax.f32 %v580_v33, 0.0  ;;  %v584_v39 = vadd.f32 %v583_v37, %v5733_v55  ;;  %v585_v40 = vpop.f32.mrb[11].mxu0  ;;  %4039 = vmatprep.subr.bf16.mxu1 %v4538_v29 }
 0x2cf   :  { %v647_v43 = vmax.f32 %v582_v36, 0.0  ;;  %v586_v44 = vadd.f32 %v585_v40, %v5735_v56 }
 0x2d0   :  { %v2002_v45 = vmul.f32 0.5, %v646_v38  ;;  %v648_v46 = vmax.f32 %v584_v39, 0.0 }
 0x2d1   :  { %v1986_v47 = vmul.f32 0.5, %v647_v43  ;;  %v649_v48 = vmax.f32 %v586_v44, 0.0  ;;  %4040 = vmatpush3.bf16.msra.mxu1 %v4538_v29 }
 0x2d2   :  { %v672_v51 = vpack.c.bf16 %v648_v46, %v646_v38  ;;  %v2003_v52 = vmul.f32 0.5, %v648_v46  ;;  %4041 = vmatprep.subr.bf16.mxu1 %v4539_v41 }
 0x2d3   :  { %v5761_v53 = vadd.f32 %v2002_v45, %v1986_v47  ;;  %v1987_v54 = vmul.f32 0.5, %v649_v48  ;;  %v589_v57 = vpop.f32.mrb[12].mxu0 }
 0x2d4   :  { %v590_v58 = vadd.f32 %v589_v57, %v5733_v55  ;;  %v591_v59 = vpop.f32.mrb[13].mxu0  ;;  %4025 = vmatprep.mubr.bf16.mxu1 %v672_v51 }
 0x2d5   :  { %v5764_v60 = vadd.f32 %v2003_v52, %v1987_v54  ;;  %v592_v61 = vadd.f32 %v591_v59, %v5735_v56  ;;  %v593_v62 = vpop.f32.mrb[14].mxu0  ;;  %4042 = vmatpush3.bf16.msra.mxu1 %v4539_v41 }
 0x2d6   :  { %v650_v63 = vmax.f32 %v590_v58, 0.0  ;;  %v594_v0 = vadd.f32 %v593_v62, %v5733_v55  ;;  %v595_v1 = vpop.f32.mrb[15].mxu0  ;;  %4043 = vmatprep.subr.bf16.mxu1 %v4540_v49 }
 0x2d7   :  { %v651_v3 = vmax.f32 %v592_v61, 0.0  ;;  %v596_v4 = vadd.f32 %v595_v1, %v5735_v56 }
 0x2d8   :  { %v2004_v6 = vmul.f32 0.5, %v650_v63  ;;  %v652_v7 = vmax.f32 %v594_v0, 0.0 }
 0x2d9   :  { %v1988_v8 = vmul.f32 0.5, %v651_v3  ;;  %v653_v10 = vmax.f32 %v596_v4, 0.0  ;;  %4044 = vmatpush3.bf16.msra.mxu1 %v4540_v49 }
 0x2da   :  { %v673_v11 = vpack.c.bf16 %v652_v7, %v650_v63  ;;  %v2005_v12 = vmul.f32 0.5, %v652_v7  ;;  %4045 = vmatprep.subr.bf16.mxu1 %v4541_v2 }
 0x2db   :  { %v5771_v15 = vadd.f32 %v2004_v6, %v1988_v8  ;;  %v1989_v16 = vmul.f32 0.5, %v653_v10  ;;  %v599_v17 = vpop.f32.mrb[16].mxu0 }
 0x2dc   :  { %v600_v18 = vadd.f32 %v599_v17, %v5733_v55  ;;  %v601_v19 = vpop.f32.mrb[17].mxu0  ;;  %4026 = vmatmul.mubr.bf16.gmra.mrb[4].mxu1 %v673_v11 }
 0x2dd   :  { %v5774_v20 = vadd.f32 %v2005_v12, %v1989_v16  ;;  %v602_v21 = vadd.f32 %v601_v19, %v5735_v56  ;;  %v603_v23 = vpop.f32.mrb[18].mxu0  ;;  %4046 = vmatpush3.bf16.msra.mxu1 %v4541_v2 }
 0x2de   :  { %v654_v24 = vmax.f32 %v600_v18, 0.0  ;;  %v604_v25 = vadd.f32 %v603_v23, %v5733_v55  ;;  %v605_v26 = vpop.f32.mrb[19].mxu0  ;;  %4047 = vmatprep.subr.bf16.mxu1 %v4542_v13 }
 0x2df   :  { %v655_v27 = vmax.f32 %v602_v21, 0.0  ;;  %v606_v28 = vadd.f32 %v605_v26, %v5735_v56 }
 0x2e0   :  { %v2006_v31 = vmul.f32 0.5, %v654_v24  ;;  %v656_v32 = vmax.f32 %v604_v25, 0.0 }
 0x2e1   :  { %v1990_v33 = vmul.f32 0.5, %v655_v27  ;;  %v657_v34 = vmax.f32 %v606_v28, 0.0  ;;  %4048 = vmatpush3.bf16.msra.mxu1 %v4542_v13 }
 0x2e2   :  { %v674_v36 = vpack.c.bf16 %v656_v32, %v654_v24  ;;  %v2007_v37 = vmul.f32 0.5, %v656_v32 }
 0x2e3   :  { %v5781_v38 = vadd.f32 %v2006_v31, %v1990_v33  ;;  %v1991_v39 = vmul.f32 0.5, %v657_v34  ;;  %v609_v40 = vpop.f32.mrb[20].mxu0 }
 0x2e4   :  { %v610_v41 = vadd.f32 %v609_v40, %v5733_v55  ;;  %v611_v43 = vpop.f32.mrb[21].mxu0  ;;  %4029 = vmatprep.mubr.bf16.mxu1 %v674_v36 }
 0x2e5   :  { %v5784_v44 = vadd.f32 %v2007_v37, %v1991_v39  ;;  %v612_v45 = vadd.f32 %v611_v43, %v5735_v56  ;;  %v613_v46 = vpop.f32.mrb[22].mxu0 }
 0x2e6   :  { %v658_v47 = vmax.f32 %v610_v41, 0.0  ;;  %v614_v48 = vadd.f32 %v613_v46, %v5733_v55  ;;  %v615_v51 = vpop.f32.mrb[23].mxu0 }
 0x2e7   :  { %v659_v52 = vmax.f32 %v612_v45, 0.0  ;;  %v616_v49 = vadd.f32 %v615_v51, %v5735_v56 }
 0x2e8   :  { %v2008_v57 = vmul.f32 0.5, %v658_v47  ;;  %v660_v58 = vmax.f32 %v614_v48, 0.0 }
 0x2e9   :  { %v1992_v59 = vmul.f32 0.5, %v659_v52  ;;  %v661_v61 = vmax.f32 %v616_v49, 0.0 }
 0x2ea   :  { %v675_v62 = vpack.c.bf16 %v660_v58, %v658_v47  ;;  %v2009_v63 = vmul.f32 0.5, %v660_v58 }
 0x2eb   :  { %v5791_v0 = vadd.f32 %v2008_v57, %v1992_v59  ;;  %v1993_v1 = vmul.f32 0.5, %v661_v61  ;;  %v619_v2 = vpop.f32.mrb[24].mxu0  ;;  %v4543_v61 = vld [vmem:[#allocation11 + $0x30] sm:$0xff]  }
 0x2ec   :  { %v620_v3 = vadd.f32 %v619_v2, %v5733_v55  ;;  %v621_v4 = vpop.f32.mrb[25].mxu0  ;;  %4030 = vmatmul.mubr.bf16.gmra.mrb[8].mxu1 %v675_v62  ;;  %4049 = vmatprep.subr.bf16.mxu1 %v4543_v61  ;;  %v4545_v62 = vld [vmem:[#allocation14] sm:$0xff]   ;;  %v4548_v2 = vld [vmem:[#allocation14 + $0x18] sm:$0xff]  }
 0x2ed   :  { %v5794_v6 = vadd.f32 %v2009_v63, %v1993_v1  ;;  %v622_v7 = vadd.f32 %v621_v4, %v5735_v56  ;;  %v623_v8 = vpop.f32.mrb[26].mxu0  ;;  %4050 = vmatpush3.bf16.msra.mxu1 %v4543_v61  ;;  %v4546_v63 = vld [vmem:[#allocation14 + $0x8] sm:$0xff]   ;;  %4069 = vmatprep.subr.bf16.mxu0 %v4545_v62  ;;  %v4547_v1 = vld [vmem:[#allocation14 + $0x10] sm:$0xff]  }
 0x2ee   :  { %v662_v10 = vmax.f32 %v620_v3, 0.0  ;;  %v624_v11 = vadd.f32 %v623_v8, %v5733_v55  ;;  %v625_v12 = vpop.f32.mrb[27].mxu0  ;;  %4070 = vmatpush3.bf16.msra.mxu0 %v4545_v62  ;;  %v4549_v3 = vld [vmem:[#allocation14 + $0x20] sm:$0xff]   ;;  %v4550_v4 = vld [vmem:[#allocation14 + $0x28] sm:$0xff]  }
 0x2ef   :  { %v663_v13 = vmax.f32 %v622_v7, 0.0  ;;  %v626_v16 = vadd.f32 %v625_v12, %v5735_v56  ;;  %4071 = vmatprep.subr.bf16.mxu0 %v4546_v63  ;;  %v3697_v7 = vld [vmem:[#allocation10] ss:$0 sm:$0xff] }
 0x2f0   :  { %v2010_v18 = vmul.f32 0.5, %v662_v10  ;;  %v664_v19 = vmax.f32 %v624_v11, 0.0 }
 0x2f1   :  { %v1994_v21 = vmul.f32 0.5, %v663_v13  ;;  %v665_v23 = vmax.f32 %v626_v16, 0.0 }
 0x2f2   :  { %v676_v24 = vpack.c.bf16 %v664_v19, %v662_v10  ;;  %v2011_v25 = vmul.f32 0.5, %v664_v19  ;;  %4072 = vmatpush3.bf16.msra.mxu0 %v4546_v63 }
 0x2f3   :  { %v5801_v26 = vadd.f32 %v2010_v18, %v1994_v21  ;;  %v1995_v27 = vmul.f32 0.5, %v665_v23  ;;  %v629_v28 = vpop.f32.mrb[28].mxu0  ;;  %4073 = vmatprep.subr.bf16.mxu0 %v4547_v1 }
 0x2f4   :  { %v630_v31 = vadd.f32 %v629_v28, %v5733_v55  ;;  %v631_v32 = vpop.f32.mrb[29].mxu0  ;;  %4033 = vmatprep.mubr.bf16.mxu1 %v676_v24 }
 0x2f5   :  { %v5804_v33 = vadd.f32 %v2011_v25, %v1995_v27  ;;  %v632_v34 = vadd.f32 %v631_v32, %v5735_v56  ;;  %v633_v36 = vpop.f32.mrb[30].mxu0 }
 0x2f6   :  { %v666_v37 = vmax.f32 %v630_v31, 0.0  ;;  %v634_v39 = vadd.f32 %v633_v36, %v5733_v55  ;;  %v635_v40 = vpop.f32.mrb[31].mxu0  ;;  %4074 = vmatpush3.bf16.msra.mxu0 %v4547_v1 }
 0x2f7   :  { %v667_v41 = vmax.f32 %v632_v34, 0.0  ;;  %v636_v43 = vadd.f32 %v635_v40, %v5735_v56  ;;  %v4544_v56 = vld [vmem:[#allocation11 + $0x38] sm:$0xff]   ;;  %4075 = vmatprep.subr.bf16.mxu0 %v4548_v2 }
 0x2f8   :  { %v2012_v46 = vmul.f32 0.5, %v666_v37  ;;  %v668_v47 = vmax.f32 %v634_v39, 0.0  ;;  %4051 = vmatprep.subr.bf16.mxu1 %v4544_v56 }
 0x2f9   :  { %v1996_v48 = vmul.f32 0.5, %v667_v41  ;;  %v669_v51 = vmax.f32 %v636_v43, 0.0  ;;  %4052 = vmatpush3.bf16.msra.mxu1 %v4544_v56 }
 0x2fa   :  { %v677_v52 = vpack.c.bf16 %v668_v47, %v666_v37  ;;  %v2013_v49 = vmul.f32 0.5, %v668_v47  ;;  %4076 = vmatpush3.bf16.msra.mxu0 %v4548_v2 }
 0x2fb   :  { %v5811_v57 = vadd.f32 %v2012_v46, %v1996_v48  ;;  %v1997_v58 = vmul.f32 0.5, %v669_v51  ;;  %4077 = vmatprep.subr.bf16.mxu0 %v4549_v3 }
 0x2fc   :  { %4034 = vmatmul.mubr.bf16.gmra.mrb[12].mxu1 %v677_v52 }
 0x2fd   :  { %v5813_v59 = vadd.f32 %v2013_v49, %v1997_v58 }
 0x2fe   :  { %4078 = vmatpush3.bf16.msra.mxu0 %v4549_v3 }
 0x2ff   :  { %4079 = vmatprep.subr.bf16.mxu0 %v4550_v4 }
 0x302   :  { %4080 = vmatpush3.bf16.msra.mxu0 %v4550_v4 }
 0x39f   :  { %v4023_v8 = vpop.f32.mrb[0].mxu1 }
 0x3a0   :  { %v5817_v10 = vadd.f32 %v4023_v8, %v3697_v7  ;;  %v783_v11 = vpop.f32.mrb[1].mxu1 }
 0x3a1   :  { %v5819_v12 = vadd.f32 %v3697_v7, %v783_v11  ;;  %v4024_v13 = vpop.f32.mrb[2].mxu1 }
 0x3a2   :  { %v5821_v16 = vadd.f32 %v4024_v13, %v3697_v7  ;;  %v786_v18 = vpop.f32.mrb[3].mxu1  ;;  %v6689_v21 = vmax.f32 %v5817_v10, 0.0 }
 0x3a3   :  { %v5823_v19 = vadd.f32 %v3697_v7, %v786_v18  ;;  %v6684_v24 = vmax.f32 %v5819_v12, 0.0 }
 0x3a4   :  { %v6683_v23 = vmax.f32 %v5821_v16, 0.0 }
 0x3a5   :  { %v6682_v25 = vmax.f32 %v5823_v19, 0.0 }
 0x3a6   :  { %v863_v27 = vpack.c.bf16 %v6683_v23, %v6689_v21 }
 0x3a7   :  { %v862_v28 = vpack.c.bf16 %v6682_v25, %v6684_v24 }
 0x3a9   :  { %4053 = vmatprep.mubr.bf16.mxu1 %v862_v28 }
 0x3aa   :  { %4054 = vmatmul.mubr.bf16.vlgmr.msra.gmra.mrb[16].mxu1 %v863_v27 }
 0x3af   :  { %v4027_v31 = vpop.f32.mrb[4].mxu1 }
 0x3b0   :  { %v5837_v32 = vadd.f32 %v4027_v31, %v3697_v7  ;;  %v799_v34 = vpop.f32.mrb[5].mxu1 }
 0x3b1   :  { %v5839_v36 = vadd.f32 %v3697_v7, %v799_v34  ;;  %v4028_v37 = vpop.f32.mrb[6].mxu1 }
 0x3b2   :  { %v5841_v39 = vadd.f32 %v4028_v37, %v3697_v7  ;;  %v802_v40 = vpop.f32.mrb[7].mxu1  ;;  %v6681_v43 = vmax.f32 %v5837_v32, 0.0 }
 0x3b3   :  { %v5843_v41 = vadd.f32 %v3697_v7, %v802_v40  ;;  %v6676_v47 = vmax.f32 %v5839_v36, 0.0 }
 0x3b4   :  { %v6675_v46 = vmax.f32 %v5841_v39, 0.0 }
 0x3b5   :  { %v6674_v48 = vmax.f32 %v5843_v41, 0.0 }
 0x3b6   :  { %v865_v51 = vpack.c.bf16 %v6675_v46, %v6681_v43 }
 0x3b7   :  { %v864_v52 = vpack.c.bf16 %v6674_v48, %v6676_v47 }
 0x3b9   :  { %4057 = vmatprep.mubr.bf16.mxu1 %v864_v52 }
 0x3ba   :  { %4058 = vmatmul.mubr.bf16.gmra.mrb[20].mxu1 %v865_v51 }
 0x3bf   :  { %v4031_v49 = vpop.f32.mrb[8].mxu1 }
 0x3c0   :  { %v5857_v58 = vadd.f32 %v4031_v49, %v3697_v7  ;;  %v815_v61 = vpop.f32.mrb[9].mxu1 }
 0x3c1   :  { %v5859_v56 = vadd.f32 %v3697_v7, %v815_v61  ;;  %v4032_v62 = vpop.f32.mrb[10].mxu1 }
 0x3c2   :  { %v5861_v63 = vadd.f32 %v4032_v62, %v3697_v7  ;;  %v818_v1 = vpop.f32.mrb[11].mxu1  ;;  %v6673_v3 = vmax.f32 %v5857_v58, 0.0 }
 0x3c3   :  { %v5863_v2 = vadd.f32 %v3697_v7, %v818_v1  ;;  %v6672_v8 = vmax.f32 %v5859_v56, 0.0 }
 0x3c4   :  { %v6671_v4 = vmax.f32 %v5861_v63, 0.0 }
 0x3c5   :  { %v6670_v11 = vmax.f32 %v5863_v2, 0.0 }
 0x3c6   :  { %v867_v13 = vpack.c.bf16 %v6671_v4, %v6673_v3 }
 0x3c7   :  { %v866_v18 = vpack.c.bf16 %v6670_v11, %v6672_v8 }
 0x3c9   :  { %4061 = vmatprep.mubr.bf16.mxu1 %v866_v18 }
 0x3ca   :  { %4062 = vmatmul.mubr.bf16.gmra.mrb[24].mxu1 %v867_v13 }
 0x3cf   :  { %v4035_v27 = vpop.f32.mrb[12].mxu1 }
 0x3d0   :  { %v5877_v28 = vadd.f32 %v4035_v27, %v3697_v7  ;;  %v831_v31 = vpop.f32.mrb[13].mxu1  ;;  %v4552_v27 = vld [vmem:[#allocation14 + $0x38] sm:$0xff]  }
 0x3d1   :  { %v5879_v34 = vadd.f32 %v3697_v7, %v831_v31  ;;  %v4036_v37 = vpop.f32.mrb[14].mxu1  ;;  %v4553_v31 = vld [vmem:[#allocation17] sm:$0xff]  }
 0x3d2   :  { %v5881_v40 = vadd.f32 %v4036_v37, %v3697_v7  ;;  %v834_v51 = vpop.f32.mrb[15].mxu1  ;;  %v6669_v49 = vmax.f32 %v5877_v28, 0.0  ;;  %v4554_v37 = vld [vmem:[#allocation17 + $0x8] sm:$0xff]   ;;  %4101 = vmatprep.subr.bf16.mxu1 %v4553_v31 }
 0x3d3   :  { %v5883_v52 = vadd.f32 %v3697_v7, %v834_v51  ;;  %v6668_v62 = vmax.f32 %v5879_v34, 0.0  ;;  %v4551_v7 = vld [vmem:[#allocation14 + $0x30] sm:$0xff]   ;;  %4102 = vmatpush3.bf16.msra.mxu1 %v4553_v31 }
 0x3d4   :  { %v6667_v61 = vmax.f32 %v5881_v40, 0.0  ;;  %4081 = vmatprep.subr.bf16.mxu0 %v4551_v7  ;;  %4103 = vmatprep.subr.bf16.mxu1 %v4554_v37  ;;  %v4555_v51 = vld [vmem:[#allocation17 + $0x10] sm:$0xff]  }
 0x3d5   :  { %v6666_v1 = vmax.f32 %v5883_v52, 0.0  ;;  %4082 = vmatpush3.bf16.msra.mxu0 %v4551_v7 }
 0x3d6   :  { %v869_v13 = vpack.c.bf16 %v6667_v61, %v6669_v49  ;;  %4083 = vmatprep.subr.bf16.mxu0 %v4552_v27 }
 0x3d7   :  { %v868_v18 = vpack.c.bf16 %v6666_v1, %v6668_v62  ;;  %4104 = vmatpush3.bf16.msra.mxu1 %v4554_v37  ;;  %v4557_v1 = vld [vmem:[#allocation17 + $0x20] sm:$0xff]  }
 0x3d8   :  { %4105 = vmatprep.subr.bf16.mxu1 %v4555_v51 }
 0x3d9   :  { %4065 = vmatprep.mubr.bf16.mxu1 %v868_v18  ;;  %4084 = vmatpush3.bf16.msra.mxu0 %v4552_v27  ;;  %v3706_v18 = vld [vmem:[#allocation13] ss:$0 sm:$0xff] }
 0x3da   :  { %4066 = vmatmul.mubr.bf16.gmra.mrb[28].mxu1 %v869_v13  ;;  %v4558_v13 = vld [vmem:[#allocation17 + $0x28] sm:$0xff]  }
 0x3db   :  { %4106 = vmatpush3.bf16.msra.mxu1 %v4555_v51 }
 0x3dc   :  { %4107 = vmatprep.subr.bf16.mxu1 %v4556_v50 }
 0x3df   :  { %4108 = vmatpush3.bf16.msra.mxu1 %v4556_v50 }
 0x3e0   :  { %4109 = vmatprep.subr.bf16.mxu1 %v4557_v1 }
 0x3e3   :  { %4110 = vmatpush3.bf16.msra.mxu1 %v4557_v1 }
 0x3e4   :  { %4111 = vmatprep.subr.bf16.mxu1 %v4558_v13 }
 0x3e7   :  { %4112 = vmatpush3.bf16.msra.mxu1 %v4558_v13 }
 0x47d   :  { %v4055_v7 = vpop.f32.mrb[16].mxu1 }
 0x47e   :  { %v5897_v27 = vadd.f32 %v4055_v7, %v3706_v18  ;;  %v975_v61 = vpop.f32.mrb[17].mxu1 }
 0x47f   :  { %v5899_v31 = vadd.f32 %v3706_v18, %v975_v61  ;;  %v4056_v62 = vpop.f32.mrb[18].mxu1 }
 0x480   :  { %v5901_v37 = vadd.f32 %v4056_v62, %v3706_v18  ;;  %v978_v49 = vpop.f32.mrb[19].mxu1  ;;  %v6678_v50 = vmax.f32 %v5897_v27, 0.0 }
 0x481   :  { %v5903_v51 = vadd.f32 %v3706_v18, %v978_v49  ;;  %v6680_v1 = vmax.f32 %v5899_v31, 0.0 }
 0x482   :  { %v6677_v11 = vmax.f32 %v5901_v37, 0.0 }
 0x483   :  { %v6679_v13 = vmax.f32 %v5903_v51, 0.0 }
 0x484   :  { %v1055_v61 = vpack.c.bf16 %v6677_v11, %v6678_v50 }
 0x485   :  { %v1054_v62 = vpack.c.bf16 %v6679_v13, %v6680_v1 }
 0x487   :  { %4085 = vmatprep.mubr.bf16.mxu0 %v1054_v62 }
 0x488   :  { %4086 = vmatmul.mubr.bf16.vlgmr.msra.gmra.mrb[32].mxu0 %v1055_v61 }
 0x48d   :  { %v4059_v49 = vpop.f32.mrb[20].mxu1 }
 0x48e   :  { %v5917_v7 = vadd.f32 %v4059_v49, %v3706_v18  ;;  %v991_v4 = vpop.f32.mrb[21].mxu1 }
 0x48f   :  { %v5919_v8 = vadd.f32 %v3706_v18, %v991_v4  ;;  %v4060_v3 = vpop.f32.mrb[22].mxu1 }
 0x490   :  { %v5921_v48 = vadd.f32 %v4060_v3, %v3706_v18  ;;  %v994_v46 = vpop.f32.mrb[23].mxu1  ;;  %v6686_v11 = vmax.f32 %v5917_v7, 0.0 }
 0x491   :  { %v5923_v47 = vadd.f32 %v3706_v18, %v994_v46  ;;  %v6688_v13 = vmax.f32 %v5919_v8, 0.0 }
 0x492   :  { %v6685_v50 = vmax.f32 %v5921_v48, 0.0 }
 0x493   :  { %v6687_v61 = vmax.f32 %v5923_v47, 0.0 }
 0x494   :  { %v1057_v4 = vpack.c.bf16 %v6685_v50, %v6686_v11 }
 0x495   :  { %v1056_v3 = vpack.c.bf16 %v6687_v61, %v6688_v13 }
 0x497   :  { %4089 = vmatprep.mubr.bf16.mxu0 %v1056_v3 }
 0x498   :  { %4090 = vmatmul.mubr.bf16.gmra.mrb[36].mxu0 %v1057_v4 }
 0x49d   :  { %v4063_v46 = vpop.f32.mrb[24].mxu1 }
 0x49e   :  { %v5937_v62 = vadd.f32 %v4063_v46, %v3706_v18  ;;  %v1007_v49 = vpop.f32.mrb[25].mxu1 }
 0x49f   :  { %v5939_v1 = vadd.f32 %v3706_v18, %v1007_v49  ;;  %v4064_v43 = vpop.f32.mrb[26].mxu1 }
 0x4a0   :  { %v5941_v25 = vadd.f32 %v4064_v43, %v3706_v18  ;;  %v1010_v23 = vpop.f32.mrb[27].mxu1  ;;  %v6691_v50 = vmax.f32 %v5937_v62, 0.0 }
 0x4a1   :  { %6725 = vst [vmem:[#allocation68_spill] sm:$0xff] %v5939_v1  ;;  %v5943_v24 = vadd.f32 %v3706_v18, %v1010_v23  ;;  %v6693_v61 = vmax.f32 %v5939_v1, 0.0 }
 0x4a2   :  { %6726 = vst [vmem:[#allocation69_spill] sm:$0xff] %v5941_v25  ;;  %v6690_v11 = vmax.f32 %v5941_v25, 0.0 }
 0x4a3   :  { %6727 = vst [vmem:[#allocation70_spill] sm:$0xff] %v5943_v24  ;;  %v6692_v4 = vmax.f32 %v5943_v24, 0.0 }
 0x4a4   :  { %v1059_v3 = vpack.c.bf16 %v6690_v11, %v6691_v50 }
 0x4a5   :  { %v1058_v43 = vpack.c.bf16 %v6692_v4, %v6693_v61 }
 0x4a7   :  { %4093 = vmatprep.mubr.bf16.mxu0 %v1058_v43 }
 0x4a8   :  { %4094 = vmatmul.mubr.bf16.gmra.mrb[40].mxu0 %v1059_v3 }
 0x4ad   :  { %v4067_v23 = vpop.f32.mrb[28].mxu1 }
 0x4ae   :  { %v5957_v46 = vadd.f32 %v4067_v23, %v3706_v18  ;;  %v1023_v49 = vpop.f32.mrb[29].mxu1  ;;  %v5977_v23 = vld [vmem:[#allocation16] ss:$0 sm:$0xff] }
 0x4af   :  { %v5959_v13 = vadd.f32 %v3706_v18, %v1023_v49  ;;  %v4068_v21 = vpop.f32.mrb[30].mxu1 }
 0x4b0   :  { %6728 = vst [vmem:[#allocation71_spill] sm:$0xff] %v5957_v46  ;;  %v5961_v55 = vadd.f32 %v4068_v21, %v3706_v18  ;;  %v1026_v45 = vpop.f32.mrb[31].mxu1  ;;  %v6695_v11 = vmax.f32 %v5957_v46, 0.0 }
 0x4b1   :  { %6729 = vst [vmem:[#allocation72_spill] sm:$0xff] %v5959_v13  ;;  %v5963_v17 = vadd.f32 %v3706_v18, %v1026_v45  ;;  %v6697_v4 = vmax.f32 %v5959_v13, 0.0  ;;  %v4559_v45 = vld [vmem:[#allocation17 + $0x30] sm:$0xff]   ;;  %v4560_v18 = vld [vmem:[#allocation17 + $0x38] sm:$0xff]  }
 0x4b2   :  { %6730 = vst [vmem:[#allocation73_spill] sm:$0xff] %v5961_v55  ;;  %v6694_v50 = vmax.f32 %v5961_v55, 0.0  ;;  %4113 = vmatprep.subr.bf16.mxu1 %v4559_v45 }
 0x4b3   :  { %6731 = vst [vmem:[#allocation74_spill] sm:$0xff] %v5963_v17  ;;  %v6696_v3 = vmax.f32 %v5963_v17, 0.0  ;;  %4114 = vmatpush3.bf16.msra.mxu1 %v4559_v45 }
 0x4b4   :  { %v1061_v43 = vpack.c.bf16 %v6694_v50, %v6695_v11  ;;  %4115 = vmatprep.subr.bf16.mxu1 %v4560_v18 }
 0x4b5   :  { %v1060_v21 = vpack.c.bf16 %v6696_v3, %v6697_v4 }
 0x4b7   :  { %4097 = vmatprep.mubr.bf16.mxu0 %v1060_v21  ;;  %4116 = vmatpush3.bf16.msra.mxu1 %v4560_v18 }
 0x4b8   :  { %4098 = vmatmul.mubr.bf16.gmra.mrb[44].mxu0 %v1061_v43 }
 0x55b   :  { %v4087_v49 = vpop.f32.mrb[32].mxu0 }
 0x55c   :  { %v1176_v61 = vadd.f32 %v4087_v49, %v5977_v23  ;;  %v1167_v54 = vpop.f32.mrb[33].mxu0 }
 0x55d   :  { %v1168_v50 = vadd.f32 %v5977_v23, %v1167_v54  ;;  %v4088_v11 = vpop.f32.mrb[34].mxu0 }
 0x55e   :  { %3563 = vst [vmem:[#allocation39 + $0x10] sm:$0xff] %v1176_v61  ;;  %v1179_v3 = vadd.f32 %v4088_v11, %v5977_v23  ;;  %v1170_v21 = vpop.f32.mrb[35].mxu0  ;;  %v3123_v43 = vmul.f32 %v1176_v61, %v1176_v61 }
 0x55f   :  { %3561 = vst [vmem:[#allocation39] sm:$0xff] %v1168_v50  ;;  %v1171_v45 = vadd.f32 %v5977_v23, %v1170_v21  ;;  %v3121_v4 = vmul.f32 %v1168_v50, %v1168_v50 }
 0x560   :  { %3564 = vst [vmem:[#allocation39 + $0x18] sm:$0xff] %v1179_v3  ;;  %3141 = vadd.xlane.f32.xlu1 %v3123_v43  ;;  %v3124_v29 = vmul.f32 %v1179_v3, %v1179_v3  ;;  %v1231_v49 = vpack.c.bf16 %v1179_v3, %v1176_v61 }
 0x561   :  { %3562 = vst [vmem:[#allocation39 + $0x8] sm:$0xff] %v1171_v45  ;;  %3137 = vadd.xlane.f32.xlu0 %v3121_v4  ;;  %v1230_v18 = vpack.c.bf16 %v1171_v45, %v1168_v50  ;;  %v3122_v5 = vmul.f32 %v1171_v45, %v1171_v45 }
 0x563   :  { %4117 = vmatprep.mubr.bf16.mxu1 %v1230_v18 }
 0x564   :  { %3143 = vadd.xlane.f32.xlu1 %v3124_v29  ;;  %4118 = vmatmul.mubr.bf16.vlgmr.msra.gmra.mrb[32].mxu1 %v1231_v49 }
 0x565   :  { %3139 = vadd.xlane.f32.xlu0 %v3122_v5 }
 0x56b   :  { %v4091_v54 = vpop.f32.mrb[36].mxu0 }
 0x56c   :  { %v1192_v11 = vadd.f32 %v4091_v54, %v5977_v23  ;;  %v1183_v42 = vpop.f32.mrb[37].mxu0 }
 0x56d   :  { %v1184_v22 = vadd.f32 %v5977_v23, %v1183_v42  ;;  %v4092_v21 = vpop.f32.mrb[38].mxu0 }
 0x56e   :  { %3567 = vst [vmem:[#allocation39 + $0x30] sm:$0xff] %v1192_v11  ;;  %v1195_v43 = vadd.f32 %v4092_v21, %v5977_v23  ;;  %v1186_v17 = vpop.f32.mrb[39].mxu0  ;;  %v3127_v4 = vmul.f32 %v1192_v11, %v1192_v11 }
 0x56f   :  { %3565 = vst [vmem:[#allocation39 + $0x20] sm:$0xff] %v1184_v22  ;;  %v1187_v50 = vadd.f32 %v5977_v23, %v1186_v17  ;;  %v3125_v61 = vmul.f32 %v1184_v22, %v1184_v22 }
 0x570   :  { %3568 = vst [vmem:[#allocation39 + $0x38] sm:$0xff] %v1195_v43  ;;  %3149 = vadd.xlane.f32.xlu0 %v3127_v4  ;;  %v3128_v29 = vmul.f32 %v1195_v43, %v1195_v43  ;;  %v1233_v3 = vpack.c.bf16 %v1195_v43, %v1192_v11 }
 0x571   :  { %3566 = vst [vmem:[#allocation39 + $0x28] sm:$0xff] %v1187_v50  ;;  %v1232_v5 = vpack.c.bf16 %v1187_v50, %v1184_v22  ;;  %v3126_v42 = vmul.f32 %v1187_v50, %v1187_v50 }
 0x572   :  { %3151 = vadd.xlane.f32.xlu1 %v3128_v29 }
 0x573   :  { %4121 = vmatprep.mubr.bf16.mxu1 %v1232_v5 }
 0x574   :  { %3145 = vadd.xlane.f32.xlu0 %v3125_v61  ;;  %4122 = vmatmul.mubr.bf16.gmra.mrb[36].mxu1 %v1233_v3 }
 0x576   :  { %3147 = vadd.xlane.f32.xlu1 %v3126_v42 }
 0x57b   :  { %v4095_v45 = vpop.f32.mrb[40].mxu0 }
 0x57c   :  { %v1208_v18 = vadd.f32 %v4095_v45, %v5977_v23  ;;  %v1199_v49 = vpop.f32.mrb[41].mxu0 }
 0x57d   :  { %v1200_v54 = vadd.f32 %v5977_v23, %v1199_v49  ;;  %v4096_v17 = vpop.f32.mrb[42].mxu0 }
 0x57e   :  { %3571 = vst [vmem:[#allocation39 + $0x50] sm:$0xff] %v1208_v18  ;;  %v1211_v21 = vadd.f32 %v4096_v17, %v5977_v23  ;;  %v1202_v4 = vpop.f32.mrb[43].mxu0  ;;  %v3131_v55 = vmul.f32 %v1208_v18, %v1208_v18 }
 0x57f   :  { %3569 = vst [vmem:[#allocation39 + $0x40] sm:$0xff] %v1200_v54  ;;  %v1203_v22 = vadd.f32 %v5977_v23, %v1202_v4  ;;  %v3129_v50 = vmul.f32 %v1200_v54, %v1200_v54 }
 0x580   :  { %3572 = vst [vmem:[#allocation39 + $0x58] sm:$0xff] %v1211_v21  ;;  %3157 = vadd.xlane.f32.xlu0 %v3131_v55  ;;  %v3132_v11 = vmul.f32 %v1211_v21, %v1211_v21  ;;  %v1235_v29 = vpack.c.bf16 %v1211_v21, %v1208_v18 }
 0x581   :  { %3570 = vst [vmem:[#allocation39 + $0x48] sm:$0xff] %v1203_v22  ;;  %v1234_v43 = vpack.c.bf16 %v1203_v22, %v1200_v54  ;;  %v3130_v5 = vmul.f32 %v1203_v22, %v1203_v22 }
 0x582   :  { %3159 = vadd.xlane.f32.xlu1 %v3132_v11 }
 0x583   :  { %4125 = vmatprep.mubr.bf16.mxu1 %v1234_v43 }
 0x584   :  { %3153 = vadd.xlane.f32.xlu0 %v3129_v50  ;;  %4126 = vmatmul.mubr.bf16.gmra.mrb[40].mxu1 %v1235_v29  ;;  %v4561_v50 = vld [vmem:[#allocation20] sm:$0xff]   ;;  %v4562_v29 = vld [vmem:[#allocation20 + $0x8] sm:$0xff]  }
 0x585   :  { %4133 = vmatprep.subr.bf16.mxu0 %v4561_v50 }
 0x586   :  { %3155 = vadd.xlane.f32.xlu1 %v3130_v5  ;;  %4134 = vmatpush3.bf16.msra.mxu0 %v4561_v50  ;;  %v4563_v5 = vld [vmem:[#allocation20 + $0x10] sm:$0xff]  }
 0x587   :  { %4135 = vmatprep.subr.bf16.mxu0 %v4562_v29 }
 0x58a   :  { %4136 = vmatpush3.bf16.msra.mxu0 %v4562_v29 }
 0x58b   :  { %v4099_v61 = vpop.f32.mrb[44].mxu0  ;;  %4137 = vmatprep.subr.bf16.mxu0 %v4563_v5 }
 0x58c   :  { %v1224_v3 = vadd.f32 %v4099_v61, %v5977_v23  ;;  %v1215_v42 = vpop.f32.mrb[45].mxu0  ;;  %v4565_v61 = vld [vmem:[#allocation20 + $0x20] sm:$0xff]  }
 0x58d   :  { %v1216_v45 = vadd.f32 %v5977_v23, %v1215_v42  ;;  %v4100_v49 = vpop.f32.mrb[46].mxu0  ;;  %v4567_v42 = vld [vmem:[#allocation20 + $0x30] sm:$0xff]  }
 0x58e   :  { %3575 = vst [vmem:[#allocation39 + $0x70] sm:$0xff] %v1224_v3  ;;  %v1227_v55 = vadd.f32 %v4100_v49, %v5977_v23  ;;  %v1218_v17 = vpop.f32.mrb[47].mxu0  ;;  %v3135_v4 = vmul.f32 %v1224_v3, %v1224_v3  ;;  %4138 = vmatpush3.bf16.msra.mxu0 %v4563_v5  ;;  %v4569_v49 = vld [vmem:[#allocation23] sm:$0xff]  }
 0x58f   :  { %3573 = vst [vmem:[#allocation39 + $0x60] sm:$0xff] %v1216_v45  ;;  %v1219_v18 = vadd.f32 %v5977_v23, %v1218_v17  ;;  %v3133_v22 = vmul.f32 %v1216_v45, %v1216_v45  ;;  %v4564_v23 = vld [vmem:[#allocation20 + $0x18] sm:$0xff]   ;;  %4165 = vmatprep.subr.bf16.mxu1 %v4569_v49 }
 0x590   :  { %3576 = vst [vmem:[#allocation39 + $0x78] sm:$0xff] %v1227_v55  ;;  %3165 = vadd.xlane.f32.xlu0 %v3135_v4  ;;  %v3136_v54 = vmul.f32 %v1227_v55, %v1227_v55  ;;  %v1237_v11 = vpack.c.bf16 %v1227_v55, %v1224_v3  ;;  %4139 = vmatprep.subr.bf16.mxu0 %v4564_v23  ;;  %v4566_v3 = vld [vmem:[#allocation20 + $0x28] sm:$0xff]   ;;  %v4571_v17 = vld [vmem:[#allocation23 + $0x10] sm:$0xff]   ;;  %v4572_v4 = vld [vmem:[#allocation23 + $0x18] sm:$0xff]  }
 0x591   :  { %3574 = vst [vmem:[#allocation39 + $0x68] sm:$0xff] %v1219_v18  ;;  %v1236_v21 = vpack.c.bf16 %v1219_v18, %v1216_v45  ;;  %v3134_v43 = vmul.f32 %v1219_v18, %v1219_v18  ;;  %v4568_v45 = vld [vmem:[#allocation20 + $0x38] sm:$0xff]   ;;  %v4570_v55 = vld [vmem:[#allocation23 + $0x8] sm:$0xff]   ;;  %4166 = vmatpush3.bf16.msra.mxu1 %v4569_v49  ;;  %v4573_v18 = vld [vmem:[#allocation23 + $0x20] sm:$0xff]  }
 0x592   :  { %3167 = vadd.xlane.f32.xlu1 %v3136_v54  ;;  %4140 = vmatpush3.bf16.msra.mxu0 %v4564_v23  ;;  %v4574_v54 = vld [vmem:[#allocation23 + $0x28] sm:$0xff]  }
 0x593   :  { %4129 = vmatprep.mubr.bf16.mxu1 %v1236_v21  ;;  %4141 = vmatprep.subr.bf16.mxu0 %v4565_v61  ;;  %v3724_v21 = vld [vmem:[#allocation19] ss:$0 sm:$0xff] }
 0x594   :  { %3161 = vadd.xlane.f32.xlu0 %v3133_v22  ;;  %4130 = vmatmul.mubr.bf16.gmra.mrb[44].mxu1 %v1237_v11 }
 0x595   :  { %4167 = vmatprep.subr.bf16.mxu1 %v4570_v55 }
 0x596   :  { %3163 = vadd.xlane.f32.xlu1 %v3134_v43  ;;  %4142 = vmatpush3.bf16.msra.mxu0 %v4565_v61 }
 0x597   :  { %4143 = vmatprep.subr.bf16.mxu0 %v4566_v3  ;;  %4168 = vmatpush3.bf16.msra.mxu1 %v4570_v55 }
 0x598   :  { %4169 = vmatprep.subr.bf16.mxu1 %v4571_v17 }
 0x59a   :  { %4144 = vmatpush3.bf16.msra.mxu0 %v4566_v3 }
 0x59b   :  { %4145 = vmatprep.subr.bf16.mxu0 %v4567_v42  ;;  %4170 = vmatpush3.bf16.msra.mxu1 %v4571_v17 }
 0x59c   :  { %4171 = vmatprep.subr.bf16.mxu1 %v4572_v4 }
 0x59e   :  { %4146 = vmatpush3.bf16.msra.mxu0 %v4567_v42 }
 0x59f   :  { %4147 = vmatprep.subr.bf16.mxu0 %v4568_v45  ;;  %4172 = vmatpush3.bf16.msra.mxu1 %v4572_v4 }
 0x5a0   :  { %4173 = vmatprep.subr.bf16.mxu1 %v4573_v18 }
 0x5a2   :  { %4148 = vmatpush3.bf16.msra.mxu0 %v4568_v45 }
 0x5a3   :  { %4174 = vmatpush3.bf16.msra.mxu1 %v4573_v18 }
 0x5a4   :  { %4175 = vmatprep.subr.bf16.mxu1 %v4574_v54 }
 0x5a7   :  { %4176 = vmatpush3.bf16.msra.mxu1 %v4574_v54 }
 0x637   :  { %v4119_v22 = vpop.f32.mrb[32].mxu1 }
 0x638   :  { %v1352_v11 = vadd.f32 %v4119_v22, %v3724_v21  ;;  %v1343_v43 = vpop.f32.mrb[33].mxu1 }
 0x639   :  { %v1344_v50 = vadd.f32 %v3724_v21, %v1343_v43  ;;  %v4120_v29 = vpop.f32.mrb[34].mxu1 }
 0x63a   :  { %v1355_v5 = vadd.f32 %v4120_v29, %v3724_v21  ;;  %v1346_v23 = vpop.f32.mrb[35].mxu1  ;;  %v1408_v3 = vmax.f32 %v1352_v11, 0.0 }
 0x63b   :  { %v1347_v61 = vadd.f32 %v3724_v21, %v1346_v23  ;;  %v1406_v45 = vmax.f32 %v1344_v50, 0.0 }
 0x63c   :  { %v1409_v42 = vmax.f32 %v1355_v5, 0.0 }
 0x63d   :  { %v1407_v49 = vmax.f32 %v1347_v61, 0.0 }
 0x63e   :  { %v1423_v55 = vpack.c.bf16 %v1409_v42, %v1408_v3 }
 0x63f   :  { %v1422_v17 = vpack.c.bf16 %v1407_v49, %v1406_v45 }
 0x641   :  { %4149 = vmatprep.mubr.bf16.mxu0 %v1422_v17 }
 0x642   :  { %4150 = vmatmul.mubr.bf16.vlgmr.msra.gmra.mrb[48].mxu0 %v1423_v55 }
 0x647   :  { %v4123_v4 = vpop.f32.mrb[36].mxu1 }
 0x648   :  { %v1368_v18 = vadd.f32 %v4123_v4, %v3724_v21  ;;  %v1359_v54 = vpop.f32.mrb[37].mxu1 }
 0x649   :  { %v1360_v13 = vadd.f32 %v3724_v21, %v1359_v54  ;;  %v4124_v46 = vpop.f32.mrb[38].mxu1 }
 0x64a   :  { %v1371_v22 = vadd.f32 %v4124_v46, %v3724_v21  ;;  %v1362_v24 = vpop.f32.mrb[39].mxu1  ;;  %v1412_v25 = vmax.f32 %v1368_v18, 0.0 }
 0x64b   :  { %v1363_v43 = vadd.f32 %v3724_v21, %v1362_v24  ;;  %v1410_v1 = vmax.f32 %v1360_v13, 0.0 }
 0x64c   :  { %v1413_v29 = vmax.f32 %v1371_v22, 0.0 }
 0x64d   :  { %v1411_v23 = vmax.f32 %v1363_v43, 0.0 }
 0x64e   :  { %v1425_v11 = vpack.c.bf16 %v1413_v29, %v1412_v25 }
 0x64f   :  { %v1424_v5 = vpack.c.bf16 %v1411_v23, %v1410_v1 }
 0x651   :  { %4153 = vmatprep.mubr.bf16.mxu0 %v1424_v5 }
 0x652   :  { %4154 = vmatmul.mubr.bf16.gmra.mrb[52].mxu0 %v1425_v11 }
 0x657   :  { %v4127_v50 = vpop.f32.mrb[40].mxu1 }
 0x658   :  { %v1384_v61 = vadd.f32 %v4127_v50, %v3724_v21  ;;  %v1375_v3 = vpop.f32.mrb[41].mxu1 }
 0x659   :  { %v1376_v42 = vadd.f32 %v3724_v21, %v1375_v3  ;;  %v4128_v45 = vpop.f32.mrb[42].mxu1 }
 0x65a   :  { %v1387_v49 = vadd.f32 %v4128_v45, %v3724_v21  ;;  %v1378_v55 = vpop.f32.mrb[43].mxu1  ;;  %v1416_v4 = vmax.f32 %v1384_v61, 0.0 }
 0x65b   :  { %v1379_v17 = vadd.f32 %v3724_v21, %v1378_v55  ;;  %v1414_v54 = vmax.f32 %v1376_v42, 0.0  ;;  %v4575_v55 = vld [vmem:[#allocation23 + $0x30] sm:$0xff]  }
 0x65c   :  { %v1417_v46 = vmax.f32 %v1387_v49, 0.0  ;;  %4177 = vmatprep.subr.bf16.mxu1 %v4575_v55 }
 0x65d   :  { %v1415_v24 = vmax.f32 %v1379_v17, 0.0  ;;  %4178 = vmatpush3.bf16.msra.mxu1 %v4575_v55  ;;  %v4576_v17 = vld [vmem:[#allocation23 + $0x38] sm:$0xff]  }
 0x65e   :  { %v1427_v18 = vpack.c.bf16 %v1417_v46, %v1416_v4  ;;  %4179 = vmatprep.subr.bf16.mxu1 %v4576_v17  ;;  %v4577_v4 = vld [vmem:[%s6732_s7] sm:$0xff]   ;;  %v4585_v46 = vld [vmem:[#allocation26] sm:$0xff]  }
 0x65f   :  { %v1426_v22 = vpack.c.bf16 %v1415_v24, %v1414_v54  ;;  %v4586_v54 = vld [vmem:[#allocation26 + $0x8] sm:$0xff]   ;;  %4197 = vmatprep.subr.bf16.mxu0 %v4585_v46  ;;  %v4588_v24 = vld [vmem:[#allocation26 + $0x18] sm:$0xff]  }
 0x660   :  { %4198 = vmatpush3.bf16.msra.mxu0 %v4585_v46  ;;  %v4579_v46 = vld [vmem:[%s6732_s7 + $0x10] sm:$0xff]  }
 0x661   :  { %4157 = vmatprep.mubr.bf16.mxu0 %v1426_v22  ;;  %4180 = vmatpush3.bf16.msra.mxu1 %v4576_v17  ;;  %v4590_v22 = vld [vmem:[#allocation26 + $0x28] sm:$0xff]   ;;  %v4578_v17 = vld [vmem:[%s6732_s7 + $0x8] sm:$0xff]  }
 0x662   :  { %4158 = vmatmul.mubr.bf16.gmra.mrb[56].mxu0 %v1427_v18  ;;  %4229 = vmatprep.subr.bf16.mxu1 %v4577_v4  ;;  %v4589_v18 = vld [vmem:[#allocation26 + $0x20] sm:$0xff]  }
 0x663   :  { %4199 = vmatprep.subr.bf16.mxu0 %v4586_v54 }
 0x664   :  { %4200 = vmatpush3.bf16.msra.mxu0 %v4586_v54 }
 0x667   :  { %v4131_v25 = vpop.f32.mrb[44].mxu1 }
 0x668   :  { %v1400_v1 = vadd.f32 %v4131_v25, %v3724_v21  ;;  %v1391_v13 = vpop.f32.mrb[45].mxu1  ;;  %v5996_v25 = vld [vmem:[#allocation22] ss:$0 sm:$0xff] }
 0x669   :  { %v1392_v43 = vadd.f32 %v3724_v21, %v1391_v13  ;;  %v4132_v29 = vpop.f32.mrb[46].mxu1 }
 0x66a   :  { %v1403_v23 = vadd.f32 %v4132_v29, %v3724_v21  ;;  %v1394_v11 = vpop.f32.mrb[47].mxu1  ;;  %v1420_v50 = vmax.f32 %v1400_v1, 0.0 }
 0x66b   :  { %v1395_v5 = vadd.f32 %v3724_v21, %v1394_v11  ;;  %v1418_v45 = vmax.f32 %v1392_v43, 0.0  ;;  %v4587_v21 = vld [vmem:[#allocation26 + $0x10] sm:$0xff]  }
 0x66c   :  { %v1421_v3 = vmax.f32 %v1403_v23, 0.0  ;;  %4201 = vmatprep.subr.bf16.mxu0 %v4587_v21 }
 0x66d   :  { %v1419_v61 = vmax.f32 %v1395_v5, 0.0  ;;  %4202 = vmatpush3.bf16.msra.mxu0 %v4587_v21 }
 0x66e   :  { %v1429_v49 = vpack.c.bf16 %v1421_v3, %v1420_v50  ;;  %4203 = vmatprep.subr.bf16.mxu0 %v4588_v24 }
 0x66f   :  { %v1428_v42 = vpack.c.bf16 %v1419_v61, %v1418_v45 }
 0x671   :  { %4161 = vmatprep.mubr.bf16.mxu0 %v1428_v42  ;;  %4204 = vmatpush3.bf16.msra.mxu0 %v4588_v24 }
 0x672   :  { %4162 = vmatmul.mubr.bf16.gmra.mrb[60].mxu0 %v1429_v49  ;;  %4205 = vmatprep.subr.bf16.mxu0 %v4589_v18 }
 0x675   :  { %4206 = vmatpush3.bf16.msra.mxu0 %v4589_v18  ;;  %v4580_v18 = vld [vmem:[%s6732_s7 + $0x18] sm:$0xff]  }
 0x676   :  { %4207 = vmatprep.subr.bf16.mxu0 %v4590_v22 }
 0x679   :  { %4208 = vmatpush3.bf16.msra.mxu0 %v4590_v22 }
 0x715   :  { %v4151_v1 = vpop.f32.mrb[48].mxu0 }
 0x716   :  { %v1544_v13 = vadd.f32 %v4151_v1, %v5996_v25  ;;  %v1535_v43 = vpop.f32.mrb[49].mxu0 }
 0x717   :  { %v1536_v29 = vadd.f32 %v5996_v25, %v1535_v43  ;;  %v4152_v23 = vpop.f32.mrb[50].mxu0 }
 0x718   :  { %v1547_v11 = vadd.f32 %v4152_v23, %v5996_v25  ;;  %v1538_v5 = vpop.f32.mrb[51].mxu0  ;;  %v1600_v3 = vmax.f32 %v1544_v13, 0.0 }
 0x719   :  { %v1539_v50 = vadd.f32 %v5996_v25, %v1538_v5  ;;  %v1598_v61 = vmax.f32 %v1536_v29, 0.0 }
 0x71a   :  { %v1601_v45 = vmax.f32 %v1547_v11, 0.0  ;;  %v4581_v11 = vld [vmem:[%s6732_s7 + $0x20] sm:$0xff]  }
 0x71b   :  { %v1599_v49 = vmax.f32 %v1539_v50, 0.0 }
 0x71c   :  { %v1615_v42 = vpack.c.bf16 %v1601_v45, %v1600_v3 }
 0x71d   :  { %v1614_v55 = vpack.c.bf16 %v1599_v49, %v1598_v61  ;;  %v4582_v61 = vld [vmem:[%s6732_s7 + $0x28] sm:$0xff]   ;;  %v4583_v49 = vld [vmem:[%s6732_s7 + $0x30] sm:$0xff]  }
 0x71f   :  { %4181 = vmatprep.mubr.bf16.mxu1 %v1614_v55 }
 0x720   :  { %4182 = vmatmul.mubr.bf16.vlgmr.msra.gmra.mrb[48].mxu1 %v1615_v42 }
 0x721   :  { %4230 = vmatpush3.bf16.msra.mxu1 %v4577_v4 }
 0x722   :  { %4231 = vmatprep.subr.bf16.mxu1 %v4578_v17 }
 0x725   :  { %v4155_v54 = vpop.f32.mrb[52].mxu0  ;;  %4232 = vmatpush3.bf16.msra.mxu1 %v4578_v17 }
 0x726   :  { %v1560_v21 = vadd.f32 %v4155_v54, %v5996_v25  ;;  %v1551_v24 = vpop.f32.mrb[53].mxu0  ;;  %4233 = vmatprep.subr.bf16.mxu1 %v4579_v46 }
 0x727   :  { %v1552_v22 = vadd.f32 %v5996_v25, %v1551_v24  ;;  %v4156_v1 = vpop.f32.mrb[54].mxu0 }
 0x728   :  { %v1563_v13 = vadd.f32 %v4156_v1, %v5996_v25  ;;  %v1554_v43 = vpop.f32.mrb[55].mxu0  ;;  %v1604_v4 = vmax.f32 %v1560_v21, 0.0 }
 0x729   :  { %v1555_v29 = vadd.f32 %v5996_v25, %v1554_v43  ;;  %4234 = vmatpush3.bf16.msra.mxu1 %v4579_v46  ;;  %v1602_v5 = vmax.f32 %v1552_v22, 0.0  ;;  %v4584_v46 = vld [vmem:[%s6732_s7 + $0x38] sm:$0xff]  }
 0x72a   :  { %v1605_v23 = vmax.f32 %v1563_v13, 0.0  ;;  %4235 = vmatprep.subr.bf16.mxu1 %v4580_v18 }
 0x72b   :  { %v1603_v50 = vmax.f32 %v1555_v29, 0.0 }
 0x72c   :  { %v1617_v3 = vpack.c.bf16 %v1605_v23, %v1604_v4 }
 0x72d   :  { %v1616_v45 = vpack.c.bf16 %v1603_v50, %v1602_v5  ;;  %4236 = vmatpush3.bf16.msra.mxu1 %v4580_v18 }
 0x72e   :  { %4237 = vmatprep.subr.bf16.mxu1 %v4581_v11 }
 0x72f   :  { %4185 = vmatprep.mubr.bf16.mxu1 %v1616_v45 }
 0x730   :  { %4186 = vmatmul.mubr.bf16.gmra.mrb[52].mxu1 %v1617_v3 }
 0x731   :  { %4238 = vmatpush3.bf16.msra.mxu1 %v4581_v11 }
 0x732   :  { %4239 = vmatprep.subr.bf16.mxu1 %v4582_v61 }
 0x735   :  { %v4159_v42 = vpop.f32.mrb[56].mxu0  ;;  %4240 = vmatpush3.bf16.msra.mxu1 %v4582_v61 }
 0x736   :  { %v1576_v55 = vadd.f32 %v4159_v42, %v5996_v25  ;;  %v1567_v17 = vpop.f32.mrb[57].mxu0  ;;  %4241 = vmatprep.subr.bf16.mxu1 %v4583_v49 }
 0x737   :  { %v1568_v54 = vadd.f32 %v5996_v25, %v1567_v17  ;;  %v4160_v21 = vpop.f32.mrb[58].mxu0 }
 0x738   :  { %v1579_v24 = vadd.f32 %v4160_v21, %v5996_v25  ;;  %v1570_v18 = vpop.f32.mrb[59].mxu0  ;;  %v1608_v1 = vmax.f32 %v1576_v55, 0.0 }
 0x739   :  { %v1571_v22 = vadd.f32 %v5996_v25, %v1570_v18  ;;  %4242 = vmatpush3.bf16.msra.mxu1 %v4583_v49  ;;  %v1606_v43 = vmax.f32 %v1568_v54, 0.0  ;;  %v6733_v18 = vpack.c.bf16 %v5744_v14, %v5741_v9  ;;  %v6738_v9 = vpack.c.bf16 %v5794_v6, %v5791_v0 }
 0x73a   :  { %v1609_v13 = vmax.f32 %v1579_v24, 0.0  ;;  %4243 = vmatprep.subr.bf16.mxu1 %v4584_v46  ;;  %v6739_v14 = vpack.c.bf16 %v5804_v33, %v5801_v26 }
 0x73b   :  { %v1607_v29 = vmax.f32 %v1571_v22, 0.0  ;;  %v6734_v22 = vpack.c.bf16 %v5754_v35, %v5751_v30  ;;  %v6740_v30 = vpack.c.bf16 %v5813_v59, %v5811_v57  ;;  %v4591_v35 = vld [vmem:[#allocation26 + $0x30] sm:$0xff]  }
 0x73c   :  { %v1619_v4 = vpack.c.bf16 %v1609_v13, %v1608_v1  ;;  %v6735_v1 = vpack.c.bf16 %v5764_v60, %v5761_v53  ;;  %v6737_v13 = vpack.c.bf16 %v5784_v44, %v5781_v38  ;;  %4209 = vmatprep.subr.bf16.mxu0 %v4591_v35  ;;  %v4592_v53 = vld [vmem:[#allocation26 + $0x38] sm:$0xff]   ;;  %v4593_v60 = vld [vmem:[#allocation29] sm:$0xff]  }
 0x73d   :  { %v1618_v23 = vpack.c.bf16 %v1607_v29, %v1606_v43  ;;  %4244 = vmatpush3.bf16.msra.mxu1 %v4584_v46  ;;  %4210 = vmatpush3.bf16.msra.mxu0 %v4591_v35 }
 0x73e   :  { %4211 = vmatprep.subr.bf16.mxu0 %v4592_v53 }
 0x73f   :  { %4189 = vmatprep.mubr.bf16.mxu1 %v1618_v23 }
 0x740   :  { %4190 = vmatmul.mubr.bf16.gmra.mrb[56].mxu1 %v1619_v4 }
 0x741   :  { %4212 = vmatpush3.bf16.msra.mxu0 %v4592_v53 }
 0x742   :  { %4261 = vmatprep.subr.bf16.mxu0 %v4593_v60 }
 0x745   :  { %v4163_v11 = vpop.f32.mrb[60].mxu0 }
 0x746   :  { %v1592_v5 = vadd.f32 %v4163_v11, %v5996_v25  ;;  %v1583_v50 = vpop.f32.mrb[61].mxu0 }
 0x747   :  { %v1584_v3 = vadd.f32 %v5996_v25, %v1583_v50  ;;  %v4164_v45 = vpop.f32.mrb[62].mxu0  ;;  %v4595_v50 = vld [vmem:[#allocation29 + $0x10] sm:$0xff]  }
 0x748   :  { %v1595_v61 = vadd.f32 %v4164_v45, %v5996_v25  ;;  %v1586_v49 = vpop.f32.mrb[63].mxu0  ;;  %v1612_v55 = vmax.f32 %v1592_v5, 0.0  ;;  %v4594_v5 = vld [vmem:[#allocation29 + $0x8] sm:$0xff]  }
 0x749   :  { %v1587_v42 = vadd.f32 %v5996_v25, %v1586_v49  ;;  %v1610_v54 = vmax.f32 %v1584_v3, 0.0  ;;  %v6736_v25 = vpack.c.bf16 %v5774_v20, %v5771_v15  ;;  %v6045_v15 = vld [vmem:[#allocation25] ss:$0 sm:$0xff] }
 0x74a   :  { %v1613_v17 = vmax.f32 %v1595_v61, 0.0  ;;  %v4596_v49 = vld [vmem:[#allocation29 + $0x18] sm:$0xff]  }
 0x74b   :  { %v1611_v21 = vmax.f32 %v1587_v42, 0.0 }
 0x74c   :  { %v1621_v24 = vpack.c.bf16 %v1613_v17, %v1612_v55 }
 0x74d   :  { %v1620_v46 = vpack.c.bf16 %v1611_v21, %v1610_v54 }
 0x74f   :  { %4193 = vmatprep.mubr.bf16.mxu1 %v1620_v46 }
 0x750   :  { %4194 = vmatmul.mubr.bf16.gmra.mrb[60].mxu1 %v1621_v24 }
 0x751   :  { %4245 = vmatprep.mubr.bf16.mxu1 %v6733_v18  ;;  %v4597_v18 = vld [vmem:[#allocation29 + $0x20] sm:$0xff]  }
 0x758   :  { %4246 = vmatmul.mubr.bf16.vlgmr.msra.gmra.mrb[64].mxu1 %v6734_v22 }
 0x759   :  { %4249 = vmatprep.mubr.bf16.mxu1 %v6735_v1 }
 0x760   :  { %4250 = vmatmul.mubr.bf16.gmra.mrb[68].mxu1 %v6736_v25 }
 0x761   :  { %4253 = vmatprep.mubr.bf16.mxu1 %v6737_v13 }
 0x768   :  { %4254 = vmatmul.mubr.bf16.gmra.mrb[72].mxu1 %v6738_v9  ;;  %v4598_v9 = vld [vmem:[#allocation29 + $0x28] sm:$0xff]  }
 0x769   :  { %4257 = vmatprep.mubr.bf16.mxu1 %v6739_v14  ;;  %v4599_v14 = vld [vmem:[#allocation29 + $0x30] sm:$0xff]  }
 0x770   :  { %4258 = vmatmul.mubr.bf16.gmra.mrb[76].mxu1 %v6740_v30 }
 0x7f3   :  { %v4183_v20 = vpop.f32.mrb[48].mxu1 }
 0x7f4   :  { %v1736_v38 = vadd.f32 %v4183_v20, %v6045_v15  ;;  %v1727_v44 = vpop.f32.mrb[49].mxu1 }
 0x7f5   :  { %v1728_v0 = vadd.f32 %v6045_v15, %v1727_v44  ;;  %v4184_v6 = vpop.f32.mrb[50].mxu1 }
 0x7f6   :  { %v1739_v26 = vadd.f32 %v4184_v6, %v6045_v15  ;;  %v1730_v33 = vpop.f32.mrb[51].mxu1  ;;  %v1792_v59 = vmax.f32 %v1736_v38, 0.0 }
 0x7f7   :  { %v1731_v57 = vadd.f32 %v6045_v15, %v1730_v33  ;;  %v1790_v29 = vmax.f32 %v1728_v0, 0.0 }
 0x7f8   :  { %v1793_v43 = vmax.f32 %v1739_v26, 0.0 }
 0x7f9   :  { %v1791_v4 = vmax.f32 %v1731_v57, 0.0 }
 0x7fa   :  { %v1807_v23 = vpack.c.bf16 %v1793_v43, %v1792_v59 }
 0x7fb   :  { %v1806_v11 = vpack.c.bf16 %v1791_v4, %v1790_v29 }
 0x7fd   :  { %4213 = vmatprep.mubr.bf16.mxu0 %v1806_v11 }
 0x7fe   :  { %4214 = vmatmul.mubr.bf16.vlgmr.msra.gmra.mrb[64].mxu0 %v1807_v23 }
 0x7ff   :  { %4262 = vmatpush3.bf16.msra.mxu0 %v4593_v60  ;;  %v4600_v60 = vld [vmem:[#allocation29 + $0x38] sm:$0xff]  }
 0x800   :  { %4263 = vmatprep.subr.bf16.mxu0 %v4594_v5 }
 0x803   :  { %v4187_v3 = vpop.f32.mrb[52].mxu1  ;;  %4264 = vmatpush3.bf16.msra.mxu0 %v4594_v5 }
 0x804   :  { %v1752_v45 = vadd.f32 %v4187_v3, %v6045_v15  ;;  %v1743_v61 = vpop.f32.mrb[53].mxu1  ;;  %4265 = vmatprep.subr.bf16.mxu0 %v4595_v50 }
 0x805   :  { %v1744_v42 = vadd.f32 %v6045_v15, %v1743_v61  ;;  %v4188_v55 = vpop.f32.mrb[54].mxu1 }
 0x806   :  { %v1755_v17 = vadd.f32 %v4188_v55, %v6045_v15  ;;  %v1746_v54 = vpop.f32.mrb[55].mxu1  ;;  %v1796_v24 = vmax.f32 %v1752_v45, 0.0 }
 0x807   :  { %v1747_v21 = vadd.f32 %v6045_v15, %v1746_v54  ;;  %4266 = vmatpush3.bf16.msra.mxu0 %v4595_v50  ;;  %v1794_v22 = vmax.f32 %v1744_v42, 0.0  ;;  %v6064_v54 = vld [vmem:[%s6741_s9] ss:$0 sm:$0xff] }
 0x808   :  { %v1797_v46 = vmax.f32 %v1755_v17, 0.0  ;;  %4267 = vmatprep.subr.bf16.mxu0 %v4596_v49 }
 0x809   :  { %v1795_v1 = vmax.f32 %v1747_v21, 0.0 }
 0x80a   :  { %v1809_v25 = vpack.c.bf16 %v1797_v46, %v1796_v24 }
 0x80b   :  { %v1808_v13 = vpack.c.bf16 %v1795_v1, %v1794_v22  ;;  %4268 = vmatpush3.bf16.msra.mxu0 %v4596_v49 }
 0x80c   :  { %4269 = vmatprep.subr.bf16.mxu0 %v4597_v18 }
 0x80d   :  { %4217 = vmatprep.mubr.bf16.mxu0 %v1808_v13 }
 0x80e   :  { %4218 = vmatmul.mubr.bf16.gmra.mrb[68].mxu0 %v1809_v25 }
 0x80f   :  { %4270 = vmatpush3.bf16.msra.mxu0 %v4597_v18 }
 0x810   :  { %4271 = vmatprep.subr.bf16.mxu0 %v4598_v9 }
 0x813   :  { %v4191_v30 = vpop.f32.mrb[56].mxu1  ;;  %4272 = vmatpush3.bf16.msra.mxu0 %v4598_v9 }
 0x814   :  { %v1768_v35 = vadd.f32 %v4191_v30, %v6045_v15  ;;  %v1759_v53 = vpop.f32.mrb[57].mxu1  ;;  %4273 = vmatprep.subr.bf16.mxu0 %v4599_v14 }
 0x815   :  { %v1760_v20 = vadd.f32 %v6045_v15, %v1759_v53  ;;  %v4192_v38 = vpop.f32.mrb[58].mxu1 }
 0x816   :  { %v1771_v44 = vadd.f32 %v4192_v38, %v6045_v15  ;;  %v1762_v0 = vpop.f32.mrb[59].mxu1  ;;  %v1800_v26 = vmax.f32 %v1768_v35, 0.0  ;;  %v6742_v35 = vmax.f32 %v5817_v10, 0.0  ;;  %v6743_v38 = vmax.f32 %v5819_v12, 0.0 }
 0x817   :  { %v1763_v6 = vadd.f32 %v6045_v15, %v1762_v0  ;;  %4274 = vmatpush3.bf16.msra.mxu0 %v4599_v14  ;;  %v1798_v57 = vmax.f32 %v1760_v20, 0.0 }
 0x818   :  { %v1801_v33 = vmax.f32 %v1771_v44, 0.0  ;;  %4275 = vmatprep.subr.bf16.mxu0 %v4600_v60  ;;  %v2240_v53 = vmul.f32 0.5, %v6742_v35  ;;  %v2238_v44 = vmul.f32 0.5, %v6743_v38  ;;  %v6749_v35 = vmax.f32 %v5843_v41, 0.0 }
 0x819   :  { %v1799_v59 = vmax.f32 %v1763_v6, 0.0 }
 0x81a   :  { %v1811_v43 = vpack.c.bf16 %v1801_v33, %v1800_v26  ;;  %v6744_v26 = vmax.f32 %v5821_v16, 0.0 }
 0x81b   :  { %v1810_v29 = vpack.c.bf16 %v1799_v59, %v1798_v57  ;;  %4276 = vmatpush3.bf16.msra.mxu0 %v4600_v60 }
 0x81c   :  { %v2241_v33 = vmul.f32 0.5, %v6744_v26 }
 0x81d   :  { %4221 = vmatprep.mubr.bf16.mxu0 %v1810_v29 }
 0x81e   :  { %4222 = vmatmul.mubr.bf16.gmra.mrb[72].mxu0 %v1811_v43  ;;  %v6745_v43 = vmax.f32 %v5823_v19, 0.0 }
 0x820   :  { %v2239_v29 = vmul.f32 0.5, %v6745_v43 }
 0x823   :  { %v4195_v4 = vpop.f32.mrb[60].mxu1 }
 0x824   :  { %v1784_v23 = vadd.f32 %v4195_v4, %v6045_v15  ;;  %v1775_v11 = vpop.f32.mrb[61].mxu1 }
 0x825   :  { %v1776_v5 = vadd.f32 %v6045_v15, %v1775_v11  ;;  %v4196_v50 = vpop.f32.mrb[62].mxu1 }
 0x826   :  { %v1787_v3 = vadd.f32 %v4196_v50, %v6045_v15  ;;  %v1778_v45 = vpop.f32.mrb[63].mxu1  ;;  %v1804_v49 = vmax.f32 %v1784_v23, 0.0 }
 0x827   :  { %v1779_v61 = vadd.f32 %v6045_v15, %v1778_v45  ;;  %v1802_v55 = vmax.f32 %v1776_v5, 0.0 }
 0x828   :  { %v1805_v42 = vmax.f32 %v1787_v3, 0.0 }
 0x829   :  { %v1803_v17 = vmax.f32 %v1779_v61, 0.0 }
 0x82a   :  { %v1813_v21 = vpack.c.bf16 %v1805_v42, %v1804_v49 }
 0x82b   :  { %v1812_v24 = vpack.c.bf16 %v1803_v17, %v1802_v55  ;;  %v4247_v46 = vpop.f32.mrb[64].mxu1 }
 0x82c   :  { %v2152_v18 = vadd.f32 %v4247_v46, %v6064_v54  ;;  %v2143_v22 = vpop.f32.mrb[65].mxu1 }
 0x82d   :  { %v2144_v1 = vadd.f32 %v6064_v54, %v2143_v22  ;;  %4225 = vmatprep.mubr.bf16.mxu0 %v1812_v24  ;;  %v4248_v25 = vpop.f32.mrb[66].mxu1  ;;  %v6747_v22 = vmax.f32 %v5839_v36, 0.0 }
 0x82e   :  { %v2208_v13 = vmax.f32 %v2152_v18, 0.0  ;;  %v2155_v9 = vadd.f32 %v4248_v25, %v6064_v54  ;;  %4226 = vmatmul.mubr.bf16.gmra.mrb[76].mxu0 %v1813_v21  ;;  %v2146_v15 = vpop.f32.mrb[67].mxu1  ;;  %v6746_v21 = vmax.f32 %v5837_v32, 0.0 }
 0x82f   :  { %v2206_v14 = vmax.f32 %v2144_v1, 0.0  ;;  %v2147_v30 = vadd.f32 %v6064_v54, %v2146_v15  ;;  %v2242_v1 = vmul.f32 0.5, %v6747_v22 }
 0x830   :  { %v2224_v60 = vmul.f32 0.5, %v2208_v13  ;;  %v2209_v20 = vmax.f32 %v2155_v9, 0.0  ;;  %v2244_v24 = vmul.f32 0.5, %v6746_v21  ;;  %v6748_v9 = vmax.f32 %v5841_v39, 0.0 }
 0x831   :  { %v2222_v0 = vmul.f32 0.5, %v2206_v14  ;;  %v2207_v6 = vmax.f32 %v2147_v30, 0.0 }
 0x832   :  { %v2256_v57 = vadd.f32 %v2240_v53, %v2224_v60  ;;  %v2225_v59 = vmul.f32 0.5, %v2209_v20  ;;  %v2245_v15 = vmul.f32 0.5, %v6748_v9  ;;  %v2243_v53 = vmul.f32 0.5, %v6749_v35 }
 0x833   :  { %v2254_v4 = vadd.f32 %v2238_v44, %v2222_v0  ;;  %v2223_v23 = vmul.f32 0.5, %v2207_v6  ;;  %v4251_v11 = vpop.f32.mrb[68].mxu1 }
 0x834   :  { %v2257_v10 = vadd.f32 %v2241_v33, %v2225_v59  ;;  %v2168_v5 = vadd.f32 %v4251_v11, %v6064_v54  ;;  %v2159_v50 = vpop.f32.mrb[69].mxu1 }
 0x835   :  { %v2255_v3 = vadd.f32 %v2239_v29, %v2223_v23  ;;  %v2160_v12 = vadd.f32 %v6064_v54, %v2159_v50  ;;  %v4252_v45 = vpop.f32.mrb[70].mxu1 }
 0x836   :  { %v2271_v61 = vpack.c.bf16 %v2257_v10, %v2256_v57  ;;  %v2212_v49 = vmax.f32 %v2168_v5, 0.0  ;;  %v2171_v16 = vadd.f32 %v4252_v45, %v6064_v54  ;;  %v2162_v42 = vpop.f32.mrb[71].mxu1  ;;  %v6751_v5 = vmax.f32 %v5859_v56, 0.0 }
 0x837   :  { %v2210_v55 = vmax.f32 %v2160_v12, 0.0  ;;  %v2163_v19 = vadd.f32 %v6064_v54, %v2162_v42  ;;  %v2270_v17 = vpack.c.bf16 %v2255_v3, %v2254_v4  ;;  %v6750_v4 = vmax.f32 %v5857_v58, 0.0 }
 0x838   :  { %v2228_v46 = vmul.f32 0.5, %v2212_v49  ;;  %v2213_v18 = vmax.f32 %v2171_v16, 0.0  ;;  %v2246_v50 = vmul.f32 0.5, %v6751_v5  ;;  %v6752_v45 = vmax.f32 %v5861_v63, 0.0  ;;  %v3106_v5 = vld [vmem:[#allocation34 + $0x8] sm:$0xff] }
 0x839   :  { %v2226_v25 = vmul.f32 0.5, %v2210_v55  ;;  %v2211_v13 = vmax.f32 %v2163_v19, 0.0  ;;  %4277 = vmatprep.mubr.bf16.mxu0 %v2270_v17  ;;  %v2248_v23 = vmul.f32 0.5, %v6750_v4  ;;  %v6753_v42 = vmax.f32 %v5863_v2, 0.0  ;;  %v4606_v4 = vld [vmem:[#allocation31 + $0x28] sm:$0xff]  }
 0x83a   :  { %v2260_v14 = vadd.f32 %v2244_v24, %v2228_v46  ;;  %v2229_v30 = vmul.f32 0.5, %v2213_v18  ;;  %4278 = vmatmul.mubr.bf16.vlgmr.msra.gmra.mrb[80].mxu0 %v2271_v61  ;;  %v2249_v61 = vmul.f32 0.5, %v6752_v45 }
 0x83b   :  { %v2258_v60 = vadd.f32 %v2242_v1, %v2226_v25  ;;  %v2227_v32 = vmul.f32 0.5, %v2211_v13  ;;  %v4255_v20 = vpop.f32.mrb[72].mxu1  ;;  %v2247_v55 = vmul.f32 0.5, %v6753_v42 }
 0x83c   :  { %v2261_v38 = vadd.f32 %v2245_v15, %v2229_v30  ;;  %v2184_v44 = vadd.f32 %v4255_v20, %v6064_v54  ;;  %v2175_v36 = vpop.f32.mrb[73].mxu1 }
 0x83d   :  { %v2259_v0 = vadd.f32 %v2243_v53, %v2227_v32  ;;  %v2176_v6 = vadd.f32 %v6064_v54, %v2175_v36  ;;  %v4256_v26 = vpop.f32.mrb[74].mxu1 }
 0x83e   :  { %v2216_v33 = vmax.f32 %v2184_v44, 0.0  ;;  %v2187_v39 = vadd.f32 %v4256_v26, %v6064_v54  ;;  %v2178_v57 = vpop.f32.mrb[75].mxu1  ;;  %v2273_v59 = vpack.c.bf16 %v2261_v38, %v2260_v14  ;;  %v6754_v14 = vmax.f32 %v5877_v28, 0.0 }
 0x83f   :  { %v2214_v43 = vmax.f32 %v2176_v6, 0.0  ;;  %v2179_v41 = vadd.f32 %v6064_v54, %v2178_v57  ;;  %v2272_v29 = vpack.c.bf16 %v2259_v0, %v2258_v60  ;;  %v6755_v60 = vmax.f32 %v5879_v34, 0.0  ;;  %v4601_v34 = vld [vmem:[#allocation31] sm:$0xff]  }
 0x840   :  { %v2232_v11 = vmul.f32 0.5, %v2216_v33  ;;  %v2217_v10 = vmax.f32 %v2187_v39, 0.0  ;;  %v2252_v30 = vmul.f32 0.5, %v6754_v14  ;;  %v6756_v44 = vmax.f32 %v5881_v40, 0.0  ;;  %4293 = vmatprep.subr.bf16.mxu1 %v4601_v34  ;;  %v4603_v40 = vld [vmem:[#allocation31 + $0x10] sm:$0xff]  }
 0x841   :  { %v2230_v3 = vmul.f32 0.5, %v2214_v43  ;;  %v2215_v12 = vmax.f32 %v2179_v41, 0.0  ;;  %4281 = vmatprep.mubr.bf16.mxu0 %v2272_v29  ;;  %v2250_v32 = vmul.f32 0.5, %v6755_v60  ;;  %4294 = vmatpush3.bf16.msra.mxu1 %v4601_v34  ;;  %v4602_v41 = vld [vmem:[#allocation31 + $0x8] sm:$0xff]   ;;  %v4604_v29 = vld [vmem:[#allocation31 + $0x18] sm:$0xff]  }
 0x842   :  { %v2264_v49 = vadd.f32 %v2248_v23, %v2232_v11  ;;  %v2233_v16 = vmul.f32 0.5, %v2217_v10  ;;  %4282 = vmatmul.mubr.bf16.gmra.mrb[84].mxu0 %v2273_v59  ;;  %v2253_v36 = vmul.f32 0.5, %v6756_v44  ;;  %4295 = vmatprep.subr.bf16.mxu1 %v4602_v41  ;;  %v4607_v23 = vld [vmem:[#allocation31 + $0x30] sm:$0xff]   ;;  %v4608_v11 = vld [vmem:[#allocation31 + $0x38] sm:$0xff]   ;;  %v3105_v10 = vld [vmem:[#allocation34] sm:$0xff] }
 0x843   :  { %v2262_v19 = vadd.f32 %v2246_v50, %v2230_v3  ;;  %v2231_v58 = vmul.f32 0.5, %v2215_v12  ;;  %v4259_v17 = vpop.f32.mrb[76].mxu1  ;;  %v6114_v50 = vpack.c.bf16 %v3106_v5, %v3105_v10  ;;  %v3751_v3 = vld [vmem:[#allocation28] ss:$0 sm:$0xff]  ;;  %v6760_v5 = vmax.f32 %v5899_v31, 0.0 }
 0x844   :  { %v2265_v21 = vadd.f32 %v2249_v61, %v2233_v16  ;;  %v2200_v24 = vadd.f32 %v4259_v17, %v6064_v54  ;;  %v2191_v56 = vpop.f32.mrb[77].mxu1  ;;  %v4612_v60 = vld [vmem:[#allocation32 + $0x18] sm:$0xff]  }
 0x845   :  { %v2263_v46 = vadd.f32 %v2247_v55, %v2231_v58  ;;  %v2192_v18 = vadd.f32 %v6064_v54, %v2191_v56  ;;  %v4260_v22 = vpop.f32.mrb[78].mxu1  ;;  %4296 = vmatpush3.bf16.msra.mxu1 %v4602_v41 }
 0x846   :  { %v2220_v1 = vmax.f32 %v2200_v24, 0.0  ;;  %v2203_v63 = vadd.f32 %v4260_v22, %v6064_v54  ;;  %v2194_v25 = vpop.f32.mrb[79].mxu1  ;;  %v2275_v13 = vpack.c.bf16 %v2265_v21, %v2264_v49  ;;  %4297 = vmatprep.subr.bf16.mxu1 %v4603_v40 }
 0x847   :  { %v2218_v9 = vmax.f32 %v2192_v18, 0.0  ;;  %v2195_v2 = vadd.f32 %v6064_v54, %v2194_v25  ;;  %v2274_v15 = vpack.c.bf16 %v2263_v46, %v2262_v19  ;;  %v6757_v54 = vmax.f32 %v5883_v52, 0.0  ;;  %v4605_v52 = vld [vmem:[#allocation31 + $0x20] sm:$0xff]  }
 0x848   :  { %v2236_v35 = vmul.f32 0.5, %v2220_v1  ;;  %v2221_v53 = vmax.f32 %v2203_v63, 0.0 }
 0x849   :  { %v2234_v20 = vmul.f32 0.5, %v2218_v9  ;;  %v2219_v38 = vmax.f32 %v2195_v2, 0.0  ;;  %4285 = vmatprep.mubr.bf16.mxu0 %v2274_v15  ;;  %v2251_v26 = vmul.f32 0.5, %v6757_v54  ;;  %4298 = vmatpush3.bf16.msra.mxu1 %v4603_v40  ;;  %v4613_v54 = vld [vmem:[#allocation32 + $0x20] sm:$0xff]  }
 0x84a   :  { %v2268_v0 = vadd.f32 %v2252_v30, %v2236_v35  ;;  %v2237_v6 = vmul.f32 0.5, %v2221_v53  ;;  %4286 = vmatmul.mubr.bf16.gmra.mrb[88].mxu0 %v2275_v13  ;;  %4299 = vmatprep.subr.bf16.mxu1 %v4604_v29  ;;  %v4609_v30 = vld [vmem:[#allocation32] sm:$0xff]   ;;  %v4610_v35 = vld [vmem:[#allocation32 + $0x8] sm:$0xff]   ;;  %v4611_v53 = vld [vmem:[#allocation32 + $0x10] sm:$0xff]  }
 0x84b   :  { %v2266_v33 = vadd.f32 %v2250_v32, %v2234_v20  ;;  %v2235_v28 = vmul.f32 0.5, %v2219_v38  ;;  %4325 = vmatprep.subr.bf16.mxu0 %v4609_v30 }
 0x84c   :  { %v2269_v39 = vadd.f32 %v2253_v36, %v2237_v6  ;;  %4326 = vmatpush3.bf16.msra.mxu0 %v4609_v30 }
 0x84d   :  { %v2267_v57 = vadd.f32 %v2251_v26, %v2235_v28  ;;  %4300 = vmatpush3.bf16.msra.mxu1 %v4604_v29  ;;  %4327 = vmatprep.subr.bf16.mxu0 %v4610_v35 }
 0x84e   :  { %v2277_v59 = vpack.c.bf16 %v2269_v39, %v2268_v0  ;;  %4301 = vmatprep.subr.bf16.mxu1 %v4605_v52 }
 0x84f   :  { %v2276_v43 = vpack.c.bf16 %v2267_v57, %v2266_v33  ;;  %v6118_v33 = vld [vmem:[%s6758_s6] ss:$0 sm:$0xff] }
 0x850   :  { %4328 = vmatpush3.bf16.msra.mxu0 %v4610_v35 }
 0x851   :  { %4289 = vmatprep.mubr.bf16.mxu0 %v2276_v43  ;;  %4302 = vmatpush3.bf16.msra.mxu1 %v4605_v52 }
 0x852   :  { %4290 = vmatmul.mubr.bf16.gmra.mrb[92].mxu0 %v2277_v59  ;;  %4303 = vmatprep.subr.bf16.mxu1 %v4606_v4 }
 0x853   :  { %4329 = vmatprep.subr.bf16.mxu0 %v4611_v53 }
 0x854   :  { %4330 = vmatpush3.bf16.msra.mxu0 %v4611_v53 }
 0x855   :  { %4304 = vmatpush3.bf16.msra.mxu1 %v4606_v4  ;;  %4331 = vmatprep.subr.bf16.mxu0 %v4612_v60  ;;  %v6759_v4 = vmax.f32 %v5897_v27, 0.0 }
 0x856   :  { %4305 = vmatprep.subr.bf16.mxu1 %v4607_v23 }
 0x858   :  { %4332 = vmatpush3.bf16.msra.mxu0 %v4612_v60  ;;  %v6764_v60 = vmax.f32 %v5919_v8, 0.0 }
 0x859   :  { %4306 = vmatpush3.bf16.msra.mxu1 %v4607_v23  ;;  %4333 = vmatprep.subr.bf16.mxu0 %v4613_v54  ;;  %v2480_v23 = vmul.f32 0.5, %v6759_v4 }
 0x85a   :  { %4307 = vmatprep.subr.bf16.mxu1 %v4608_v11 }
 0x85c   :  { %4334 = vmatpush3.bf16.msra.mxu0 %v4613_v54  ;;  %v6766_v54 = vmax.f32 %v5923_v47, 0.0 }
 0x85d   :  { %4308 = vmatpush3.bf16.msra.mxu1 %v4608_v11 }
 0x85e   :  { %4414 = vmatprep.subr.bf16.mxu1 %v6114_v50 }
 0x8d1   :  { %v4215_v12 = vpop.f32.mrb[64].mxu0 }
 0x8d2   :  { %v1928_v45 = vadd.f32 %v4215_v12, %v3751_v3  ;;  %v1919_v61 = vpop.f32.mrb[65].mxu0 }
 0x8d3   :  { %v1920_v49 = vadd.f32 %v3751_v3, %v1919_v61  ;;  %v4216_v16 = vpop.f32.mrb[66].mxu0  ;;  %v6761_v61 = vmax.f32 %v5901_v37, 0.0 }
 0x8d4   :  { %3515 = vst [vmem:[#allocation35 + $0x10] sm:$0xff] %v1928_v45  ;;  %v1931_v42 = vadd.f32 %v4216_v16, %v3751_v3  ;;  %v1922_v55 = vpop.f32.mrb[67].mxu0 }
 0x8d5   :  { %3513 = vst [vmem:[#allocation35] sm:$0xff] %v1920_v49  ;;  %v1923_v19 = vadd.f32 %v3751_v3, %v1922_v55  ;;  %v2481_v49 = vmul.f32 0.5, %v6761_v61  ;;  %v6762_v55 = vmax.f32 %v5903_v51, 0.0  ;;  %v6768_v61 = vld [vmem:[#allocation68_spill] sm:$0xff] }
 0x8d6   :  { %3516 = vst [vmem:[#allocation35 + $0x18] sm:$0xff] %v1931_v42 }
 0x8d7   :  { %3514 = vst [vmem:[#allocation35 + $0x8] sm:$0xff] %v1923_v19  ;;  %v2479_v19 = vmul.f32 0.5, %v6762_v55 }
 0x8e1   :  { %v4219_v58 = vpop.f32.mrb[68].mxu0 }
 0x8e2   :  { %v1944_v17 = vadd.f32 %v4219_v58, %v3751_v3  ;;  %v1935_v21 = vpop.f32.mrb[69].mxu0 }
 0x8e3   :  { %v1936_v24 = vadd.f32 %v3751_v3, %v1935_v21  ;;  %v4220_v56 = vpop.f32.mrb[70].mxu0 }
 0x8e4   :  { %3519 = vst [vmem:[#allocation35 + $0x30] sm:$0xff] %v1944_v17  ;;  %v1947_v46 = vadd.f32 %v4220_v56, %v3751_v3  ;;  %v1938_v18 = vpop.f32.mrb[71].mxu0 }
 0x8e5   :  { %3517 = vst [vmem:[#allocation35 + $0x20] sm:$0xff] %v1936_v24  ;;  %v1939_v22 = vadd.f32 %v3751_v3, %v1938_v18 }
 0x8e6   :  { %3520 = vst [vmem:[#allocation35 + $0x38] sm:$0xff] %v1947_v46 }
 0x8e7   :  { %3518 = vst [vmem:[#allocation35 + $0x28] sm:$0xff] %v1939_v22  ;;  %v3107_v22 = vld [vmem:[#allocation34 + $0x10] sm:$0xff] }
 0x8f1   :  { %v4223_v1 = vpop.f32.mrb[72].mxu0 }
 0x8f2   :  { %v1960_v63 = vadd.f32 %v4223_v1, %v3751_v3  ;;  %v1951_v25 = vpop.f32.mrb[73].mxu0  ;;  %v3108_v1 = vld [vmem:[#allocation34 + $0x18] sm:$0xff] }
 0x8f3   :  { %v1952_v13 = vadd.f32 %v3751_v3, %v1951_v25  ;;  %v4224_v9 = vpop.f32.mrb[74].mxu0  ;;  %v4417_v53 = vpack.c.bf16 %v3108_v1, %v3107_v22 }
 0x8f4   :  { %3523 = vst [vmem:[#allocation35 + $0x50] sm:$0xff] %v1960_v63  ;;  %v1963_v2 = vadd.f32 %v4224_v9, %v3751_v3  ;;  %v1954_v15 = vpop.f32.mrb[75].mxu0 }
 0x8f5   :  { %3521 = vst [vmem:[#allocation35 + $0x40] sm:$0xff] %v1952_v13  ;;  %v1955_v14 = vadd.f32 %v3751_v3, %v1954_v15  ;;  %v6763_v15 = vmax.f32 %v5917_v7, 0.0 }
 0x8f6   :  { %3524 = vst [vmem:[#allocation35 + $0x58] sm:$0xff] %v1963_v2 }
 0x8f7   :  { %3522 = vst [vmem:[#allocation35 + $0x48] sm:$0xff] %v1955_v14  ;;  %v2484_v14 = vmul.f32 0.5, %v6763_v15 }
 0x901   :  { %v4227_v32 = vpop.f32.mrb[76].mxu0 }
 0x902   :  { %v1976_v20 = vadd.f32 %v4227_v32, %v3751_v3  ;;  %v1967_v38 = vpop.f32.mrb[77].mxu0  ;;  %v2482_v32 = vmul.f32 0.5, %v6764_v60 }
 0x903   :  { %v1968_v44 = vadd.f32 %v3751_v3, %v1967_v38  ;;  %v4228_v36 = vpop.f32.mrb[78].mxu0 }
 0x904   :  { %3527 = vst [vmem:[#allocation35 + $0x70] sm:$0xff] %v1976_v20  ;;  %v1979_v0 = vadd.f32 %v4228_v36, %v3751_v3  ;;  %v1970_v6 = vpop.f32.mrb[79].mxu0 }
 0x905   :  { %3525 = vst [vmem:[#allocation35 + $0x60] sm:$0xff] %v1968_v44  ;;  %v1971_v26 = vadd.f32 %v3751_v3, %v1970_v6  ;;  %v2478_v3 = vmul.f32 0.5, %v6760_v5  ;;  %v6765_v44 = vmax.f32 %v5921_v48, 0.0 }
 0x906   :  { %3528 = vst [vmem:[#allocation35 + $0x78] sm:$0xff] %v1979_v0 }
 0x907   :  { %3526 = vst [vmem:[#allocation35 + $0x68] sm:$0xff] %v1971_v26  ;;  %v2485_v36 = vmul.f32 0.5, %v6765_v44  ;;  %v2483_v26 = vmul.f32 0.5, %v6766_v54 }
 0x90d   :  { %v4279_v28 = vpop.f32.mrb[80].mxu0 }
 0x90e   :  { %v2392_v39 = vadd.f32 %v4279_v28, %v6118_v33  ;;  %v2383_v57 = vpop.f32.mrb[81].mxu0 }
 0x90f   :  { %v2384_v59 = vadd.f32 %v6118_v33, %v2383_v57  ;;  %v4280_v43 = vpop.f32.mrb[82].mxu0 }
 0x910   :  { %v2448_v34 = vmax.f32 %v2392_v39, 0.0  ;;  %v2395_v41 = vadd.f32 %v4280_v43, %v6118_v33  ;;  %v2386_v40 = vpop.f32.mrb[83].mxu0 }
 0x911   :  { %v2446_v29 = vmax.f32 %v2384_v59, 0.0  ;;  %v2387_v52 = vadd.f32 %v6118_v33, %v2386_v40  ;;  %v3110_v40 = vld [vmem:[#allocation34 + $0x28] sm:$0xff] }
 0x912   :  { %v2464_v11 = vmul.f32 0.5, %v2448_v34  ;;  %v2449_v10 = vmax.f32 %v2395_v41, 0.0  ;;  %v3109_v41 = vld [vmem:[#allocation34 + $0x20] sm:$0xff] }
 0x913   :  { %v2462_v12 = vmul.f32 0.5, %v2446_v29  ;;  %v2447_v45 = vmax.f32 %v2387_v52, 0.0 }
 0x914   :  { %v2496_v16 = vadd.f32 %v2480_v23, %v2464_v11  ;;  %v2465_v42 = vmul.f32 0.5, %v2449_v10  ;;  %v6767_v10 = vmax.f32 %v5937_v62, 0.0 }
 0x915   :  { %v2494_v58 = vadd.f32 %v2478_v3, %v2462_v12  ;;  %v2463_v17 = vmul.f32 0.5, %v2447_v45  ;;  %v4283_v21 = vpop.f32.mrb[84].mxu0  ;;  %v4421_v45 = vpack.c.bf16 %v3110_v40, %v3109_v41 }
 0x916   :  { %v2497_v27 = vadd.f32 %v2481_v49, %v2465_v42  ;;  %v2408_v24 = vadd.f32 %v4283_v21, %v6118_v33  ;;  %v2399_v56 = vpop.f32.mrb[85].mxu0  ;;  %v2488_v5 = vmul.f32 0.5, %v6767_v10  ;;  %v6769_v49 = vmax.f32 %v6768_v61, 0.0  ;;  %v6169_v10 = vld [vmem:[#allocation39] sm:$0xff]  ;;  %v3118_v61 = vld [vmem:[#allocation34 + $0x68] sm:$0xff] }
 0x917   :  { %v2495_v46 = vadd.f32 %v2479_v19, %v2463_v17  ;;  %v2400_v31 = vadd.f32 %v6118_v33, %v2399_v56  ;;  %v4284_v18 = vpop.f32.mrb[86].mxu0  ;;  %v6770_v19 = vld [vmem:[#allocation69_spill] sm:$0xff] }
 0x918   :  { %v2511_v37 = vpack.c.bf16 %v2497_v27, %v2496_v16  ;;  %v2452_v63 = vmax.f32 %v2408_v24, 0.0  ;;  %v2411_v25 = vadd.f32 %v4284_v18, %v6118_v33  ;;  %v2402_v13 = vpop.f32.mrb[87].mxu0  ;;  %v2486_v16 = vmul.f32 0.5, %v6769_v49  ;;  %v6772_v24 = vld [vmem:[#allocation70_spill] sm:$0xff] }
 0x919   :  { %v2450_v51 = vmax.f32 %v2400_v31, 0.0  ;;  %v2403_v9 = vadd.f32 %v6118_v33, %v2402_v13  ;;  %v2510_v2 = vpack.c.bf16 %v2495_v46, %v2494_v58  ;;  %v6771_v58 = vmax.f32 %v6770_v19, 0.0  ;;  %v4746_v19 = vld [vmem:[#allocation39 + $0x8] sm:$0xff] }
 0x91a   :  { %v2468_v30 = vmul.f32 0.5, %v2452_v63  ;;  %v2453_v35 = vmax.f32 %v2411_v25, 0.0  ;;  %v6773_v56 = vmax.f32 %v6772_v24, 0.0  ;;  %v6178_v24 = vld [vmem:[#allocation39 + $0x30] sm:$0xff] }
 0x91b   :  { %v2466_v20 = vmul.f32 0.5, %v2450_v51  ;;  %v2451_v38 = vmax.f32 %v2403_v9, 0.0  ;;  %4309 = vmatprep.mubr.bf16.mxu1 %v2510_v2  ;;  %v2489_v17 = vmul.f32 0.5, %v6771_v58  ;;  %v3111_v51 = vld [vmem:[#allocation34 + $0x30] sm:$0xff]  ;;  %v3112_v9 = vld [vmem:[#allocation34 + $0x38] sm:$0xff] }
 0x91c   :  { %v2500_v0 = vadd.f32 %v2484_v14, %v2468_v30  ;;  %v2469_v6 = vmul.f32 0.5, %v2453_v35  ;;  %4310 = vmatmul.mubr.bf16.vlgmr.msra.gmra.mrb[80].mxu1 %v2511_v37  ;;  %v2487_v46 = vmul.f32 0.5, %v6773_v56  ;;  %v4747_v58 = vld [vmem:[#allocation39 + $0x10] sm:$0xff]  ;;  %v6181_v56 = vld [vmem:[#allocation39 + $0x38] sm:$0xff] }
 0x91d   :  { %v2498_v7 = vadd.f32 %v2482_v32, %v2466_v20  ;;  %v2467_v28 = vmul.f32 0.5, %v2451_v38  ;;  %4416 = vmatpush3.bf16.xpose.msra.mxu1 %v6114_v50  ;;  %v4287_v39 = vpop.f32.mrb[88].mxu0  ;;  %v6774_v32 = vld [vmem:[#allocation71_spill] sm:$0xff] }
 0x91e   :  { %v2501_v57 = vadd.f32 %v2485_v36, %v2469_v6  ;;  %v2424_v8 = vadd.f32 %v4287_v39, %v6118_v33  ;;  %v2415_v59 = vpop.f32.mrb[89].mxu0  ;;  %4418 = vmatprep.subr.bf16.mxu1 %v4417_v53  ;;  %v6775_v20 = vmax.f32 %v6774_v32, 0.0  ;;  %v6776_v6 = vld [vmem:[#allocation72_spill] sm:$0xff]  ;;  %v6778_v39 = vld [vmem:[#allocation73_spill] sm:$0xff] }
 0x91f   :  { %v2499_v43 = vadd.f32 %v2483_v26, %v2467_v28  ;;  %v2416_v48 = vadd.f32 %v6118_v33, %v2415_v59  ;;  %v4288_v34 = vpop.f32.mrb[90].mxu0  ;;  %v6777_v54 = vmax.f32 %v6776_v6, 0.0 }
 0x920   :  { %v2456_v29 = vmax.f32 %v2424_v8, 0.0  ;;  %v2427_v47 = vadd.f32 %v4288_v34, %v6118_v33  ;;  %v2418_v52 = vpop.f32.mrb[91].mxu0  ;;  %v2513_v4 = vpack.c.bf16 %v2501_v57, %v2500_v0  ;;  %v2492_v38 = vmul.f32 0.5, %v6775_v20 }
 0x921   :  { %v2454_v23 = vmax.f32 %v2416_v48, 0.0  ;;  %v2419_v50 = vadd.f32 %v6118_v33, %v2418_v52  ;;  %v2512_v11 = vpack.c.bf16 %v2499_v43, %v2498_v7  ;;  %v4425_v0 = vpack.c.bf16 %v3112_v9, %v3111_v51  ;;  %v3113_v52 = vld [vmem:[#allocation34 + $0x40] sm:$0xff]  ;;  %v4616_v51 = vld [vmem:[#allocation32 + $0x38] sm:$0xff]   ;;  %v6209_v9 = vld [vmem:[%s6782_s23] ss:$0 sm:$0xff] }
 0x922   :  { %v2472_v3 = vmul.f32 0.5, %v2456_v29  ;;  %v2457_v12 = vmax.f32 %v2427_v47, 0.0  ;;  %v2490_v26 = vmul.f32 0.5, %v6777_v54  ;;  %v6779_v57 = vmax.f32 %v6778_v39, 0.0 }
 0x923   :  { %v2470_v42 = vmul.f32 0.5, %v2454_v23  ;;  %v2455_v55 = vmax.f32 %v2419_v50, 0.0  ;;  %4313 = vmatprep.mubr.bf16.mxu1 %v2512_v11  ;;  %v2720_v54 = vmul.f32 0.5, %v4747_v58 }
 0x924   :  { %v2504_v21 = vadd.f32 %v2488_v5, %v2472_v3  ;;  %v2473_v27 = vmul.f32 0.5, %v2457_v12  ;;  %4314 = vmatmul.mubr.bf16.gmra.mrb[84].mxu1 %v2513_v4  ;;  %v2493_v8 = vmul.f32 0.5, %v6779_v57  ;;  %v3114_v4 = vld [vmem:[#allocation34 + $0x48] sm:$0xff]  ;;  %v3115_v5 = vld [vmem:[#allocation34 + $0x50] sm:$0xff]  ;;  %v3116_v3 = vld [vmem:[#allocation34 + $0x58] sm:$0xff]  ;;  %v2719_v57 = vmul.f32 0.5, %v4746_v19 }
 0x925   :  { %v2502_v62 = vadd.f32 %v2486_v16, %v2470_v42  ;;  %v2471_v31 = vmul.f32 0.5, %v2455_v55  ;;  %4420 = vmatpush3.bf16.xpose.msra.mxu1 %v4417_v53  ;;  %v4291_v18 = vpop.f32.mrb[92].mxu0  ;;  %v4429_v11 = vpack.c.bf16 %v3114_v4, %v3113_v52  ;;  %v4433_v12 = vpack.c.bf16 %v3116_v3, %v3115_v5  ;;  %v3119_v16 = vld [vmem:[#allocation34 + $0x70] sm:$0xff]  ;;  %v3120_v42 = vld [vmem:[#allocation34 + $0x78] sm:$0xff] }
 0x926   :  { %v2505_v22 = vadd.f32 %v2489_v17, %v2473_v27  ;;  %v2440_v1 = vadd.f32 %v4291_v18, %v6118_v33  ;;  %v2431_v37 = vpop.f32.mrb[93].mxu0  ;;  %4422 = vmatprep.subr.bf16.mxu1 %v4421_v45  ;;  %v4441_v55 = vpack.c.bf16 %v3120_v42, %v3119_v16  ;;  %v4748_v17 = vld [vmem:[#allocation39 + $0x18] sm:$0xff]  ;;  %v6175_v27 = vld [vmem:[#allocation39 + $0x28] sm:$0xff]  ;;  %v2725_v16 = vmul.f32 0.5, %v6181_v56 }
 0x927   :  { %v2503_v63 = vadd.f32 %v2487_v46, %v2471_v31  ;;  %v2432_v25 = vadd.f32 %v6118_v33, %v2431_v37  ;;  %v4292_v13 = vpop.f32.mrb[94].mxu0  ;;  %v6184_v46 = vld [vmem:[#allocation39 + $0x40] sm:$0xff]  ;;  %v6190_v31 = vld [vmem:[#allocation39 + $0x50] sm:$0xff]  ;;  %v6193_v18 = vld [vmem:[#allocation39 + $0x58] sm:$0xff] }
 0x928   :  { %v2460_v2 = vmax.f32 %v2440_v1, 0.0  ;;  %v2443_v15 = vadd.f32 %v4292_v13, %v6118_v33  ;;  %v2434_v14 = vpop.f32.mrb[95].mxu0  ;;  %v2515_v30 = vpack.c.bf16 %v2505_v22, %v2504_v21  ;;  %v6172_v21 = vld [vmem:[#allocation39 + $0x20] sm:$0xff]  ;;  %v4614_v1 = vld [vmem:[#allocation32 + $0x28] sm:$0xff]   ;;  %v6205_v13 = vld [vmem:[#allocation39 + $0x78] sm:$0xff] }
 0x929   :  { %v2458_v35 = vmax.f32 %v2432_v25, 0.0  ;;  %v2435_v53 = vadd.f32 %v6118_v33, %v2434_v14  ;;  %v2514_v60 = vpack.c.bf16 %v2503_v63, %v2502_v62  ;;  %v6780_v33 = vld [vmem:[#allocation74_spill] sm:$0xff]  ;;  %v6187_v62 = vld [vmem:[#allocation39 + $0x48] sm:$0xff]  ;;  %v6196_v22 = vld [vmem:[#allocation39 + $0x60] sm:$0xff]  ;;  %4335 = vmatprep.subr.bf16.mxu0 %v4614_v1  ;;  %v2722_v42 = vmul.f32 0.5, %v6172_v21 }
 0x92a   :  { %v2476_v44 = vmul.f32 0.5, %v2460_v2  ;;  %v2461_v36 = vmax.f32 %v2443_v15, 0.0  ;;  %v6781_v48 = vmax.f32 %v6780_v33, 0.0  ;;  %v6199_v37 = vld [vmem:[#allocation39 + $0x68] sm:$0xff]  ;;  %4336 = vmatpush3.bf16.msra.mxu0 %v4614_v1  ;;  %v6202_v63 = vld [vmem:[#allocation39 + $0x70] sm:$0xff] }
 0x92b   :  { %v2474_v7 = vmul.f32 0.5, %v2458_v35  ;;  %v2459_v28 = vmax.f32 %v2435_v53, 0.0  ;;  %4317 = vmatprep.mubr.bf16.mxu1 %v2514_v60  ;;  %v4615_v25 = vld [vmem:[#allocation32 + $0x30] sm:$0xff]  }
 0x92c   :  { %v2508_v59 = vadd.f32 %v2492_v38, %v2476_v44  ;;  %v2477_v43 = vmul.f32 0.5, %v2461_v36  ;;  %4318 = vmatmul.mubr.bf16.gmra.mrb[88].mxu1 %v2515_v30  ;;  %v2491_v34 = vmul.f32 0.5, %v6781_v48  ;;  %4337 = vmatprep.subr.bf16.mxu0 %v4615_v25 }
 0x92d   :  { %v2506_v41 = vadd.f32 %v2490_v26, %v2474_v7  ;;  %v2475_v40 = vmul.f32 0.5, %v2459_v28  ;;  %4424 = vmatpush3.bf16.xpose.msra.mxu1 %v4421_v45  ;;  %v3117_v45 = vld [vmem:[#allocation34 + $0x60] sm:$0xff]  ;;  %v2721_v7 = vmul.f32 0.5, %v4748_v17  ;;  %v2718_v28 = vmul.f32 0.5, %v6169_v10 }
 0x92e   :  { %v2509_v29 = vadd.f32 %v2493_v8, %v2477_v43  ;;  %4426 = vmatprep.subr.bf16.mxu1 %v4425_v0  ;;  %v4437_v49 = vpack.c.bf16 %v3118_v61, %v3117_v45  ;;  %4338 = vmatpush3.bf16.msra.mxu0 %v4615_v25  ;;  %v2724_v61 = vmul.f32 0.5, %v6178_v24 }
 0x92f   :  { %v2507_v47 = vadd.f32 %v2491_v34, %v2475_v40  ;;  %4339 = vmatprep.subr.bf16.mxu0 %v4616_v51 }
 0x930   :  { %v2517_v23 = vpack.c.bf16 %v2509_v29, %v2508_v59 }
 0x931   :  { %v2516_v50 = vpack.c.bf16 %v2507_v47, %v2506_v41 }
 0x932   :  { %4340 = vmatpush3.bf16.msra.mxu0 %v4616_v51 }
 0x933   :  { %4321 = vmatprep.mubr.bf16.mxu1 %v2516_v50 }
 0x934   :  { %4322 = vmatmul.mubr.bf16.gmra.mrb[92].mxu1 %v2517_v23 }
 0x935   :  { %4428 = vmatpush3.bf16.xpose.msra.mxu1 %v4425_v0  ;;  %4389 = vmatprep.mubr.f32.mxu1 %v6169_v10 }
 0x936   :  { %4430 = vmatprep.subr.bf16.mxu1 %v4429_v11 }
 0x93d   :  { %4432 = vmatpush3.bf16.xpose.msra.mxu1 %v4429_v11 }
 0x93e   :  { %4434 = vmatprep.subr.bf16.mxu1 %v4433_v12 }
 0x945   :  { %4436 = vmatpush3.bf16.xpose.msra.mxu1 %v4433_v12 }
 0x946   :  { %4438 = vmatprep.subr.bf16.mxu1 %v4437_v49 }
 0x94d   :  { %4440 = vmatpush3.bf16.xpose.msra.mxu1 %v4437_v49 }
 0x94e   :  { %4442 = vmatprep.subr.bf16.mxu1 %v4441_v55 }
 0x955   :  { %4444 = vmatpush3.bf16.xpose.msra.mxu1 %v4441_v55 }
 0x95c   :  { %4390 = vmatmul.mubr.f32.vlgmr.msra.gmra.mrb[96].mxu1 %v4746_v19  ;;  %v2723_v19 = vmul.f32 0.5, %v6175_v27 }
 0x95d   :  { %4392 = vmatprep.mubr.f32.mxu1 %v4747_v58 }
 0x960   :  { %4393 = vmatmul.mubr.f32.gmra.mrb[98].mxu1 %v4748_v17 }
 0x961   :  { %4395 = vmatprep.mubr.f32.mxu1 %v6172_v21 }
 0x964   :  { %4396 = vmatmul.mubr.f32.gmra.mrb[100].mxu1 %v6175_v27 }
 0x965   :  { %4398 = vmatprep.mubr.f32.mxu1 %v6178_v24 }
 0x968   :  { %4399 = vmatmul.mubr.f32.gmra.mrb[102].mxu1 %v6181_v56 }
 0x969   :  { %4401 = vmatprep.mubr.f32.mxu1 %v6184_v46 }
 0x96c   :  { %4402 = vmatmul.mubr.f32.gmra.mrb[104].mxu1 %v6187_v62 }
 0x96d   :  { %4404 = vmatprep.mubr.f32.mxu1 %v6190_v31 }
 0x970   :  { %4405 = vmatmul.mubr.f32.gmra.mrb[106].mxu1 %v6193_v18 }
 0x971   :  { %4407 = vmatprep.mubr.f32.mxu1 %v6196_v22 }
 0x974   :  { %4408 = vmatmul.mubr.f32.gmra.mrb[108].mxu1 %v6199_v37 }
 0x975   :  { %4410 = vmatprep.mubr.f32.mxu1 %v6202_v63 }
 0x978   :  { %4411 = vmatmul.mubr.f32.gmra.mrb[110].mxu1 %v6205_v13 }
 0x9ef   :  { %v4311_v2 = vpop.f32.mrb[80].mxu1 }
 0x9f0   :  { %v2632_v15 = vadd.f32 %v4311_v2, %v6209_v9  ;;  %v2623_v14 = vpop.f32.mrb[81].mxu1 }
 0x9f1   :  { %v2624_v30 = vadd.f32 %v6209_v9, %v2623_v14  ;;  %v4312_v35 = vpop.f32.mrb[82].mxu1 }
 0x9f2   :  { %v2688_v53 = vmax.f32 %v2632_v15, 0.0  ;;  %v2635_v60 = vadd.f32 %v4312_v35, %v6209_v9  ;;  %v2626_v32 = vpop.f32.mrb[83].mxu1 }
 0x9f3   :  { %v2686_v20 = vmax.f32 %v2624_v30, 0.0  ;;  %v2627_v38 = vadd.f32 %v6209_v9, %v2626_v32 }
 0x9f4   :  { %v2704_v44 = vmul.f32 0.5, %v2688_v53  ;;  %v2689_v36 = vmax.f32 %v2635_v60, 0.0 }
 0x9f5   :  { %v2702_v0 = vmul.f32 0.5, %v2686_v20  ;;  %v2687_v6 = vmax.f32 %v2627_v38, 0.0 }
 0x9f6   :  { %v2705_v26 = vmul.f32 0.5, %v2689_v36  ;;  %v2736_v59 = vadd.f32 %v2720_v54, %v2704_v44  ;;  %v2728_v36 = vmul.f32 0.5, %v6190_v31  ;;  %v2726_v54 = vmul.f32 0.5, %v6184_v46 }
 0x9f7   :  { %v2703_v39 = vmul.f32 0.5, %v2687_v6  ;;  %v4315_v8 = vpop.f32.mrb[84].mxu1  ;;  %v2734_v34 = vadd.f32 %v2718_v28, %v2702_v0  ;;  %v2729_v6 = vmul.f32 0.5, %v6193_v18 }
 0x9f8   :  { %v2737_v43 = vadd.f32 %v2721_v7, %v2705_v26  ;;  %v2648_v33 = vadd.f32 %v4315_v8, %v6209_v9  ;;  %v2639_v48 = vpop.f32.mrb[85].mxu1  ;;  %v2727_v7 = vmul.f32 0.5, %v6187_v62 }
 0x9f9   :  { %v2735_v41 = vadd.f32 %v2719_v57, %v2703_v39  ;;  %v2640_v40 = vadd.f32 %v6209_v9, %v2639_v48  ;;  %v4316_v29 = vpop.f32.mrb[86].mxu1 }
 0x9fa   :  { %v2751_v47 = vpack.c.bf16 %v2737_v43, %v2736_v59  ;;  %v2692_v52 = vmax.f32 %v2648_v33, 0.0  ;;  %v2651_v4 = vadd.f32 %v4316_v29, %v6209_v9  ;;  %v2642_v23 = vpop.f32.mrb[87].mxu1 }
 0x9fb   :  { %v2690_v50 = vmax.f32 %v2640_v40, 0.0  ;;  %v2643_v11 = vadd.f32 %v6209_v9, %v2642_v23  ;;  %v2750_v10 = vpack.c.bf16 %v2735_v41, %v2734_v34 }
 0x9fc   :  { %v2708_v5 = vmul.f32 0.5, %v2692_v52  ;;  %v2693_v3 = vmax.f32 %v2651_v4, 0.0 }
 0x9fd   :  { %v2706_v12 = vmul.f32 0.5, %v2690_v50  ;;  %v2691_v45 = vmax.f32 %v2643_v11, 0.0  ;;  %4341 = vmatprep.mubr.bf16.mxu0 %v2750_v10  ;;  %v2732_v50 = vmul.f32 0.5, %v6202_v63  ;;  %v2733_v10 = vmul.f32 0.5, %v6205_v13 }
 0x9fe   :  { %v2709_v49 = vmul.f32 0.5, %v2693_v3  ;;  %4342 = vmatmul.mubr.bf16.vlgmr.msra.gmra.mrb[96].mxu0 %v2751_v47  ;;  %v2740_v17 = vadd.f32 %v2724_v61, %v2708_v5  ;;  %v2730_v5 = vmul.f32 0.5, %v6196_v22 }
 0x9ff   :  { %v2707_v55 = vmul.f32 0.5, %v2691_v45  ;;  %v4319_v58 = vpop.f32.mrb[88].mxu1  ;;  %v2738_v2 = vadd.f32 %v2722_v42, %v2706_v12  ;;  %v2731_v12 = vmul.f32 0.5, %v6199_v37 }
 0xa00   :  { %v2741_v1 = vadd.f32 %v2725_v16, %v2709_v49  ;;  %v2664_v25 = vadd.f32 %v4319_v58, %v6209_v9  ;;  %v2655_v51 = vpop.f32.mrb[89].mxu1 }
 0xa01   :  { %v2739_v15 = vadd.f32 %v2723_v19, %v2707_v55  ;;  %v2656_v14 = vadd.f32 %v6209_v9, %v2655_v51  ;;  %v4320_v24 = vpop.f32.mrb[90].mxu1 }
 0xa02   :  { %v2696_v30 = vmax.f32 %v2664_v25, 0.0  ;;  %v2667_v56 = vadd.f32 %v4320_v24, %v6209_v9  ;;  %v2658_v35 = vpop.f32.mrb[91].mxu1  ;;  %v2753_v53 = vpack.c.bf16 %v2741_v1, %v2740_v17 }
 0xa03   :  { %v2694_v21 = vmax.f32 %v2656_v14, 0.0  ;;  %v2659_v60 = vadd.f32 %v6209_v9, %v2658_v35  ;;  %v2752_v27 = vpack.c.bf16 %v2739_v15, %v2738_v2  ;;  %v3142_v35 = vpop.xlane.xlu1 %3141 }
 0xa04   :  { %v2712_v32 = vmul.f32 0.5, %v2696_v30  ;;  %v2697_v20 = vmax.f32 %v2667_v56, 0.0  ;;  %v3138_v56 = vpop.xlane.xlu0 %3137 }
 0xa05   :  { %v2710_v38 = vmul.f32 0.5, %v2694_v21  ;;  %v2695_v44 = vmax.f32 %v2659_v60, 0.0  ;;  %4345 = vmatprep.mubr.bf16.mxu0 %v2752_v27  ;;  %v6268_v60 = vld [vmem:[%s6783_s1] ss:$0 sm:$0xff] }
 0xa06   :  { %v2713_v0 = vmul.f32 0.5, %v2697_v20  ;;  %4346 = vmatmul.mubr.bf16.gmra.mrb[100].mxu0 %v2753_v53  ;;  %v2744_v39 = vadd.f32 %v2728_v36, %v2712_v32  ;;  %v6784_v53 = vlaneseq }
 0xa07   :  { %v2711_v26 = vmul.f32 0.5, %v2695_v44  ;;  %v4323_v28 = vpop.f32.mrb[92].mxu1  ;;  %v2742_v43 = vadd.f32 %v2726_v54, %v2710_v38  ;;  %v3144_v20 = vpop.xlane.xlu1 %3143 }
 0xa08   :  { %v2745_v57 = vadd.f32 %v2729_v6, %v2713_v0  ;;  %v2680_v8 = vadd.f32 %v4323_v28, %v6209_v9  ;;  %v2671_v59 = vpop.f32.mrb[93].mxu1  ;;  %v6265_v21 = vand.u32 127, %v6784_v53  ;;  %v3140_v27 = vpop.xlane.xlu0 %3139  ;;  %v6282_v28 = vld [vmem:[%s6785_s13] ss:$0 sm:$0xff] }
 0xa09   :  { %v2743_v33 = vadd.f32 %v2727_v7, %v2711_v26  ;;  %v2672_v48 = vadd.f32 %v6209_v9, %v2671_v59  ;;  %v4324_v31 = vpop.f32.mrb[94].mxu1 }
 0xa0a   :  { %v2700_v34 = vmax.f32 %v2680_v8, 0.0  ;;  %v2683_v18 = vadd.f32 %v4324_v31, %v6209_v9  ;;  %v2674_v41 = vpop.f32.mrb[95].mxu1  ;;  %v2755_v40 = vpack.c.bf16 %v2745_v57, %v2744_v39  ;;  %vm2928_vm0 = vcmp.lt.s32.totalorder %v6265_v21, 4 }
 0xa0b   :  { %v2698_v46 = vmax.f32 %v2672_v48, 0.0  ;;  %v2675_v29 = vadd.f32 %v6209_v9, %v2674_v41  ;;  %v2754_v62 = vpack.c.bf16 %v2743_v33, %v2742_v43  ;;  %v6284_v39 = vpop.xlane.xlu1 %3151  ;;  %v3321_v33 = vadd.f32 %v6282_v28, %v3138_v56 }
 0xa0c   :  { %v2716_v47 = vmul.f32 0.5, %v2700_v34  ;;  %v2701_v52 = vmax.f32 %v2683_v18, 0.0  ;;  %v6272_v0 = vpop.xlane.xlu0 %3149 }
 0xa0d   :  { %v2714_v4 = vmul.f32 0.5, %v2698_v46  ;;  %v2699_v23 = vmax.f32 %v2675_v29, 0.0  ;;  %4349 = vmatprep.mubr.bf16.mxu0 %v2754_v62  ;;  %v3322_v46 = vadd.f32 %v6282_v28, %v3140_v27 }
 0xa0e   :  { %v2717_v11 = vmul.f32 0.5, %v2701_v52  ;;  %4350 = vmatmul.mubr.bf16.gmra.mrb[104].mxu0 %v2755_v40  ;;  %v2748_v45 = vadd.f32 %v2732_v50, %v2716_v47 }
 0xa0f   :  { %v2715_v3 = vmul.f32 0.5, %v2699_v23  ;;  %v2746_v9 = vadd.f32 %v2730_v5, %v2714_v4  ;;  %v3148_v52 = vpop.xlane.xlu1 %3147 }
 0xa10   :  { %v2749_v61 = vadd.f32 %v2733_v10, %v2717_v11  ;;  %v3146_v34 = vpop.xlane.xlu0 %3145  ;;  %v3323_v10 = vadd.f32 %v6282_v28, %v3142_v35 }
 0xa11   :  { %v2747_v49 = vadd.f32 %v2731_v12, %v2715_v3 }
 0xa12   :  { %v2757_v16 = vpack.c.bf16 %v2749_v61, %v2748_v45 }
 0xa13   :  { %v2756_v42 = vpack.c.bf16 %v2747_v49, %v2746_v9 }
 0xa14   :  { %v3158_v3 = vpop.xlane.xlu0 %3157 }
 0xa15   :  { %4353 = vmatprep.mubr.bf16.mxu0 %v2756_v42  ;;  %v6320_v42 = vpop.xlane.xlu1 %3159 }
 0xa16   :  { %4354 = vmatmul.mubr.bf16.gmra.mrb[108].mxu0 %v2757_v16  ;;  %v3324_v16 = vadd.f32 %v6282_v28, %v3144_v20 }
 0xa2f   :  { %v4391_v55 = vpop.f32.mrb[96].mxu1 }
 0xa30   :  { %v3235_v19 = vpop.f32.mrb[97].mxu1  ;;  %v3338_v48 = vmul.f32 2.0, %v4391_v55 }
 0xa31   :  { %v3337_v59 = vmul.f32 2.0, %v3235_v19 }
 0xa32   :  { %v3354_v5 = vsub.f32 %v3322_v46, %v3338_v48  ;;  %v3327_v48 = vadd.f32 %v6282_v28, %v6272_v0 }
 0xa33   :  { %v4394_v63 = vpop.f32.mrb[98].mxu1  ;;  %v3353_v29 = vsub.f32 %v3321_v33, %v3337_v59 }
 0xa34   :  { %v3245_v58 = vpop.f32.mrb[99].mxu1  ;;  %v3340_v12 = vmul.f32 2.0, %v4394_v63  ;;  %v3325_v63 = vadd.f32 %v6282_v28, %v3146_v34  ;;  %v3156_v34 = vpop.xlane.xlu1 %3155 }
 0xa35   :  { %v3339_v62 = vmul.f32 2.0, %v3245_v58  ;;  %v3369_v9 = vmax.f32 %v3353_v29, 0.0  ;;  %v3370_v58 = vmax.f32 %v3354_v5, 0.0 }
 0xa36   :  { %v3356_v35 = vsub.f32 %v3324_v16, %v3340_v12  ;;  %v3331_v16 = vadd.f32 %v6282_v28, %v3158_v3 }
 0xa37   :  { %v6240_v13 = vpop.f32.mrb[100].mxu1  ;;  %v3355_v49 = vsub.f32 %v3323_v10, %v3339_v62  ;;  %v3328_v62 = vadd.f32 %v6282_v28, %v6284_v39 }
 0xa38   :  { %v6242_v17 = vpop.f32.mrb[101].mxu1  ;;  %v3342_v53 = vmul.f32 2.0, %v6240_v13  ;;  %v6365_v39 = vpop.xlane.xlu1 %3167 }
 0xa39   :  { %v3341_v55 = vmul.f32 2.0, %v6242_v17  ;;  %v3326_v17 = vadd.f32 %v6282_v28, %v3148_v52 }
 0xa3b   :  { %v6244_v22 = vpop.f32.mrb[102].mxu1 }
 0xa3c   :  { %v6246_v37 = vpop.f32.mrb[103].mxu1 }
 0xa3f   :  { %v6248_v1 = vpop.f32.mrb[104].mxu1 }
 0xa40   :  { %v6250_v25 = vpop.f32.mrb[105].mxu1 }
 0xa43   :  { %v6252_v51 = vpop.f32.mrb[106].mxu1 }
 0xa44   :  { %v6254_v2 = vpop.f32.mrb[107].mxu1 }
 0xa47   :  { %v6256_v15 = vpop.f32.mrb[108].mxu1 }
 0xa48   :  { %v6258_v14 = vpop.f32.mrb[109].mxu1 }
 0xa4b   :  { %v6260_v24 = vpop.f32.mrb[110].mxu1 }
 0xa4c   :  { %v6262_v30 = vpop.f32.mrb[111].mxu1 }
 0xad1   :  { %v4343_v32 = vpop.f32.mrb[96].mxu0 }
 0xad2   :  { %v2872_v38 = vadd.f32 %v4343_v32, %v6268_v60  ;;  %v2863_v44 = vpop.f32.mrb[97].mxu0 }
 0xad3   :  { %v4344_v36 = vpop.f32.mrb[98].mxu0  ;;  %v2864_v6 = vadd.f32 %v6268_v60, %v2863_v44  ;;  %v3371_v44 = vmax.f32 %v3355_v49, 0.0 }
 0xad4   :  { %v2875_v54 = vadd.f32 %v4344_v36, %v6268_v60  ;;  %v2866_v26 = vpop.f32.mrb[99].mxu0  ;;  %v6278_v7 = vsel %vm2928_vm0, %v2872_v38, -inf  ;;  %v3385_v38 = vadd.f32 1.0, %v3369_v9  ;;  %v3343_v36 = vmul.f32 2.0, %v6246_v37 }
 0xad5   :  { %2949 = vmax.xlane.f32.xlu0 %v6278_v7  ;;  %v2867_v57 = vadd.f32 %v6268_v60, %v2866_v26  ;;  %v6294_v43 = vsel %vm2928_vm0, %v2864_v6, -inf  ;;  %v3357_v26 = vsub.f32 %v3325_v63, %v3341_v55  ;;  %v3344_v37 = vmul.f32 2.0, %v6244_v22 }
 0xad6   :  { %v6289_v8 = vsel %vm2928_vm0, %v2875_v54, -inf  ;;  %v3154_v54 = vpop.xlane.xlu0 %3153  ;;  %4617 = vrcp.f32 %v3385_v38  ;;  %v3387_v22 = vadd.f32 1.0, %v3371_v44  ;;  %v3346_v9 = vmul.f32 2.0, %v6248_v1 }
 0xad7   :  { %2951 = vmax.xlane.f32.xlu1 %v6289_v8  ;;  %v6301_v40 = vsel %vm2928_vm0, %v2867_v57, -inf  ;;  %v3373_v52 = vmax.f32 %v3357_v26, 0.0  ;;  %v3360_v10 = vsub.f32 %v3328_v62, %v3344_v37  ;;  %v3330_v55 = vadd.f32 %v6282_v28, %v3156_v34 }
 0xad8   :  { %v3347_v1 = vmul.f32 2.0, %v6254_v2  ;;  %v3332_v2 = vadd.f32 %v6282_v28, %v6320_v42  ;;  %v3349_v37 = vmul.f32 2.0, %v6258_v14 }
 0xad9   :  { %v4347_v31 = vpop.f32.mrb[100].mxu0  ;;  %2945 = vmax.xlane.f32.xlu0 %v6294_v43 }
 0xada   :  { %v2888_v18 = vadd.f32 %v4347_v31, %v6268_v60  ;;  %v2879_v41 = vpop.f32.mrb[101].mxu0  ;;  %v3386_v31 = vadd.f32 1.0, %v3370_v58  ;;  %v6356_v0 = vpop.xlane.xlu0 %3165 }
 0xadb   :  { %v4348_v47 = vpop.f32.mrb[102].mxu0  ;;  %2947 = vmax.xlane.f32.xlu1 %v6301_v40  ;;  %v2880_v4 = vadd.f32 %v6268_v60, %v2879_v41  ;;  %v3358_v41 = vsub.f32 %v3326_v17, %v3342_v53 }
 0xadc   :  { %v2891_v23 = vadd.f32 %v4348_v47, %v6268_v60  ;;  %v2882_v50 = vpop.f32.mrb[103].mxu0  ;;  %v6309_v11 = vsel %vm2928_vm0, %v2888_v18, -inf  ;;  %v3372_v18 = vmax.f32 %v3356_v35, 0.0  ;;  %v3359_v47 = vsub.f32 %v3327_v48, %v3343_v36 }
 0xadd   :  { %2957 = vmax.xlane.f32.xlu0 %v6309_v11  ;;  %v2883_v45 = vadd.f32 %v6268_v60, %v2882_v50  ;;  %v6325_v19 = vsel %vm2928_vm0, %v2880_v4, -inf  ;;  %v3345_v4 = vmul.f32 2.0, %v6250_v25  ;;  %v3329_v50 = vadd.f32 %v6282_v28, %v3154_v54 }
 0xade   :  { %v6316_v61 = vsel %vm2928_vm0, %v2891_v23, -inf  ;;  %4619 = vrcp.f32 %v3386_v31  ;;  %v3388_v12 = vadd.f32 1.0, %v3372_v18  ;;  %v3375_v63 = vmax.f32 %v3359_v47, 0.0  ;;  %v3162_v44 = vpop.xlane.xlu0 %3161 }
 0xadf   :  { %2959 = vmax.xlane.f32.xlu1 %v6316_v61  ;;  %v6333_v20 = vsel %vm2928_vm0, %v2883_v45, -inf  ;;  %v3374_v45 = vmax.f32 %v3358_v41, 0.0  ;;  %4621 = vrcp.f32 %v3387_v22  ;;  %v3389_v35 = vadd.f32 1.0, %v3373_v52 }
 0xae0   :  { %v3361_v53 = vsub.f32 %v3329_v50, %v3345_v4  ;;  %4623 = vrcp.f32 %v3388_v12  ;;  %v3348_v54 = vmul.f32 2.0, %v6252_v51  ;;  %v3391_v26 = vadd.f32 1.0, %v3375_v63  ;;  %v4618_v51 = vpop.eup %4617 }
 0xae1   :  { %v4351_v56 = vpop.f32.mrb[104].mxu0  ;;  %2953 = vmax.xlane.f32.xlu0 %v6325_v19  ;;  %v3390_v36 = vadd.f32 1.0, %v3374_v45  ;;  %4625 = vrcp.f32 %v3389_v35  ;;  %v3363_v31 = vsub.f32 %v3331_v16, %v3347_v1  ;;  %v3333_v34 = vadd.f32 %v6282_v28, %v3162_v44 }
 0xae2   :  { %v2904_v27 = vadd.f32 %v4351_v56, %v6268_v60  ;;  %v2895_v32 = vpop.f32.mrb[105].mxu0  ;;  %v3377_v48 = vmax.f32 %v3361_v53, 0.0  ;;  %v3364_v41 = vsub.f32 %v3332_v2, %v3348_v54  ;;  %v3351_v50 = vmul.f32 2.0, %v6262_v30 }
 0xae3   :  { %v4352_v6 = vpop.f32.mrb[106].mxu0  ;;  %2955 = vmax.xlane.f32.xlu1 %v6333_v20  ;;  %v2896_v13 = vadd.f32 %v6268_v60, %v2895_v32  ;;  %v3376_v32 = vmax.f32 %v3360_v10, 0.0  ;;  %4627 = vrcp.f32 %v3390_v36  ;;  %v3379_v52 = vmax.f32 %v3363_v31, 0.0 }
 0xae4   :  { %v2907_v57 = vadd.f32 %v4352_v6, %v6268_v60  ;;  %v2898_v59 = vpop.f32.mrb[107].mxu0  ;;  %v6342_v33 = vsel %vm2928_vm0, %v2904_v27, -inf  ;;  %v3362_v6 = vsub.f32 %v3330_v55, %v3346_v9  ;;  %4629 = vrcp.f32 %v3391_v26 }
 0xae5   :  { %2965 = vmax.xlane.f32.xlu0 %v6342_v33  ;;  %v2899_v46 = vadd.f32 %v6268_v60, %v2898_v59  ;;  %v6361_v23 = vsel %vm2928_vm0, %v2896_v13, -inf  ;;  %v3164_v59 = vpop.xlane.xlu1 %3163  ;;  %v3392_v18 = vadd.f32 1.0, %v3376_v32  ;;  %v3393_v22 = vadd.f32 1.0, %v3377_v48 }
 0xae6   :  { %v6351_v29 = vsel %vm2928_vm0, %v2907_v57, -inf  ;;  %v3334_v14 = vadd.f32 %v6282_v28, %v3164_v59  ;;  %v3365_v4 = vsub.f32 %v3333_v34, %v3349_v37  ;;  %v6412_v10 = vsel %vm2928_vm0, %v4618_v51, 0.0 }
 0xae7   :  { %2967 = vmax.xlane.f32.xlu1 %v6351_v29  ;;  %v6370_v25 = vsel %vm2928_vm0, %v2899_v46, -inf  ;;  %v3350_v46 = vmul.f32 2.0, %v6256_v15  ;;  %v3335_v15 = vadd.f32 %v6282_v28, %v6356_v0  ;;  %4631 = vrcp.f32 %v3392_v18 }
 0xae8   :  { %v4620_v62 = vpop.eup %4619  ;;  %v3380_v45 = vmax.f32 %v3364_v41, 0.0  ;;  %v3336_v30 = vadd.f32 %v6282_v28, %v6365_v39  ;;  %4633 = vrcp.f32 %v3393_v22  ;;  %v3395_v55 = vadd.f32 1.0, %v3379_v52 }
 0xae9   :  { %v4355_v5 = vpop.f32.mrb[108].mxu0  ;;  %2961 = vmax.xlane.f32.xlu0 %v6361_v23  ;;  %v3366_v9 = vsub.f32 %v3334_v14, %v3350_v46  ;;  %v6420_v16 = vsel %vm2928_vm0, %v4620_v62, 0.0  ;;  %v3381_v63 = vmax.f32 %v3365_v4, 0.0 }
 0xaea   :  { %v2911_v49 = vpop.f32.mrb[109].mxu0  ;;  %v2920_v17 = vadd.f32 %v4355_v5, %v6268_v60  ;;  %v4622_v5 = vpop.eup %4621  ;;  %v3396_v35 = vadd.f32 1.0, %v3380_v45 }
 0xaeb   :  { %v2912_v58 = vadd.f32 %v6268_v60, %v2911_v49  ;;  %v4356_v56 = vpop.f32.mrb[110].mxu0  ;;  %2963 = vmax.xlane.f32.xlu1 %v6370_v25  ;;  %v3352_v49 = vmul.f32 2.0, %v6260_v24  ;;  %v4624_v0 = vpop.eup %4623  ;;  %v3382_v53 = vmax.f32 %v3366_v9, 0.0 }
 0xaec   :  { %v2914_v27 = vpop.f32.mrb[111].mxu0  ;;  %v2923_v13 = vadd.f32 %v4356_v56, %v6268_v60  ;;  %v6397_v42 = vsel %vm2928_vm0, %v2920_v17, -inf  ;;  %v6425_v56 = vsel %vm2928_vm0, %v4622_v5, 0.0  ;;  %v4626_v24 = vpop.eup %4625  ;;  %v6430_v39 = vsel %vm2928_vm0, %v4624_v0, 0.0 }
 0xaed   :  { %v2915_v38 = vadd.f32 %v6268_v60, %v2914_v27  ;;  %v6381_v3 = vsel %vm2928_vm0, %v2912_v58, -inf  ;;  %v3378_v60 = vmax.f32 %v3362_v6, 0.0  ;;  %v3367_v58 = vsub.f32 %v3335_v15, %v3351_v50  ;;  %v4628_v1 = vpop.eup %4627 }
 0xaee   :  { %2969 = vmax.xlane.f32.xlu0 %v6381_v3  ;;  %v6404_v47 = vsel %vm2928_vm0, %v2923_v13, -inf  ;;  %v3368_v28 = vsub.f32 %v3336_v30, %v3352_v49  ;;  %v3397_v27 = vadd.f32 1.0, %v3381_v63  ;;  %v4630_v17 = vpop.eup %4629  ;;  %v3398_v44 = vadd.f32 1.0, %v3382_v53 }
 0xaef   :  { %v6390_v57 = vsel %vm2928_vm0, %v2915_v38, -inf  ;;  %v3394_v12 = vadd.f32 1.0, %v3378_v60  ;;  %v3383_v32 = vmax.f32 %v3367_v58, 0.0  ;;  %v6435_v38 = vsel %vm2928_vm0, %v4626_v24, 0.0 }
 0xaf0   :  { %2971 = vmax.xlane.f32.xlu1 %v6390_v57  ;;  %v3384_v36 = vmax.f32 %v3368_v28, 0.0  ;;  %v6440_v54 = vsel %vm2928_vm0, %v4628_v1, 0.0  ;;  %v6445_v26 = vsel %vm2928_vm0, %v4630_v17, 0.0 }
 0xaf1   :  { %4635 = vrcp.f32 %v3394_v12  ;;  %v4632_v6 = vpop.eup %4631  ;;  %v3399_v2 = vadd.f32 1.0, %v3383_v32 }
 0xaf2   :  { %2973 = vmax.xlane.f32.xlu0 %v6397_v42  ;;  %4637 = vrcp.f32 %v3395_v55  ;;  %v4634_v13 = vpop.eup %4633  ;;  %v3400_v59 = vadd.f32 1.0, %v3384_v36  ;;  %v6450_v48 = vsel %vm2928_vm0, %v4632_v6, 0.0 }
 0xaf3   :  { %4639 = vrcp.f32 %v3396_v35  ;;  %v6455_v37 = vsel %vm2928_vm0, %v4634_v13, 0.0 }
 0xaf4   :  { %2975 = vmax.xlane.f32.xlu1 %v6404_v47  ;;  %4641 = vrcp.f32 %v3397_v27 }
 0xaf5   :  { %4643 = vrcp.f32 %v3398_v44 }
 0xaf6   :  { %3449 = vadd.xlane.f32.xlu0 %v6412_v10  ;;  %4645 = vrcp.f32 %v3399_v2 }
 0xaf7   :  { %4647 = vrcp.f32 %v3400_v59 }
 0xaf8   :  { %3451 = vadd.xlane.f32.xlu1 %v6420_v16 }
 0xafa   :  { %3453 = vadd.xlane.f32.xlu0 %v6425_v56 }
 0xafb   :  { %v4636_v31 = vpop.eup %4635 }
 0xafc   :  { %3455 = vadd.xlane.f32.xlu1 %v6430_v39  ;;  %v4638_v51 = vpop.eup %4637  ;;  %v6460_v34 = vsel %vm2928_vm0, %v4636_v31, 0.0 }
 0xafd   :  { %v4640_v18 = vpop.eup %4639  ;;  %v6465_v60 = vsel %vm2928_vm0, %v4638_v51, 0.0 }
 0xafe   :  { %3457 = vadd.xlane.f32.xlu0 %v6435_v38  ;;  %v4642_v41 = vpop.eup %4641  ;;  %v6470_v46 = vsel %vm2928_vm0, %v4640_v18, 0.0 }
 0xaff   :  { %v4644_v62 = vpop.eup %4643  ;;  %v6475_v14 = vsel %vm2928_vm0, %v4642_v41, 0.0 }
 0xb00   :  { %3459 = vadd.xlane.f32.xlu1 %v6440_v54  ;;  %v4646_v22 = vpop.eup %4645  ;;  %v6480_v52 = vsel %vm2928_vm0, %v4644_v62, 0.0 }
 0xb01   :  { %v4648_v4 = vpop.eup %4647  ;;  %v6485_v50 = vsel %vm2928_vm0, %v4646_v22, 0.0 }
 0xb02   :  { %3461 = vadd.xlane.f32.xlu0 %v6445_v26  ;;  %v6490_v15 = vsel %vm2928_vm0, %v4648_v4, 0.0 }
 0xb04   :  { %3463 = vadd.xlane.f32.xlu1 %v6450_v48 }
 0xb06   :  { %3465 = vadd.xlane.f32.xlu0 %v6455_v37 }
 0xb08   :  { %3467 = vadd.xlane.f32.xlu1 %v6460_v34 }
 0xb0a   :  { %3469 = vadd.xlane.f32.xlu0 %v6465_v60 }
 0xb0c   :  { %3471 = vadd.xlane.f32.xlu1 %v6470_v46 }
 0xb0e   :  { %3473 = vadd.xlane.f32.xlu0 %v6475_v14 }
 0xb10   :  { %3475 = vadd.xlane.f32.xlu1 %v6480_v52 }
 0xb12   :  { %3477 = vadd.xlane.f32.xlu0 %v6485_v50 }
 0xb14   :  { %3479 = vadd.xlane.f32.xlu1 %v6490_v15 }
 0xb62   :  { %v2950_v5 = vpop.xlane.xlu0 %2949 }
 0xb63   :  { %v2979_v12 = vsub.f32 %v6278_v7, %v2950_v5 }
 0xb64   :  { %v2952_v45 = vpop.xlane.xlu1 %2951 }
 0xb65   :  { %v2997_v9 = vmul.f32 1.442695, %v2979_v12  ;;  %v2980_v49 = vsub.f32 %v6289_v8, %v2952_v45 }
 0xb66   :  { %v2946_v30 = vpop.xlane.xlu0 %2945 }
 0xb67   :  { %4649 = vpow2.f32 %v2997_v9  ;;  %v2999_v0 = vmul.f32 1.442695, %v2980_v49  ;;  %v2977_v55 = vsub.f32 %v6294_v43, %v2946_v30 }
 0xb68   :  { %v2948_v63 = vpop.xlane.xlu1 %2947 }
 0xb69   :  { %4651 = vpow2.f32 %v2999_v0  ;;  %v2993_v58 = vmul.f32 1.442695, %v2977_v55  ;;  %v2978_v24 = vsub.f32 %v6301_v40, %v2948_v63 }
 0xb6a   :  { %v2958_v35 = vpop.xlane.xlu0 %2957 }
 0xb6b   :  { %4653 = vpow2.f32 %v2993_v58  ;;  %v2995_v53 = vmul.f32 1.442695, %v2978_v24  ;;  %v2983_v28 = vsub.f32 %v6309_v11, %v2958_v35 }
 0xb6c   :  { %v2960_v7 = vpop.xlane.xlu1 %2959 }
 0xb6d   :  { %4655 = vpow2.f32 %v2995_v53  ;;  %v3005_v1 = vmul.f32 1.442695, %v2983_v28  ;;  %v2984_v8 = vsub.f32 %v6316_v61, %v2960_v7 }
 0xb6e   :  { %v2954_v27 = vpop.xlane.xlu0 %2953 }
 0xb6f   :  { %4657 = vpow2.f32 %v3005_v1  ;;  %v3007_v32 = vmul.f32 1.442695, %v2984_v8  ;;  %v2981_v43 = vsub.f32 %v6325_v19, %v2954_v27 }
 0xb70   :  { %v2956_v17 = vpop.xlane.xlu1 %2955 }
 0xb71   :  { %v4650_v44 = vpop.eup %4649  ;;  %4659 = vpow2.f32 %v3007_v32  ;;  %v3001_v36 = vmul.f32 1.442695, %v2981_v43  ;;  %v2982_v40 = vsub.f32 %v6333_v20, %v2956_v17 }
 0xb72   :  { %v2966_v6 = vpop.xlane.xlu0 %2965  ;;  %v6503_v11 = vsel %vm2928_vm0, %v4650_v44, 0.0 }
 0xb73   :  { %v4652_v2 = vpop.eup %4651  ;;  %4661 = vpow2.f32 %v3001_v36  ;;  %v3003_v13 = vmul.f32 1.442695, %v2982_v40  ;;  %v2987_v61 = vsub.f32 %v6342_v33, %v2966_v6  ;;  %3045 = vadd.xlane.f32.xlu0 %v6503_v11 }
 0xb74   :  { %v2968_v59 = vpop.xlane.xlu1 %2967  ;;  %v6509_v19 = vsel %vm2928_vm0, %v4652_v2, 0.0 }
 0xb75   :  { %v4654_v31 = vpop.eup %4653  ;;  %4663 = vpow2.f32 %v3003_v13  ;;  %v3013_v20 = vmul.f32 1.442695, %v2987_v61  ;;  %v2988_v51 = vsub.f32 %v6351_v29, %v2968_v59  ;;  %3047 = vadd.xlane.f32.xlu1 %v6509_v19 }
 0xb76   :  { %v2962_v18 = vpop.xlane.xlu0 %2961  ;;  %v6515_v41 = vsel %vm2928_vm0, %v4654_v31, 0.0 }
 0xb77   :  { %v4656_v33 = vpop.eup %4655  ;;  %4665 = vpow2.f32 %v3013_v20  ;;  %v3015_v62 = vmul.f32 1.442695, %v2988_v51  ;;  %v2985_v22 = vsub.f32 %v6361_v23, %v2962_v18  ;;  %3041 = vadd.xlane.f32.xlu0 %v6515_v41 }
 0xb78   :  { %v2964_v4 = vpop.xlane.xlu1 %2963  ;;  %v6521_v5 = vsel %vm2928_vm0, %v4656_v33, 0.0 }
 0xb79   :  { %v4658_v29 = vpop.eup %4657  ;;  %4667 = vpow2.f32 %v3015_v62  ;;  %v3009_v12 = vmul.f32 1.442695, %v2985_v22  ;;  %v2986_v45 = vsub.f32 %v6370_v25, %v2964_v4  ;;  %3043 = vadd.xlane.f32.xlu1 %v6521_v5 }
 0xb7a   :  { %v6527_v9 = vsel %vm2928_vm0, %v4658_v29, 0.0 }
 0xb7b   :  { %v4660_v49 = vpop.eup %4659  ;;  %4669 = vpow2.f32 %v3009_v12  ;;  %v3011_v23 = vmul.f32 1.442695, %v2986_v45  ;;  %3053 = vadd.xlane.f32.xlu0 %v6527_v9  ;;  %v2970_v30 = vpop.xlane.xlu0 %2969 }
 0xb7c   :  { %v2989_v0 = vsub.f32 %v6381_v3, %v2970_v30  ;;  %v6533_v55 = vsel %vm2928_vm0, %v4660_v49, 0.0 }
 0xb7d   :  { %v4662_v63 = vpop.eup %4661  ;;  %4671 = vpow2.f32 %v3011_v23  ;;  %3055 = vadd.xlane.f32.xlu1 %v6533_v55  ;;  %v2972_v25 = vpop.xlane.xlu1 %2971 }
 0xb7e   :  { %v3017_v58 = vmul.f32 1.442695, %v2989_v0  ;;  %v2990_v24 = vsub.f32 %v6390_v57, %v2972_v25  ;;  %v6539_v35 = vsel %vm2928_vm0, %v4662_v63, 0.0 }
 0xb7f   :  { %v4664_v53 = vpop.eup %4663  ;;  %3049 = vadd.xlane.f32.xlu0 %v6539_v35  ;;  %v2974_v3 = vpop.xlane.xlu0 %2973 }
 0xb80   :  { %4673 = vpow2.f32 %v3017_v58  ;;  %v3019_v28 = vmul.f32 1.442695, %v2990_v24  ;;  %v2991_v7 = vsub.f32 %v6397_v42, %v2974_v3  ;;  %v6545_v1 = vsel %vm2928_vm0, %v4664_v53, 0.0 }
 0xb81   :  { %v4666_v8 = vpop.eup %4665  ;;  %3051 = vadd.xlane.f32.xlu1 %v6545_v1  ;;  %v2976_v57 = vpop.xlane.xlu1 %2975 }
 0xb82   :  { %4675 = vpow2.f32 %v3019_v28  ;;  %v3021_v27 = vmul.f32 1.442695, %v2991_v7  ;;  %v2992_v32 = vsub.f32 %v6404_v47, %v2976_v57  ;;  %v6551_v43 = vsel %vm2928_vm0, %v4666_v8, 0.0 }
 0xb83   :  { %v4668_v17 = vpop.eup %4667  ;;  %3061 = vadd.xlane.f32.xlu0 %v6551_v43  ;;  %v3450_v42 = vpop.xlane.xlu0 %3449 }
 0xb84   :  { %4677 = vpow2.f32 %v3021_v27  ;;  %v3023_v44 = vmul.f32 1.442695, %v2992_v32  ;;  %v6556_v36 = vsel %vm2928_vm0, %v4668_v17, 0.0 }
 0xb85   :  { %v4670_v40 = vpop.eup %4669  ;;  %4679 = vrcp.f32 %v3450_v42  ;;  %3063 = vadd.xlane.f32.xlu1 %v6556_v36  ;;  %v3452_v6 = vpop.xlane.xlu1 %3451 }
 0xb86   :  { %4681 = vpow2.f32 %v3023_v44  ;;  %v6561_v47 = vsel %vm2928_vm0, %v4670_v40, 0.0 }
 0xb87   :  { %v4672_v2 = vpop.eup %4671  ;;  %4683 = vrcp.f32 %v3452_v6  ;;  %3057 = vadd.xlane.f32.xlu0 %v6561_v47  ;;  %v3454_v13 = vpop.xlane.xlu0 %3453 }
 0xb88   :  { %4685 = vrcp.f32 %v3454_v13  ;;  %v6566_v61 = vsel %vm2928_vm0, %v4672_v2, 0.0 }
 0xb89   :  { %3059 = vadd.xlane.f32.xlu1 %v6566_v61  ;;  %v3456_v59 = vpop.xlane.xlu1 %3455 }
 0xb8a   :  { %v4674_v31 = vpop.eup %4673  ;;  %4687 = vrcp.f32 %v3456_v59 }
 0xb8b   :  { %v3458_v20 = vpop.xlane.xlu0 %3457  ;;  %v6571_v51 = vsel %vm2928_vm0, %v4674_v31, 0.0 }
 0xb8c   :  { %v4676_v18 = vpop.eup %4675  ;;  %4689 = vrcp.f32 %v3458_v20  ;;  %3065 = vadd.xlane.f32.xlu0 %v6571_v51 }
 0xb8d   :  { %v3460_v33 = vpop.xlane.xlu1 %3459  ;;  %v6576_v62 = vsel %vm2928_vm0, %v4676_v18, 0.0 }
 0xb8e   :  { %v4678_v22 = vpop.eup %4677  ;;  %4691 = vrcp.f32 %v3460_v33  ;;  %3067 = vadd.xlane.f32.xlu1 %v6576_v62 }
 0xb8f   :  { %v4680_v4 = vpop.eup %4679  ;;  %v3462_v29 = vpop.xlane.xlu0 %3461  ;;  %v6581_v12 = vsel %vm2928_vm0, %v4678_v22, 0.0 }
 0xb90   :  { %v4682_v45 = vpop.eup %4681  ;;  %v3497_v49 = vmul.f32 %v4680_v4, %v6412_v10  ;;  %4693 = vrcp.f32 %v3462_v29  ;;  %3069 = vadd.xlane.f32.xlu0 %v6581_v12 }
 0xb91   :  { %v4684_v23 = vpop.eup %4683  ;;  %v3464_v30 = vpop.xlane.xlu1 %3463  ;;  %v6587_v0 = vsel %vm2928_vm0, %v4682_v45, 0.0 }
 0xb92   :  { %v4686_v63 = vpop.eup %4685  ;;  %3529 = vst [vmem:[#allocation36] sm:$0xff] %v3497_v49  ;;  %v3498_v25 = vmul.f32 %v4684_v23, %v6420_v16  ;;  %4695 = vrcp.f32 %v3464_v30  ;;  %3071 = vadd.xlane.f32.xlu1 %v6587_v0 }
 0xb93   :  { %v3499_v58 = vmul.f32 %v4686_v63, %v6425_v56  ;;  %v3466_v24 = vpop.xlane.xlu0 %3465 }
 0xb94   :  { %v4688_v10 = vpop.eup %4687  ;;  %3530 = vst [vmem:[#allocation36 + $0x8] sm:$0xff] %v3498_v25  ;;  %4697 = vrcp.f32 %v3466_v24 }
 0xb95   :  { %3531 = vst [vmem:[#allocation36 + $0x10] sm:$0xff] %v3499_v58  ;;  %v3500_v53 = vmul.f32 %v4688_v10, %v6430_v39  ;;  %v3468_v3 = vpop.xlane.xlu1 %3467 }
 0xb96   :  { %v4690_v21 = vpop.eup %4689  ;;  %4699 = vrcp.f32 %v3468_v3 }
 0xb97   :  { %3532 = vst [vmem:[#allocation36 + $0x18] sm:$0xff] %v3500_v53  ;;  %v3501_v28 = vmul.f32 %v4690_v21, %v6435_v38  ;;  %v3470_v7 = vpop.xlane.xlu0 %3469 }
 0xb98   :  { %v4692_v16 = vpop.eup %4691  ;;  %4701 = vrcp.f32 %v3470_v7 }
 0xb99   :  { %3533 = vst [vmem:[#allocation36 + $0x20] sm:$0xff] %v3501_v28  ;;  %v3502_v8 = vmul.f32 %v4692_v16, %v6440_v54  ;;  %v3472_v56 = vpop.xlane.xlu1 %3471 }
 0xb9a   :  { %v4694_v57 = vpop.eup %4693  ;;  %4703 = vrcp.f32 %v3472_v56 }
 0xb9b   :  { %3534 = vst [vmem:[#allocation36 + $0x28] sm:$0xff] %v3502_v8  ;;  %v3503_v27 = vmul.f32 %v4694_v57, %v6445_v26  ;;  %v3474_v32 = vpop.xlane.xlu0 %3473 }
 0xb9c   :  { %v4696_v39 = vpop.eup %4695  ;;  %4705 = vrcp.f32 %v3474_v32 }
 0xb9d   :  { %3535 = vst [vmem:[#allocation36 + $0x30] sm:$0xff] %v3503_v27  ;;  %v3504_v17 = vmul.f32 %v4696_v39, %v6450_v48  ;;  %v3476_v42 = vpop.xlane.xlu1 %3475 }
 0xb9e   :  { %v4698_v38 = vpop.eup %4697  ;;  %4707 = vrcp.f32 %v3476_v42 }
 0xb9f   :  { %3536 = vst [vmem:[#allocation36 + $0x38] sm:$0xff] %v3504_v17  ;;  %v3505_v44 = vmul.f32 %v4698_v38, %v6455_v37  ;;  %v3478_v40 = vpop.xlane.xlu0 %3477 }
 0xba0   :  { %v4700_v54 = vpop.eup %4699  ;;  %4709 = vrcp.f32 %v3478_v40 }
 0xba1   :  { %3537 = vst [vmem:[#allocation36 + $0x40] sm:$0xff] %v3505_v44  ;;  %v3506_v6 = vmul.f32 %v4700_v54, %v6460_v34  ;;  %v3480_v2 = vpop.xlane.xlu1 %3479 }
 0xba2   :  { %v4702_v26 = vpop.eup %4701  ;;  %4711 = vrcp.f32 %v3480_v2 }
 0xba3   :  { %3538 = vst [vmem:[#allocation36 + $0x48] sm:$0xff] %v3506_v6  ;;  %v3507_v13 = vmul.f32 %v4702_v26, %v6465_v60 }
 0xba4   :  { %v4704_v59 = vpop.eup %4703 }
 0xba5   :  { %3539 = vst [vmem:[#allocation36 + $0x50] sm:$0xff] %v3507_v13  ;;  %v3508_v48 = vmul.f32 %v4704_v59, %v6470_v46 }
 0xba6   :  { %v4706_v31 = vpop.eup %4705 }
 0xba7   :  { %3540 = vst [vmem:[#allocation36 + $0x58] sm:$0xff] %v3508_v48  ;;  %v3509_v37 = vmul.f32 %v4706_v31, %v6475_v14 }
 0xba8   :  { %v4708_v20 = vpop.eup %4707 }
 0xba9   :  { %3541 = vst [vmem:[#allocation36 + $0x60] sm:$0xff] %v3509_v37  ;;  %v3510_v18 = vmul.f32 %v4708_v20, %v6480_v52 }
 0xbaa   :  { %v4710_v33 = vpop.eup %4709 }
 0xbab   :  { %3542 = vst [vmem:[#allocation36 + $0x68] sm:$0xff] %v3510_v18  ;;  %v3511_v34 = vmul.f32 %v4710_v33, %v6485_v50 }
 0xbac   :  { %v4712_v22 = vpop.eup %4711 }
 0xbad   :  { %3543 = vst [vmem:[#allocation36 + $0x70] sm:$0xff] %v3511_v34  ;;  %v3512_v60 = vmul.f32 %v4712_v22, %v6490_v15 }
 0xbaf   :  { %3544 = vst [vmem:[#allocation36 + $0x78] sm:$0xff] %v3512_v60 }
 0xbb0   :  { %5234 = shalt.err (!%p5231_p4)
}
 0xbb1   :  { %s5235_s3 = scalar_lea.hbm %s5542_s8, 2048 }
 0xbb2   :  { %p5236_p5 = scmp.ne.s32.totalorder %s5542_s8, %s5235_s3  ;;  %p5239_p6 = scmp.lt.u32.totalorder %s5235_s3, %s5542_s8 }
 0xbb4   :  { %p5241_p7 = pnand %p5239_p6, %p5236_p5 }
 0xbb6   :  { %5244 = shalt.err (!%p5241_p7)
}
 0xbb7   :  { %3588 = dma.vmem_to_hbm [thread:$0]  %s3583_s20, 2048, %s5542_s8, [#allocation4], %s5371_s26, %s5371_s26, %s5372_s28  }
 0xbb8   :  { %s5245_s30 = scalar_lea.vmem %s6605_s10, 2048  ;;  %p5250_p9 = scmp.lt.s32.totalorder %s6605_s10, %s6605_s10 }
 0xbb9   :  { %p5246_p8 = scmp.ne.s32.totalorder %s6605_s10, %s5245_s30  ;;  %p5251_p10 = scmp.lt.s32.totalorder %s5245_s30, %s5245_s30 }
 0xbbb   :  { %p5252_p11 = por %p5251_p10, %p5250_p9 }
 0xbbd   :  { %p5253_p12 = pnand %p5252_p11, %p5246_p8 }
 0xbbf   :  { %5256 = shalt.err (!%p5253_p12)
}
 0xbc0   :  { %s5257_s15 = scalar_lea.hbm %s5547_s27, 2048 }
 0xbc1   :  { %p5258_p13 = scmp.ne.s32.totalorder %s5547_s27, %s5257_s15  ;;  %p5261_p0 = scmp.lt.u32.totalorder %s5257_s15, %s5547_s27 }
 0xbc3   :  { %p5263_p1 = pnand %p5261_p0, %p5258_p13 }
 0xbc5   :  { %5266 = shalt.err (!%p5263_p1)
}
 0xbc6   :  { %3600 = dma.vmem_to_hbm [thread:$0]  %s6605_s10, 2048, %s5547_s27, [#allocation37], %s5371_s26, %s5371_s26, %s5372_s28  }
 0xbc7   :  { %s5397_s8 = smov [#allocation39]  }
 0xbc8   :  { %s3618_s14 = sshll.u32 %s5397_s8, 4  ;;  %s3619_s14 = int_to_ptr.vmem [resolvable:$true] %s3618_s14 }
 0xbc9   :  { %s5267_s0 = scalar_lea.vmem %s3619_s14, 2048  ;;  %p5272_p3 = scmp.lt.s32.totalorder %s3619_s14, %s3619_s14 }
 0xbca   :  { %p5268_p2 = scmp.ne.s32.totalorder %s3619_s14, %s5267_s0  ;;  %p5273_p4 = scmp.lt.s32.totalorder %s5267_s0, %s5267_s0 }
 0xbcc   :  { %p5274_p5 = por %p5273_p4, %p5272_p3 }
 0xbce   :  { %p5275_p6 = pnand %p5274_p5, %p5268_p2 }
 0xbd0   :  { %5278 = shalt.err (!%p5275_p6)
}
 0xbd1   :  { %s5279_s29 = scalar_lea.hbm %s5557_s12, 2048 }
 0xbd2   :  { %p5280_p7 = scmp.ne.s32.totalorder %s5557_s12, %s5279_s29  ;;  %p5283_p8 = scmp.lt.u32.totalorder %s5279_s29, %s5557_s12 }
 0xbd4   :  { %p5285_p9 = pnand %p5283_p8, %p5280_p7 }
 0xbd6   :  { %5288 = shalt.err (!%p5285_p9)
}
 0xbd7   :  { %3624 = dma.vmem_to_hbm [thread:$0]  %s3619_s14, 2048, %s5557_s12, [#allocation40], %s5371_s26, %s5371_s26, %s5372_s28  }
 0xbd8   :  { %s5398_s12 = smov [#allocation38]  }
 0xbd9   :  { %s3606_s27 = sshll.u32 %s5398_s12, 4  ;;  %s3607_s27 = int_to_ptr.vmem [resolvable:$true] %s3606_s27 }
 0xbda   :  { %s5289_s16 = scalar_lea.vmem %s3607_s27, 2048  ;;  %p5294_p11 = scmp.lt.s32.totalorder %s3607_s27, %s3607_s27 }
 0xbdb   :  { %p5290_p10 = scmp.ne.s32.totalorder %s3607_s27, %s5289_s16  ;;  %p5295_p12 = scmp.lt.s32.totalorder %s5289_s16, %s5289_s16 }
 0xbdd   :  { %p5296_p13 = por %p5295_p12, %p5294_p11 }
 0xbdf   :  { %p5297_p0 = pnand %p5296_p13, %p5290_p10 }
 0xc00   :  { %v3046_v46 = vpop.xlane.xlu0 %3045 }
 0xc01   :  { %4713 = vrcp.f32 %v3046_v46 }
 0xc02   :  { %v3048_v14 = vpop.xlane.xlu1 %3047 }
 0xc03   :  { %4715 = vrcp.f32 %v3048_v14 }
 0xc04   :  { %v3042_v52 = vpop.xlane.xlu0 %3041 }
 0xc05   :  { %4717 = vrcp.f32 %v3042_v52 }
 0xc06   :  { %v3044_v50 = vpop.xlane.xlu1 %3043 }
 0xc07   :  { %4719 = vrcp.f32 %v3044_v50 }
 0xc08   :  { %v3054_v15 = vpop.xlane.xlu0 %3053 }
 0xc09   :  { %4721 = vrcp.f32 %v3054_v15 }
 0xc0a   :  { %v3056_v4 = vpop.xlane.xlu1 %3055 }
 0xc0b   :  { %v4714_v29 = vpop.eup %4713  ;;  %4723 = vrcp.f32 %v3056_v4 }
 0xc0c   :  { %v3091_v45 = vmul.f32 %v4714_v29, %v6503_v11  ;;  %v3050_v49 = vpop.xlane.xlu0 %3049 }
 0xc0d   :  { %v4716_v23 = vpop.eup %4715  ;;  %4725 = vrcp.f32 %v3050_v49 }
 0xc0e   :  { %3547 = vst [vmem:[#allocation38 + $0x10] sm:$0xff] %v3091_v45  ;;  %v3092_v30 = vmul.f32 %v4716_v23, %v6509_v19  ;;  %v3052_v63 = vpop.xlane.xlu1 %3051 }
 0xc0f   :  { %v4718_v25 = vpop.eup %4717  ;;  %4727 = vrcp.f32 %v3052_v63 }
 0xc10   :  { %3548 = vst [vmem:[#allocation38 + $0x18] sm:$0xff] %v3092_v30  ;;  %v3089_v58 = vmul.f32 %v4718_v25, %v6515_v41  ;;  %v3062_v24 = vpop.xlane.xlu0 %3061 }
 0xc11   :  { %v4720_v10 = vpop.eup %4719  ;;  %4729 = vrcp.f32 %v3062_v24 }
 0xc12   :  { %3545 = vst [vmem:[#allocation38] sm:$0xff] %v3089_v58  ;;  %v3090_v53 = vmul.f32 %v4720_v10, %v6521_v5  ;;  %v3064_v3 = vpop.xlane.xlu1 %3063 }
 0xc13   :  { %v4722_v11 = vpop.eup %4721  ;;  %4731 = vrcp.f32 %v3064_v3 }
 0xc14   :  { %3546 = vst [vmem:[#allocation38 + $0x8] sm:$0xff] %v3090_v53  ;;  %v3095_v21 = vmul.f32 %v4722_v11, %v6527_v9  ;;  %v3058_v28 = vpop.xlane.xlu0 %3057 }
 0xc15   :  { %v4724_v19 = vpop.eup %4723  ;;  %4733 = vrcp.f32 %v3058_v28 }
 0xc16   :  { %3551 = vst [vmem:[#allocation38 + $0x30] sm:$0xff] %v3095_v21  ;;  %v3096_v7 = vmul.f32 %v4724_v19, %v6533_v55  ;;  %v3060_v16 = vpop.xlane.xlu1 %3059 }
 0xc17   :  { %v4726_v41 = vpop.eup %4725  ;;  %4735 = vrcp.f32 %v3060_v16 }
 0xc18   :  { %3552 = vst [vmem:[#allocation38 + $0x38] sm:$0xff] %v3096_v7  ;;  %v3093_v8 = vmul.f32 %v4726_v41, %v6539_v35 }
 0xc19   :  { %v4728_v56 = vpop.eup %4727  ;;  %v3066_v5 = vpop.xlane.xlu0 %3065 }
 0xc1a   :  { %3549 = vst [vmem:[#allocation38 + $0x20] sm:$0xff] %v3093_v8  ;;  %v3094_v57 = vmul.f32 %v4728_v56, %v6545_v1  ;;  %4737 = vrcp.f32 %v3066_v5 }
 0xc1b   :  { %v4730_v27 = vpop.eup %4729  ;;  %v3068_v9 = vpop.xlane.xlu1 %3067 }
 0xc1c   :  { %3550 = vst [vmem:[#allocation38 + $0x28] sm:$0xff] %v3094_v57  ;;  %v3099_v32 = vmul.f32 %v4730_v27, %v6551_v43  ;;  %4739 = vrcp.f32 %v3068_v9 }
 0xc1d   :  { %v4732_v39 = vpop.eup %4731  ;;  %v3070_v55 = vpop.xlane.xlu0 %3069 }
 0xc1e   :  { %3555 = vst [vmem:[#allocation38 + $0x50] sm:$0xff] %v3099_v32  ;;  %v3100_v17 = vmul.f32 %v4732_v39, %v6556_v36  ;;  %4741 = vrcp.f32 %v3070_v55 }
 0xc1f   :  { %v4734_v42 = vpop.eup %4733  ;;  %v3072_v35 = vpop.xlane.xlu1 %3071 }
 0xc20   :  { %3556 = vst [vmem:[#allocation38 + $0x58] sm:$0xff] %v3100_v17  ;;  %v3097_v38 = vmul.f32 %v4734_v42, %v6561_v47  ;;  %4743 = vrcp.f32 %v3072_v35 }
 0xc21   :  { %v4736_v1 = vpop.eup %4735 }
 0xc22   :  { %3553 = vst [vmem:[#allocation38 + $0x40] sm:$0xff] %v3097_v38  ;;  %v3098_v44 = vmul.f32 %v4736_v1, %v6566_v61 }
 0xc24   :  { %v4738_v40 = vpop.eup %4737  ;;  %3554 = vst [vmem:[#allocation38 + $0x48] sm:$0xff] %v3098_v44 }
 0xc25   :  { %v3101_v43 = vmul.f32 %v4738_v40, %v6571_v51 }
 0xc26   :  { %v4740_v54 = vpop.eup %4739 }
 0xc27   :  { %3557 = vst [vmem:[#allocation38 + $0x60] sm:$0xff] %v3101_v43  ;;  %v3102_v6 = vmul.f32 %v4740_v54, %v6576_v62 }
 0xc28   :  { %v4742_v36 = vpop.eup %4741 }
 0xc29   :  { %3558 = vst [vmem:[#allocation38 + $0x68] sm:$0xff] %v3102_v6  ;;  %v3103_v2 = vmul.f32 %v4742_v36, %v6581_v12 }
 0xc2a   :  { %v4744_v47 = vpop.eup %4743 }
 0xc2b   :  { %3559 = vst [vmem:[#allocation38 + $0x70] sm:$0xff] %v3103_v2  ;;  %v3104_v26 = vmul.f32 %v4744_v47, %v6587_v0 }
 0xc2d   :  { %3560 = vst [vmem:[#allocation38 + $0x78] sm:$0xff] %v3104_v26 }
 0xc2e   :  { %5300 = shalt.err (!%p5297_p0)
}
 0xc2f   :  { %s5301_s22 = scalar_lea.hbm %s5552_s4, 2048 }
 0xc30   :  { %p5302_p1 = scmp.ne.s32.totalorder %s5552_s4, %s5301_s22  ;;  %p5305_p2 = scmp.lt.u32.totalorder %s5301_s22, %s5552_s4 }
 0xc32   :  { %p5307_p3 = pnand %p5305_p2, %p5302_p1 }
 0xc34   :  { %5310 = shalt.err (!%p5307_p3)
}
 0xc35   :  { %3612 = dma.vmem_to_hbm [thread:$0]  %s3607_s27, 2048, %s5552_s4, [#allocation37], %s5371_s26, %s5371_s26, %s5372_s28  }
 0xc36   :  { %5333 = dma.done.wait [#allocation4], 2048  }
 0xc37   :  { %5334 = vsyncadd [#allocation4], 4294965248 }
 0xc38   :  { %5335 = dma.done.wait [#allocation37], 4096  }
 0xc39   :  { %5336 = vsyncadd [#allocation37], 4294963200 }
 0xc3a   :  { %5337 = dma.done.wait [#allocation40], 2048  }
 0xc3b   :  { %5338 = vsyncadd [#allocation40], 4294965248 }
 0xc3c   :  { %3637 = vsyncpa [#allocation3], 1 }
 0xc3d   :  { %3638 = vsyncpa [#allocation6], 1 }
 0xc3e   :  { %3639 = vsyncpa [#allocation9], 1 }
 0xc3f   :  { %3640 = vsyncpa [#allocation12], 1 }
 0xc40   :  { %3641 = vsyncpa [#allocation15], 1 }
 0xc41   :  { %3642 = vsyncpa [#allocation18], 1 }
 0xc42   :  { %3643 = vsyncpa [#allocation21], 1 }
 0xc43   :  { %3644 = vsyncpa [#allocation24], 1 }
 0xc44   :  { %3645 = vsyncpa [#allocation27], 1 }
 0xc45   :  { %3646 = vsyncpa [#allocation30], 1 }
 0xc46   :  { %3647 = vsyncpa [#allocation33], 1 }
 0xc47   :  { %3648 = vsyncpa [#allocation4], 1 }
 0xc48   :  { %3649 = vsyncpa [#allocation37], 1 }
 0xc49   :  { %3650 = vsyncpa [#allocation40], 1 }

</bundles_post_ra>
